<compile_context>
chip_gen: v6e
topology: v6e:2x2x1
jax: 0.10.0
libtpu: 0.0.40
codegen_flags: <defaults>
</compile_context>

<pallas_src>
import math
import jax
import jax.numpy as jnp
from jax import lax
from jax.experimental import pallas as pl
from jax.experimental.pallas import tpu as pltpu

F_OUT = 256  # GCN_2 second layer output width (fc2 -> 256)


# ----------------------------------------------------------------------------
# Kernel helpers
# ----------------------------------------------------------------------------
def _lower_median_rows(x, n):
    """torch.median(x, dim=0).values for x:[n, F] (lower median, tie-safe)."""
    k = (n - 1) // 2
    less = jnp.zeros(x.shape, jnp.float32)
    leq = jnp.zeros(x.shape, jnp.float32)
    for j in range(n):                       # n is tiny & static -> unrolled
        xj = x[j:j + 1, :]
        less = less + (xj < x).astype(jnp.float32)
        leq = leq + (xj <= x).astype(jnp.float32)
    sel = jnp.logical_and(less <= float(k), leq > float(k))
    return jnp.max(jnp.where(sel, x, -jnp.inf), axis=0, keepdims=True)   # [1, F]


def make_fused_kernel(B, N, n_h, F, use_mask):
    """Fully fused Contrast_2 forward; single grid step, batch folded into rows."""
    BN = B * N

    def kernel(s_ref, adj_ref, dif_ref, w1_ref, b1a_ref, b1b_ref,
               w2a_ref, b2a_ref, w2b_ref, b2b_ref, w0t_ref, scalars_ref, *rest):
        if use_mask:
            msk_ref, logits_ref, hsum_ref = rest
        else:
            logits_ref, hsum_ref = rest

        a1 = scalars_ref[0]        # PReLU slope of gcn1
        a2 = scalars_ref[1]        # PReLU slope of gcn2
        disc_b = scalars_ref[2]    # bilinear bias
        inv_norm = scalars_ref[3]  # 1 / (N * sum(msk)) for masked readout

        s = s_ref[...]             # [2BN, n_in]  rows = [seq1 b0..bB-1 ; seq2 b0..bB-1]
        adjb = adj_ref[...]        # [2BN, 2BN]   block-diag(adj_0..adj_{B-1}, adj_0..)
        difb = dif_ref[...]

        # ---- first FC of BOTH GCNs merged into one dot, then split columns --
        sf = jnp.dot(s, w1_ref[...], preferred_element_type=jnp.float32)   # [2BN, 2*n_h]
        sfa = sf[:, :n_h]
        sfb = sf[:, n_h:]

        # ---------------- gcn1 (adj path): rows = [h1 batches ; h3 batches] --
        oa = jnp.dot(adjb, sfa, preferred_element_type=jnp.float32) + b1a_ref[...]
        fa = jnp.dot(oa, w2a_ref[...], preferred_element_type=jnp.float32)
        ha = jnp.dot(adjb, fa, preferred_element_type=jnp.float32) + b2a_ref[...]
        ha = jnp.where(ha > 0.0, ha, ha * a1)                               # PReLU

        # ---------------- gcn2 (diff path): rows = [h2 batches ; h4 batches] -
        ob = jnp.dot(difb, sfb, preferred_element_type=jnp.float32) + b1b_ref[...]
        fb = jnp.dot(ob, w2b_ref[...], preferred_element_type=jnp.float32)
        hb = jnp.dot(difb, fb, preferred_element_type=jnp.float32) + b2b_ref[...]
        hb = jnp.where(hb > 0.0, hb, hb * a2)                               # PReLU

        h1 = ha[:BN]               # [BN, F]   gcn1(seq1)
        h2 = hb[:BN]               # [BN, F]   gcn2(seq1)
        hsum_ref[...] = h1 + h2

        # ---------------- readout per batch (median or masked mean) ----------
        def readout(h):                            # [BN, F] -> [B, F]
            rows = []
            for b in range(B):                     # B static -> unrolled, tile-aligned slices
                blk = h[b * N:(b + 1) * N, :]      # [N, F]
                if use_mask:
                    m = msk_ref[b * N:(b + 1) * N, :]               # [N, 1]
                    rows.append(jnp.sum(blk * m, axis=0, keepdims=True) * inv_norm)
                else:
                    rows.append(_lower_median_rows(blk, N))         # [1, F]
            return jnp.concatenate(rows, axis=0)                    # [B, F]

        cc = jnp.concatenate([readout(h1), readout(h2)], axis=0)    # [2B, F]  rows: c1 | c2
        cc = 1.0 / (1.0 + jnp.exp(-cc))                             # sigmoid

        # ---------------- discriminator: Bilinear(F, F, 1) on the MXU --------
        # v_i = (W @ c_i)^T computed as c_i @ W^T, all 2B vectors in one dot.
        v = jnp.dot(cc, w0t_ref[...], preferred_element_type=jnp.float32)   # [2B, F]

        # Two dots against the resident activations (no [4N,F] hcat buffer).
        sa = lax.dot_general(v, ha, (((1,), (1,)), ((), ())),
                             preferred_element_type=jnp.float32)            # [2B, 2BN]
        sb = lax.dot_general(v, hb, (((1,), (1,)), ((), ())),
                             preferred_element_type=jnp.float32)            # [2B, 2BN]

        # logits[b] = cat(sc_1, sc_2, sc_3, sc_4) with
        #   sc_1 = v1[b].h2[b]   sc_2 = v2[b].h1[b]
        #   sc_3 = v1[b].h4[b]   sc_4 = v2[b].h3[b]
        # assembled into one lane-dense (1, 4*B*N) row via static slice stores.
        for b in range(B):
            lo = b * N
            c0 = b * 4 * N
            logits_ref[0:1, c0 + 0 * N:c0 + 1 * N] = sb[b:b + 1, lo:lo + N] + disc_b
            logits_ref[0:1, c0 + 1 * N:c0 + 2 * N] = sa[B + b:B + b + 1, lo:lo + N] + disc_b
            logits_ref[0:1, c0 + 2 * N:c0 + 3 * N] = sb[b:b + 1, BN + lo:BN + lo + N] + disc_b
            logits_ref[0:1, c0 + 3 * N:c0 + 4 * N] = sa[B + b:B + b + 1, BN + lo:BN + lo + N] + disc_b

    return kernel


# ----------------------------------------------------------------------------
# Parameters
# ----------------------------------------------------------------------------
def _xavier(key, shape, fan_in, fan_out):
    bound = math.sqrt(6.0 / (fan_in + fan_out))
    return jax.random.uniform(key, shape, jnp.float32, -bound, bound)


def init_contrast2_params(key, n_in, n_h, F=F_OUT):
    k1, k2, k3, k4, k5 = jax.random.split(key, 5)
    return dict(
        # gcn1
        w1a=_xavier(k1, (n_in, n_h), n_in, n_h),   # fc.weight^T
        b1a=jnp.zeros((1, n_h), jnp.float32),      # bias
        w2a=_xavier(k2, (n_h, F), n_h, F),         # fc2.weight^T
        b2a=jnp.zeros((1, F), jnp.float32),        # bias2
        # gcn2
        w1b=_xavier(k3, (n_in, n_h), n_in, n_h),
        b1b=jnp.zeros((1, n_h), jnp.float32),
        w2b=_xavier(k4, (n_h, F), n_h, F),
        b2b=jnp.zeros((1, F), jnp.float32),
        # discriminator Bilinear(256, 256, 1): store W^T so v = c @ W^T
        w0t=jnp.transpose(_xavier(k5, (F, F), F, F)),
        # scalars
        a1=jnp.float32(0.25),       # PReLU slopes
        a2=jnp.float32(0.25),
        disc_b=jnp.float32(0.0),    # bilinear bias
    )


# ----------------------------------------------------------------------------
# Forward (single fused pallas_call, one grid step)
# ----------------------------------------------------------------------------
def contrast2_forward(params, seq1, seq2, adj, diff, msk=None):
    B, N, n_in = seq1.shape
    n_h = params["w1a"].shape[1]
    F = params["w2a"].shape[1]
    use_mask = msk is not None
    BN = B * N

    # Fold batch + both views into rows: [2BN, n_in].
    s_all = jnp.concatenate([seq1, seq2], axis=0).reshape(2 * BN, n_in)

    # Block-diagonal adjacency over (view, batch): diag(a_0..a_{B-1}, a_0..a_{B-1}).
    # NOTE(scale): fine at N=8 (64x64); for large N switch to per-batch dots
    # instead of materializing zero off-diagonal blocks.
    def big_blockdiag(a):
        a2 = jnp.concatenate([a, a], axis=0)                       # [2B, N, N]
        eye = jnp.eye(2 * B, dtype=a.dtype)
        return jnp.einsum("pq,pij->piqj", eye, a2).reshape(2 * BN, 2 * BN)

    adj_big = big_blockdiag(adj)
    diff_big = big_blockdiag(diff)

    # Merge the two GCNs' first FC weights -> one dot in-kernel.
    w1 = jnp.concatenate([params["w1a"], params["w1b"]], axis=1)   # [n_in, 2*n_h]

    if use_mask:
        # torch: mean(seq*msk, 1) / sum(msk)  ==  sum(seq*msk, 1) / (N * sum(msk))
        inv_norm = (1.0 / (N * jnp.sum(msk.astype(jnp.float32)))).astype(jnp.float32)
    else:
        inv_norm = jnp.float32(0.0)
    scalars = jnp.stack([params["a1"], params["a2"], params["disc_b"], inv_norm])

    inputs = [s_all, adj_big, diff_big, w1,
              params["b1a"], params["b1b"],
              params["w2a"], params["b2a"], params["w2b"], params["b2b"],
              params["w0t"], scalars]
    in_specs = [
        pl.BlockSpec((2 * BN, n_in), lambda i: (0, 0)),             # stacked seq
        pl.BlockSpec((2 * BN, 2 * BN), lambda i: (0, 0)),           # adj (block-diag)
        pl.BlockSpec((2 * BN, 2 * BN), lambda i: (0, 0)),           # diff (block-diag)
        pl.BlockSpec((n_in, 2 * n_h), lambda i: (0, 0)),            # merged fc1 weights
        pl.BlockSpec((1, n_h), lambda i: (0, 0)),                   # b1a
        pl.BlockSpec((1, n_h), lambda i: (0, 0)),                   # b1b
        pl.BlockSpec((n_h, F), lambda i: (0, 0)),                   # w2a
        pl.BlockSpec((1, F), lambda i: (0, 0)),                     # b2a
        pl.BlockSpec((n_h, F), lambda i: (0, 0)),                   # w2b
        pl.BlockSpec((1, F), lambda i: (0, 0)),                     # b2b
        pl.BlockSpec((F, F), lambda i: (0, 0)),                     # w0t
        pl.BlockSpec(memory_space=pltpu.MemorySpace.SMEM),          # scalars
    ]
    if use_mask:
        inputs.append(msk.astype(jnp.float32).reshape(BN, 1))
        in_specs.append(pl.BlockSpec((BN, 1), lambda i: (0, 0)))

    kernel = make_fused_kernel(B, N, n_h, F, use_mask)
    # Single grid step: the whole problem is 64-row dots, so per-step pipeline
    # overhead is paid exactly once.  (On v7x one could use grid=(2,) with two
    # batches folded per step + dimension_semantics=("parallel",) to occupy
    # both TensorCores, but at these sizes the fully collapsed form is fastest.)
    logits_flat, hsum_flat = pl.pallas_call(
        kernel,
        out_shape=(
            jax.ShapeDtypeStruct((1, 4 * BN), jnp.float32),         # lane-dense (1, 128)
            jax.ShapeDtypeStruct((BN, F), jnp.float32),
        ),
        grid=(1,),
        in_specs=in_specs,
        out_specs=(
            pl.BlockSpec((1, 4 * BN), lambda i: (0, 0)),
            pl.BlockSpec((BN, F), lambda i: (0, 0)),
        ),
    )(*inputs)
    return logits_flat.reshape(B, 4 * N), hsum_flat.reshape(B, N, F)


# ----------------------------------------------------------------------------
if __name__ == "__main__":
    B, N, n_in, n_h = 4, 8, 16, 32     # B=4 matches the torch.bmm branch of GCN_2

    key = jax.random.PRNGKey(0)
    kp, k1, k2, k3, k4 = jax.random.split(key, 5)

    params = init_contrast2_params(kp, n_in, n_h)

    seq1 = jax.random.normal(k1, (B, N, n_in), jnp.float32)
    seq2 = jax.random.normal(k2, (B, N, n_in), jnp.float32)
    adj = jax.random.uniform(k3, (B, N, N), jnp.float32) / N
    diff = jax.random.uniform(k4, (B, N, N), jnp.float32) / N

    fwd = jax.jit(contrast2_forward)
    logits, hsum = fwd(params, seq1, seq2, adj, diff, None)
    jax.block_until_ready((logits, hsum))

    assert logits.shape == (B, 4 * N)
    assert hsum.shape == (B, N, F_OUT)
    print("KERNEL_OK")
</pallas_src>

<mosaic_0001>
module attributes {stable_mosaic.version = 11 : i64} {
  func.func @kernel(%arg0: i32, %arg1: memref<64x16xf32, #tpu.memory_space<vmem>>, %arg2: memref<64x64xf32, #tpu.memory_space<vmem>>, %arg3: memref<64x64xf32, #tpu.memory_space<vmem>>, %arg4: memref<16x64xf32, #tpu.memory_space<vmem>>, %arg5: memref<1x32xf32, #tpu.memory_space<vmem>>, %arg6: memref<1x32xf32, #tpu.memory_space<vmem>>, %arg7: memref<32x256xf32, #tpu.memory_space<vmem>>, %arg8: memref<1x256xf32, #tpu.memory_space<vmem>>, %arg9: memref<32x256xf32, #tpu.memory_space<vmem>>, %arg10: memref<1x256xf32, #tpu.memory_space<vmem>>, %arg11: memref<256x256xf32, #tpu.memory_space<vmem>>, %arg12: memref<4xf32, #tpu.memory_space<smem>>, %arg13: memref<1x128xf32, #tpu.memory_space<vmem>>, %arg14: memref<32x256xf32, #tpu.memory_space<vmem>>) attributes {dimension_semantics = [#tpu.dimension_semantics<arbitrary>], iteration_bounds = array<i64: 1>, scalar_prefetch = 0 : i64, scratch_operands = 0 : i64, tpu.core_type = #tpu.core_type<tc>, window_params = [{pipeline_mode = #tpu.pipeline_mode<synchronous>, transform_indices = @transform_0, window_bounds = array<i64: 64, 16>}, {pipeline_mode = #tpu.pipeline_mode<synchronous>, transform_indices = @transform_1, window_bounds = array<i64: 64, 64>}, {pipeline_mode = #tpu.pipeline_mode<synchronous>, transform_indices = @transform_2, window_bounds = array<i64: 64, 64>}, {pipeline_mode = #tpu.pipeline_mode<synchronous>, transform_indices = @transform_3, window_bounds = array<i64: 16, 64>}, {pipeline_mode = #tpu.pipeline_mode<synchronous>, transform_indices = @transform_4, window_bounds = array<i64: 1, 32>}, {pipeline_mode = #tpu.pipeline_mode<synchronous>, transform_indices = @transform_5, window_bounds = array<i64: 1, 32>}, {pipeline_mode = #tpu.pipeline_mode<synchronous>, transform_indices = @transform_6, window_bounds = array<i64: 32, 256>}, {pipeline_mode = #tpu.pipeline_mode<synchronous>, transform_indices = @transform_7, window_bounds = array<i64: 1, 256>}, {pipeline_mode = #tpu.pipeline_mode<synchronous>, transform_indices = @transform_8, window_bounds = array<i64: 32, 256>}, {pipeline_mode = #tpu.pipeline_mode<synchronous>, transform_indices = @transform_9, window_bounds = array<i64: 1, 256>}, {pipeline_mode = #tpu.pipeline_mode<synchronous>, transform_indices = @transform_10, window_bounds = array<i64: 256, 256>}, {transform_indices = @transform_11, window_bounds = array<i64: 4>}, {pipeline_mode = #tpu.pipeline_mode<synchronous>, transform_indices = @transform_12, window_bounds = array<i64: 1, 128>}, {pipeline_mode = #tpu.pipeline_mode<synchronous>, transform_indices = @transform_13, window_bounds = array<i64: 32, 256>}]} {
    %c0 = arith.constant 0 : index
    %0 = memref.load %arg12[%c0] : memref<4xf32, #tpu.memory_space<smem>>
    %c1 = arith.constant 1 : index
    %1 = memref.load %arg12[%c1] : memref<4xf32, #tpu.memory_space<smem>>
    %c2 = arith.constant 2 : index
    %2 = memref.load %arg12[%c2] : memref<4xf32, #tpu.memory_space<smem>>
    %c0_0 = arith.constant 0 : index
    %c0_1 = arith.constant 0 : index
    %3 = vector.load %arg1[%c0_0, %c0_1] : memref<64x16xf32, #tpu.memory_space<vmem>>, vector<64x16xf32>
    %c0_2 = arith.constant 0 : index
    %c0_3 = arith.constant 0 : index
    %4 = vector.load %arg2[%c0_2, %c0_3] : memref<64x64xf32, #tpu.memory_space<vmem>>, vector<64x64xf32>
    %c0_4 = arith.constant 0 : index
    %c0_5 = arith.constant 0 : index
    %5 = vector.load %arg3[%c0_4, %c0_5] : memref<64x64xf32, #tpu.memory_space<vmem>>, vector<64x64xf32>
    %c0_6 = arith.constant 0 : index
    %c0_7 = arith.constant 0 : index
    %6 = vector.load %arg4[%c0_6, %c0_7] : memref<16x64xf32, #tpu.memory_space<vmem>>, vector<16x64xf32>
    %cst = arith.constant dense<0.000000e+00> : vector<64x64xf32>
    %7 = tpu.matmul %3, %6, %cst {dimension_numbers = #tpu.dot_dimension_numbers<[1], [0], [0], [1], [0, 0, 1, 1], [], []>} : vector<64x16xf32>, vector<16x64xf32>, vector<64x64xf32> -> vector<64x64xf32>
    %8 = vector.extract_strided_slice %7 {offsets = [0, 0], sizes = [64, 32], strides = [1, 1]} : vector<64x64xf32> to vector<64x32xf32>
    %9 = vector.extract_strided_slice %7 {offsets = [0, 32], sizes = [64, 32], strides = [1, 1]} : vector<64x64xf32> to vector<64x32xf32>
    %cst_8 = arith.constant dense<0.000000e+00> : vector<64x32xf32>
    %10 = tpu.matmul %4, %8, %cst_8 {dimension_numbers = #tpu.dot_dimension_numbers<[1], [0], [0], [1], [0, 0, 1, 1], [], []>} : vector<64x64xf32>, vector<64x32xf32>, vector<64x32xf32> -> vector<64x32xf32>
    %c0_9 = arith.constant 0 : index
    %c0_10 = arith.constant 0 : index
    %11 = vector.load %arg5[%c0_9, %c0_10] : memref<1x32xf32, #tpu.memory_space<vmem>>, vector<1x32xf32>
    %12 = vector.broadcast %11 : vector<1x32xf32> to vector<64x32xf32>
    %13 = arith.addf %10, %12 : vector<64x32xf32>
    %c0_11 = arith.constant 0 : index
    %c0_12 = arith.constant 0 : index
    %14 = vector.load %arg7[%c0_11, %c0_12] : memref<32x256xf32, #tpu.memory_space<vmem>>, vector<32x256xf32>
    %cst_13 = arith.constant dense<0.000000e+00> : vector<64x256xf32>
    %15 = tpu.matmul %13, %14, %cst_13 {dimension_numbers = #tpu.dot_dimension_numbers<[1], [0], [0], [1], [0, 0, 1, 1], [], []>} : vector<64x32xf32>, vector<32x256xf32>, vector<64x256xf32> -> vector<64x256xf32>
    %cst_14 = arith.constant dense<0.000000e+00> : vector<64x256xf32>
    %16 = tpu.matmul %4, %15, %cst_14 {dimension_numbers = #tpu.dot_dimension_numbers<[1], [0], [0], [1], [0, 0, 1, 1], [], []>} : vector<64x64xf32>, vector<64x256xf32>, vector<64x256xf32> -> vector<64x256xf32>
    %c0_15 = arith.constant 0 : index
    %c0_16 = arith.constant 0 : index
    %17 = vector.load %arg8[%c0_15, %c0_16] : memref<1x256xf32, #tpu.memory_space<vmem>>, vector<1x256xf32>
    %18 = vector.broadcast %17 : vector<1x256xf32> to vector<64x256xf32>
    %19 = arith.addf %16, %18 : vector<64x256xf32>
    %cst_17 = arith.constant 0.000000e+00 : f32
    %20 = vector.broadcast %cst_17 : f32 to vector<64x256xf32>
    %21 = arith.cmpf ogt, %19, %20 : vector<64x256xf32>
    %22 = vector.broadcast %0 : f32 to vector<64x256xf32>
    %23 = arith.mulf %19, %22 : vector<64x256xf32>
    %24 = arith.select %21, %19, %23 : vector<64x256xi1>, vector<64x256xf32>
    %cst_18 = arith.constant dense<0.000000e+00> : vector<64x32xf32>
    %25 = tpu.matmul %5, %9, %cst_18 {dimension_numbers = #tpu.dot_dimension_numbers<[1], [0], [0], [1], [0, 0, 1, 1], [], []>} : vector<64x64xf32>, vector<64x32xf32>, vector<64x32xf32> -> vector<64x32xf32>
    %c0_19 = arith.constant 0 : index
    %c0_20 = arith.constant 0 : index
    %26 = vector.load %arg6[%c0_19, %c0_20] : memref<1x32xf32, #tpu.memory_space<vmem>>, vector<1x32xf32>
    %27 = vector.broadcast %26 : vector<1x32xf32> to vector<64x32xf32>
    %28 = arith.addf %25, %27 : vector<64x32xf32>
    %c0_21 = arith.constant 0 : index
    %c0_22 = arith.constant 0 : index
    %29 = vector.load %arg9[%c0_21, %c0_22] : memref<32x256xf32, #tpu.memory_space<vmem>>, vector<32x256xf32>
    %cst_23 = arith.constant dense<0.000000e+00> : vector<64x256xf32>
    %30 = tpu.matmul %28, %29, %cst_23 {dimension_numbers = #tpu.dot_dimension_numbers<[1], [0], [0], [1], [0, 0, 1, 1], [], []>} : vector<64x32xf32>, vector<32x256xf32>, vector<64x256xf32> -> vector<64x256xf32>
    %cst_24 = arith.constant dense<0.000000e+00> : vector<64x256xf32>
    %31 = tpu.matmul %5, %30, %cst_24 {dimension_numbers = #tpu.dot_dimension_numbers<[1], [0], [0], [1], [0, 0, 1, 1], [], []>} : vector<64x64xf32>, vector<64x256xf32>, vector<64x256xf32> -> vector<64x256xf32>
    %c0_25 = arith.constant 0 : index
    %c0_26 = arith.constant 0 : index
    %32 = vector.load %arg10[%c0_25, %c0_26] : memref<1x256xf32, #tpu.memory_space<vmem>>, vector<1x256xf32>
    %33 = vector.broadcast %32 : vector<1x256xf32> to vector<64x256xf32>
    %34 = arith.addf %31, %33 : vector<64x256xf32>
    %cst_27 = arith.constant 0.000000e+00 : f32
    %35 = vector.broadcast %cst_27 : f32 to vector<64x256xf32>
    %36 = arith.cmpf ogt, %34, %35 : vector<64x256xf32>
    %37 = vector.broadcast %1 : f32 to vector<64x256xf32>
    %38 = arith.mulf %34, %37 : vector<64x256xf32>
    %39 = arith.select %36, %34, %38 : vector<64x256xi1>, vector<64x256xf32>
    %40 = vector.extract_strided_slice %24 {offsets = [0, 0], sizes = [32, 256], strides = [1, 1]} : vector<64x256xf32> to vector<32x256xf32>
    %41 = vector.extract_strided_slice %39 {offsets = [0, 0], sizes = [32, 256], strides = [1, 1]} : vector<64x256xf32> to vector<32x256xf32>
    %42 = arith.addf %40, %41 : vector<32x256xf32>
    %c0_28 = arith.constant 0 : index
    %c0_29 = arith.constant 0 : index
    %43 = vector.load %arg14[%c0_28, %c0_29] : memref<32x256xf32, #tpu.memory_space<vmem>>, vector<32x256xf32>
    tpu.vector_store %arg14[%c0_28, %c0_29], %42 {strides = array<i32>} : memref<32x256xf32, #tpu.memory_space<vmem>>, vector<32x256xf32>,
    %44 = vector.extract_strided_slice %40 {offsets = [0, 0], sizes = [8, 256], strides = [1, 1]} : vector<32x256xf32> to vector<8x256xf32>
    %cst_30 = arith.constant 0.000000e+00 : f32
    %45 = vector.broadcast %cst_30 : f32 to vector<8x256xf32>
    %cst_31 = arith.constant 0.000000e+00 : f32
    %46 = vector.broadcast %cst_31 : f32 to vector<8x256xf32>
    %47 = vector.extract_strided_slice %44 {offsets = [0, 0], sizes = [1, 256], strides = [1, 1]} : vector<8x256xf32> to vector<1x256xf32>
    %48 = vector.broadcast %47 : vector<1x256xf32> to vector<8x256xf32>
    %49 = arith.cmpf olt, %48, %44 : vector<8x256xf32>
    %50 = arith.extui %49 : vector<8x256xi1> to vector<8x256xi32>
    %51 = arith.sitofp %50 : vector<8x256xi32> to vector<8x256xf32>
    %52 = arith.addf %45, %51 : vector<8x256xf32>
    %53 = vector.broadcast %47 : vector<1x256xf32> to vector<8x256xf32>
    %54 = arith.cmpf ole, %53, %44 : vector<8x256xf32>
    %55 = arith.extui %54 : vector<8x256xi1> to vector<8x256xi32>
    %56 = arith.sitofp %55 : vector<8x256xi32> to vector<8x256xf32>
    %57 = arith.addf %46, %56 : vector<8x256xf32>
    %58 = vector.extract_strided_slice %44 {offsets = [1, 0], sizes = [1, 256], strides = [1, 1]} : vector<8x256xf32> to vector<1x256xf32>
    %59 = vector.broadcast %58 : vector<1x256xf32> to vector<8x256xf32>
    %60 = arith.cmpf olt, %59, %44 : vector<8x256xf32>
    %61 = arith.extui %60 : vector<8x256xi1> to vector<8x256xi32>
    %62 = arith.sitofp %61 : vector<8x256xi32> to vector<8x256xf32>
    %63 = arith.addf %52, %62 : vector<8x256xf32>
    %64 = vector.broadcast %58 : vector<1x256xf32> to vector<8x256xf32>
    %65 = arith.cmpf ole, %64, %44 : vector<8x256xf32>
    %66 = arith.extui %65 : vector<8x256xi1> to vector<8x256xi32>
    %67 = arith.sitofp %66 : vector<8x256xi32> to vector<8x256xf32>
    %68 = arith.addf %57, %67 : vector<8x256xf32>
    %69 = vector.extract_strided_slice %44 {offsets = [2, 0], sizes = [1, 256], strides = [1, 1]} : vector<8x256xf32> to vector<1x256xf32>
    %70 = vector.broadcast %69 : vector<1x256xf32> to vector<8x256xf32>
    %71 = arith.cmpf olt, %70, %44 : vector<8x256xf32>
    %72 = arith.extui %71 : vector<8x256xi1> to vector<8x256xi32>
    %73 = arith.sitofp %72 : vector<8x256xi32> to vector<8x256xf32>
    %74 = arith.addf %63, %73 : vector<8x256xf32>
    %75 = vector.broadcast %69 : vector<1x256xf32> to vector<8x256xf32>
    %76 = arith.cmpf ole, %75, %44 : vector<8x256xf32>
    %77 = arith.extui %76 : vector<8x256xi1> to vector<8x256xi32>
    %78 = arith.sitofp %77 : vector<8x256xi32> to vector<8x256xf32>
    %79 = arith.addf %68, %78 : vector<8x256xf32>
    %80 = vector.extract_strided_slice %44 {offsets = [3, 0], sizes = [1, 256], strides = [1, 1]} : vector<8x256xf32> to vector<1x256xf32>
    %81 = vector.broadcast %80 : vector<1x256xf32> to vector<8x256xf32>
    %82 = arith.cmpf olt, %81, %44 : vector<8x256xf32>
    %83 = arith.extui %82 : vector<8x256xi1> to vector<8x256xi32>
    %84 = arith.sitofp %83 : vector<8x256xi32> to vector<8x256xf32>
    %85 = arith.addf %74, %84 : vector<8x256xf32>
    %86 = vector.broadcast %80 : vector<1x256xf32> to vector<8x256xf32>
    %87 = arith.cmpf ole, %86, %44 : vector<8x256xf32>
    %88 = arith.extui %87 : vector<8x256xi1> to vector<8x256xi32>
    %89 = arith.sitofp %88 : vector<8x256xi32> to vector<8x256xf32>
    %90 = arith.addf %79, %89 : vector<8x256xf32>
    %91 = vector.extract_strided_slice %44 {offsets = [4, 0], sizes = [1, 256], strides = [1, 1]} : vector<8x256xf32> to vector<1x256xf32>
    %92 = vector.broadcast %91 : vector<1x256xf32> to vector<8x256xf32>
    %93 = arith.cmpf olt, %92, %44 : vector<8x256xf32>
    %94 = arith.extui %93 : vector<8x256xi1> to vector<8x256xi32>
    %95 = arith.sitofp %94 : vector<8x256xi32> to vector<8x256xf32>
    %96 = arith.addf %85, %95 : vector<8x256xf32>
    %97 = vector.broadcast %91 : vector<1x256xf32> to vector<8x256xf32>
    %98 = arith.cmpf ole, %97, %44 : vector<8x256xf32>
    %99 = arith.extui %98 : vector<8x256xi1> to vector<8x256xi32>
    %100 = arith.sitofp %99 : vector<8x256xi32> to vector<8x256xf32>
    %101 = arith.addf %90, %100 : vector<8x256xf32>
    %102 = vector.extract_strided_slice %44 {offsets = [5, 0], sizes = [1, 256], strides = [1, 1]} : vector<8x256xf32> to vector<1x256xf32>
    %103 = vector.broadcast %102 : vector<1x256xf32> to vector<8x256xf32>
    %104 = arith.cmpf olt, %103, %44 : vector<8x256xf32>
    %105 = arith.extui %104 : vector<8x256xi1> to vector<8x256xi32>
    %106 = arith.sitofp %105 : vector<8x256xi32> to vector<8x256xf32>
    %107 = arith.addf %96, %106 : vector<8x256xf32>
    %108 = vector.broadcast %102 : vector<1x256xf32> to vector<8x256xf32>
    %109 = arith.cmpf ole, %108, %44 : vector<8x256xf32>
    %110 = arith.extui %109 : vector<8x256xi1> to vector<8x256xi32>
    %111 = arith.sitofp %110 : vector<8x256xi32> to vector<8x256xf32>
    %112 = arith.addf %101, %111 : vector<8x256xf32>
    %113 = vector.extract_strided_slice %44 {offsets = [6, 0], sizes = [1, 256], strides = [1, 1]} : vector<8x256xf32> to vector<1x256xf32>
    %114 = vector.broadcast %113 : vector<1x256xf32> to vector<8x256xf32>
    %115 = arith.cmpf olt, %114, %44 : vector<8x256xf32>
    %116 = arith.extui %115 : vector<8x256xi1> to vector<8x256xi32>
    %117 = arith.sitofp %116 : vector<8x256xi32> to vector<8x256xf32>
    %118 = arith.addf %107, %117 : vector<8x256xf32>
    %119 = vector.broadcast %113 : vector<1x256xf32> to vector<8x256xf32>
    %120 = arith.cmpf ole, %119, %44 : vector<8x256xf32>
    %121 = arith.extui %120 : vector<8x256xi1> to vector<8x256xi32>
    %122 = arith.sitofp %121 : vector<8x256xi32> to vector<8x256xf32>
    %123 = arith.addf %112, %122 : vector<8x256xf32>
    %124 = vector.extract_strided_slice %44 {offsets = [7, 0], sizes = [1, 256], strides = [1, 1]} : vector<8x256xf32> to vector<1x256xf32>
    %125 = vector.broadcast %124 : vector<1x256xf32> to vector<8x256xf32>
    %126 = arith.cmpf olt, %125, %44 : vector<8x256xf32>
    %127 = arith.extui %126 : vector<8x256xi1> to vector<8x256xi32>
    %128 = arith.sitofp %127 : vector<8x256xi32> to vector<8x256xf32>
    %129 = arith.addf %118, %128 : vector<8x256xf32>
    %130 = vector.broadcast %124 : vector<1x256xf32> to vector<8x256xf32>
    %131 = arith.cmpf ole, %130, %44 : vector<8x256xf32>
    %132 = arith.extui %131 : vector<8x256xi1> to vector<8x256xi32>
    %133 = arith.sitofp %132 : vector<8x256xi32> to vector<8x256xf32>
    %134 = arith.addf %123, %133 : vector<8x256xf32>
    %cst_32 = arith.constant 3.000000e+00 : f32
    %135 = vector.broadcast %cst_32 : f32 to vector<8x256xf32>
    %136 = arith.cmpf ole, %129, %135 : vector<8x256xf32>
    %cst_33 = arith.constant 3.000000e+00 : f32
    %137 = vector.broadcast %cst_33 : f32 to vector<8x256xf32>
    %138 = arith.cmpf ogt, %134, %137 : vector<8x256xf32>
    %139 = arith.andi %136, %138 : vector<8x256xi1>
    %cst_34 = arith.constant 0xFF800000 : f32
    %140 = vector.broadcast %cst_34 : f32 to vector<8x256xf32>
    %141 = arith.select %139, %44, %140 : vector<8x256xi1>, vector<8x256xf32>
    %cst_35 = arith.constant dense<0xFF800000> : vector<256xf32>
    %142 = vector.multi_reduction <maximumf>, %141, %cst_35 [0] : vector<8x256xf32> to vector<256xf32>
    %143 = vector.shape_cast %142 : vector<256xf32> to vector<1x256xf32>
    %144 = vector.extract_strided_slice %40 {offsets = [8, 0], sizes = [8, 256], strides = [1, 1]} : vector<32x256xf32> to vector<8x256xf32>
    %cst_36 = arith.constant 0.000000e+00 : f32
    %145 = vector.broadcast %cst_36 : f32 to vector<8x256xf32>
    %cst_37 = arith.constant 0.000000e+00 : f32
    %146 = vector.broadcast %cst_37 : f32 to vector<8x256xf32>
    %147 = vector.extract_strided_slice %144 {offsets = [0, 0], sizes = [1, 256], strides = [1, 1]} : vector<8x256xf32> to vector<1x256xf32>
    %148 = vector.broadcast %147 : vector<1x256xf32> to vector<8x256xf32>
    %149 = arith.cmpf olt, %148, %144 : vector<8x256xf32>
    %150 = arith.extui %149 : vector<8x256xi1> to vector<8x256xi32>
    %151 = arith.sitofp %150 : vector<8x256xi32> to vector<8x256xf32>
    %152 = arith.addf %145, %151 : vector<8x256xf32>
    %153 = vector.broadcast %147 : vector<1x256xf32> to vector<8x256xf32>
    %154 = arith.cmpf ole, %153, %144 : vector<8x256xf32>
    %155 = arith.extui %154 : vector<8x256xi1> to vector<8x256xi32>
    %156 = arith.sitofp %155 : vector<8x256xi32> to vector<8x256xf32>
    %157 = arith.addf %146, %156 : vector<8x256xf32>
    %158 = vector.extract_strided_slice %144 {offsets = [1, 0], sizes = [1, 256], strides = [1, 1]} : vector<8x256xf32> to vector<1x256xf32>
    %159 = vector.broadcast %158 : vector<1x256xf32> to vector<8x256xf32>
    %160 = arith.cmpf olt, %159, %144 : vector<8x256xf32>
    %161 = arith.extui %160 : vector<8x256xi1> to vector<8x256xi32>
    %162 = arith.sitofp %161 : vector<8x256xi32> to vector<8x256xf32>
    %163 = arith.addf %152, %162 : vector<8x256xf32>
    %164 = vector.broadcast %158 : vector<1x256xf32> to vector<8x256xf32>
    %165 = arith.cmpf ole, %164, %144 : vector<8x256xf32>
    %166 = arith.extui %165 : vector<8x256xi1> to vector<8x256xi32>
    %167 = arith.sitofp %166 : vector<8x256xi32> to vector<8x256xf32>
    %168 = arith.addf %157, %167 : vector<8x256xf32>
    %169 = vector.extract_strided_slice %144 {offsets = [2, 0], sizes = [1, 256], strides = [1, 1]} : vector<8x256xf32> to vector<1x256xf32>
    %170 = vector.broadcast %169 : vector<1x256xf32> to vector<8x256xf32>
    %171 = arith.cmpf olt, %170, %144 : vector<8x256xf32>
    %172 = arith.extui %171 : vector<8x256xi1> to vector<8x256xi32>
    %173 = arith.sitofp %172 : vector<8x256xi32> to vector<8x256xf32>
    %174 = arith.addf %163, %173 : vector<8x256xf32>
    %175 = vector.broadcast %169 : vector<1x256xf32> to vector<8x256xf32>
    %176 = arith.cmpf ole, %175, %144 : vector<8x256xf32>
    %177 = arith.extui %176 : vector<8x256xi1> to vector<8x256xi32>
    %178 = arith.sitofp %177 : vector<8x256xi32> to vector<8x256xf32>
    %179 = arith.addf %168, %178 : vector<8x256xf32>
    %180 = vector.extract_strided_slice %144 {offsets = [3, 0], sizes = [1, 256], strides = [1, 1]} : vector<8x256xf32> to vector<1x256xf32>
    %181 = vector.broadcast %180 : vector<1x256xf32> to vector<8x256xf32>
    %182 = arith.cmpf olt, %181, %144 : vector<8x256xf32>
    %183 = arith.extui %182 : vector<8x256xi1> to vector<8x256xi32>
    %184 = arith.sitofp %183 : vector<8x256xi32> to vector<8x256xf32>
    %185 = arith.addf %174, %184 : vector<8x256xf32>
    %186 = vector.broadcast %180 : vector<1x256xf32> to vector<8x256xf32>
    %187 = arith.cmpf ole, %186, %144 : vector<8x256xf32>
    %188 = arith.extui %187 : vector<8x256xi1> to vector<8x256xi32>
    %189 = arith.sitofp %188 : vector<8x256xi32> to vector<8x256xf32>
    %190 = arith.addf %179, %189 : vector<8x256xf32>
    %191 = vector.extract_strided_slice %144 {offsets = [4, 0], sizes = [1, 256], strides = [1, 1]} : vector<8x256xf32> to vector<1x256xf32>
    %192 = vector.broadcast %191 : vector<1x256xf32> to vector<8x256xf32>
    %193 = arith.cmpf olt, %192, %144 : vector<8x256xf32>
    %194 = arith.extui %193 : vector<8x256xi1> to vector<8x256xi32>
    %195 = arith.sitofp %194 : vector<8x256xi32> to vector<8x256xf32>
    %196 = arith.addf %185, %195 : vector<8x256xf32>
    %197 = vector.broadcast %191 : vector<1x256xf32> to vector<8x256xf32>
    %198 = arith.cmpf ole, %197, %144 : vector<8x256xf32>
    %199 = arith.extui %198 : vector<8x256xi1> to vector<8x256xi32>
    %200 = arith.sitofp %199 : vector<8x256xi32> to vector<8x256xf32>
    %201 = arith.addf %190, %200 : vector<8x256xf32>
    %202 = vector.extract_strided_slice %144 {offsets = [5, 0], sizes = [1, 256], strides = [1, 1]} : vector<8x256xf32> to vector<1x256xf32>
    %203 = vector.broadcast %202 : vector<1x256xf32> to vector<8x256xf32>
    %204 = arith.cmpf olt, %203, %144 : vector<8x256xf32>
    %205 = arith.extui %204 : vector<8x256xi1> to vector<8x256xi32>
    %206 = arith.sitofp %205 : vector<8x256xi32> to vector<8x256xf32>
    %207 = arith.addf %196, %206 : vector<8x256xf32>
    %208 = vector.broadcast %202 : vector<1x256xf32> to vector<8x256xf32>
    %209 = arith.cmpf ole, %208, %144 : vector<8x256xf32>
    %210 = arith.extui %209 : vector<8x256xi1> to vector<8x256xi32>
    %211 = arith.sitofp %210 : vector<8x256xi32> to vector<8x256xf32>
    %212 = arith.addf %201, %211 : vector<8x256xf32>
    %213 = vector.extract_strided_slice %144 {offsets = [6, 0], sizes = [1, 256], strides = [1, 1]} : vector<8x256xf32> to vector<1x256xf32>
    %214 = vector.broadcast %213 : vector<1x256xf32> to vector<8x256xf32>
    %215 = arith.cmpf olt, %214, %144 : vector<8x256xf32>
    %216 = arith.extui %215 : vector<8x256xi1> to vector<8x256xi32>
    %217 = arith.sitofp %216 : vector<8x256xi32> to vector<8x256xf32>
    %218 = arith.addf %207, %217 : vector<8x256xf32>
    %219 = vector.broadcast %213 : vector<1x256xf32> to vector<8x256xf32>
    %220 = arith.cmpf ole, %219, %144 : vector<8x256xf32>
    %221 = arith.extui %220 : vector<8x256xi1> to vector<8x256xi32>
    %222 = arith.sitofp %221 : vector<8x256xi32> to vector<8x256xf32>
    %223 = arith.addf %212, %222 : vector<8x256xf32>
    %224 = vector.extract_strided_slice %144 {offsets = [7, 0], sizes = [1, 256], strides = [1, 1]} : vector<8x256xf32> to vector<1x256xf32>
    %225 = vector.broadcast %224 : vector<1x256xf32> to vector<8x256xf32>
    %226 = arith.cmpf olt, %225, %144 : vector<8x256xf32>
    %227 = arith.extui %226 : vector<8x256xi1> to vector<8x256xi32>
    %228 = arith.sitofp %227 : vector<8x256xi32> to vector<8x256xf32>
    %229 = arith.addf %218, %228 : vector<8x256xf32>
    %230 = vector.broadcast %224 : vector<1x256xf32> to vector<8x256xf32>
    %231 = arith.cmpf ole, %230, %144 : vector<8x256xf32>
    %232 = arith.extui %231 : vector<8x256xi1> to vector<8x256xi32>
    %233 = arith.sitofp %232 : vector<8x256xi32> to vector<8x256xf32>
    %234 = arith.addf %223, %233 : vector<8x256xf32>
    %cst_38 = arith.constant 3.000000e+00 : f32
    %235 = vector.broadcast %cst_38 : f32 to vector<8x256xf32>
    %236 = arith.cmpf ole, %229, %235 : vector<8x256xf32>
    %cst_39 = arith.constant 3.000000e+00 : f32
    %237 = vector.broadcast %cst_39 : f32 to vector<8x256xf32>
    %238 = arith.cmpf ogt, %234, %237 : vector<8x256xf32>
    %239 = arith.andi %236, %238 : vector<8x256xi1>
    %cst_40 = arith.constant 0xFF800000 : f32
    %240 = vector.broadcast %cst_40 : f32 to vector<8x256xf32>
    %241 = arith.select %239, %144, %240 : vector<8x256xi1>, vector<8x256xf32>
    %cst_41 = arith.constant dense<0xFF800000> : vector<256xf32>
    %242 = vector.multi_reduction <maximumf>, %241, %cst_41 [0] : vector<8x256xf32> to vector<256xf32>
    %243 = vector.shape_cast %242 : vector<256xf32> to vector<1x256xf32>
    %244 = vector.extract_strided_slice %40 {offsets = [16, 0], sizes = [8, 256], strides = [1, 1]} : vector<32x256xf32> to vector<8x256xf32>
    %cst_42 = arith.constant 0.000000e+00 : f32
    %245 = vector.broadcast %cst_42 : f32 to vector<8x256xf32>
    %cst_43 = arith.constant 0.000000e+00 : f32
    %246 = vector.broadcast %cst_43 : f32 to vector<8x256xf32>
    %247 = vector.extract_strided_slice %244 {offsets = [0, 0], sizes = [1, 256], strides = [1, 1]} : vector<8x256xf32> to vector<1x256xf32>
    %248 = vector.broadcast %247 : vector<1x256xf32> to vector<8x256xf32>
    %249 = arith.cmpf olt, %248, %244 : vector<8x256xf32>
    %250 = arith.extui %249 : vector<8x256xi1> to vector<8x256xi32>
    %251 = arith.sitofp %250 : vector<8x256xi32> to vector<8x256xf32>
    %252 = arith.addf %245, %251 : vector<8x256xf32>
    %253 = vector.broadcast %247 : vector<1x256xf32> to vector<8x256xf32>
    %254 = arith.cmpf ole, %253, %244 : vector<8x256xf32>
    %255 = arith.extui %254 : vector<8x256xi1> to vector<8x256xi32>
    %256 = arith.sitofp %255 : vector<8x256xi32> to vector<8x256xf32>
    %257 = arith.addf %246, %256 : vector<8x256xf32>
    %258 = vector.extract_strided_slice %244 {offsets = [1, 0], sizes = [1, 256], strides = [1, 1]} : vector<8x256xf32> to vector<1x256xf32>
    %259 = vector.broadcast %258 : vector<1x256xf32> to vector<8x256xf32>
    %260 = arith.cmpf olt, %259, %244 : vector<8x256xf32>
    %261 = arith.extui %260 : vector<8x256xi1> to vector<8x256xi32>
    %262 = arith.sitofp %261 : vector<8x256xi32> to vector<8x256xf32>
    %263 = arith.addf %252, %262 : vector<8x256xf32>
    %264 = vector.broadcast %258 : vector<1x256xf32> to vector<8x256xf32>
    %265 = arith.cmpf ole, %264, %244 : vector<8x256xf32>
    %266 = arith.extui %265 : vector<8x256xi1> to vector<8x256xi32>
    %267 = arith.sitofp %266 : vector<8x256xi32> to vector<8x256xf32>
    %268 = arith.addf %257, %267 : vector<8x256xf32>
    %269 = vector.extract_strided_slice %244 {offsets = [2, 0], sizes = [1, 256], strides = [1, 1]} : vector<8x256xf32> to vector<1x256xf32>
    %270 = vector.broadcast %269 : vector<1x256xf32> to vector<8x256xf32>
    %271 = arith.cmpf olt, %270, %244 : vector<8x256xf32>
    %272 = arith.extui %271 : vector<8x256xi1> to vector<8x256xi32>
    %273 = arith.sitofp %272 : vector<8x256xi32> to vector<8x256xf32>
    %274 = arith.addf %263, %273 : vector<8x256xf32>
    %275 = vector.broadcast %269 : vector<1x256xf32> to vector<8x256xf32>
    %276 = arith.cmpf ole, %275, %244 : vector<8x256xf32>
    %277 = arith.extui %276 : vector<8x256xi1> to vector<8x256xi32>
    %278 = arith.sitofp %277 : vector<8x256xi32> to vector<8x256xf32>
    %279 = arith.addf %268, %278 : vector<8x256xf32>
    %280 = vector.extract_strided_slice %244 {offsets = [3, 0], sizes = [1, 256], strides = [1, 1]} : vector<8x256xf32> to vector<1x256xf32>
    %281 = vector.broadcast %280 : vector<1x256xf32> to vector<8x256xf32>
    %282 = arith.cmpf olt, %281, %244 : vector<8x256xf32>
    %283 = arith.extui %282 : vector<8x256xi1> to vector<8x256xi32>
    %284 = arith.sitofp %283 : vector<8x256xi32> to vector<8x256xf32>
    %285 = arith.addf %274, %284 : vector<8x256xf32>
    %286 = vector.broadcast %280 : vector<1x256xf32> to vector<8x256xf32>
    %287 = arith.cmpf ole, %286, %244 : vector<8x256xf32>
    %288 = arith.extui %287 : vector<8x256xi1> to vector<8x256xi32>
    %289 = arith.sitofp %288 : vector<8x256xi32> to vector<8x256xf32>
    %290 = arith.addf %279, %289 : vector<8x256xf32>
    %291 = vector.extract_strided_slice %244 {offsets = [4, 0], sizes = [1, 256], strides = [1, 1]} : vector<8x256xf32> to vector<1x256xf32>
    %292 = vector.broadcast %291 : vector<1x256xf32> to vector<8x256xf32>
    %293 = arith.cmpf olt, %292, %244 : vector<8x256xf32>
    %294 = arith.extui %293 : vector<8x256xi1> to vector<8x256xi32>
    %295 = arith.sitofp %294 : vector<8x256xi32> to vector<8x256xf32>
    %296 = arith.addf %285, %295 : vector<8x256xf32>
    %297 = vector.broadcast %291 : vector<1x256xf32> to vector<8x256xf32>
    %298 = arith.cmpf ole, %297, %244 : vector<8x256xf32>
    %299 = arith.extui %298 : vector<8x256xi1> to vector<8x256xi32>
    %300 = arith.sitofp %299 : vector<8x256xi32> to vector<8x256xf32>
    %301 = arith.addf %290, %300 : vector<8x256xf32>
    %302 = vector.extract_strided_slice %244 {offsets = [5, 0], sizes = [1, 256], strides = [1, 1]} : vector<8x256xf32> to vector<1x256xf32>
    %303 = vector.broadcast %302 : vector<1x256xf32> to vector<8x256xf32>
    %304 = arith.cmpf olt, %303, %244 : vector<8x256xf32>
    %305 = arith.extui %304 : vector<8x256xi1> to vector<8x256xi32>
    %306 = arith.sitofp %305 : vector<8x256xi32> to vector<8x256xf32>
    %307 = arith.addf %296, %306 : vector<8x256xf32>
    %308 = vector.broadcast %302 : vector<1x256xf32> to vector<8x256xf32>
    %309 = arith.cmpf ole, %308, %244 : vector<8x256xf32>
    %310 = arith.extui %309 : vector<8x256xi1> to vector<8x256xi32>
    %311 = arith.sitofp %310 : vector<8x256xi32> to vector<8x256xf32>
    %312 = arith.addf %301, %311 : vector<8x256xf32>
    %313 = vector.extract_strided_slice %244 {offsets = [6, 0], sizes = [1, 256], strides = [1, 1]} : vector<8x256xf32> to vector<1x256xf32>
    %314 = vector.broadcast %313 : vector<1x256xf32> to vector<8x256xf32>
    %315 = arith.cmpf olt, %314, %244 : vector<8x256xf32>
    %316 = arith.extui %315 : vector<8x256xi1> to vector<8x256xi32>
    %317 = arith.sitofp %316 : vector<8x256xi32> to vector<8x256xf32>
    %318 = arith.addf %307, %317 : vector<8x256xf32>
    %319 = vector.broadcast %313 : vector<1x256xf32> to vector<8x256xf32>
    %320 = arith.cmpf ole, %319, %244 : vector<8x256xf32>
    %321 = arith.extui %320 : vector<8x256xi1> to vector<8x256xi32>
    %322 = arith.sitofp %321 : vector<8x256xi32> to vector<8x256xf32>
    %323 = arith.addf %312, %322 : vector<8x256xf32>
    %324 = vector.extract_strided_slice %244 {offsets = [7, 0], sizes = [1, 256], strides = [1, 1]} : vector<8x256xf32> to vector<1x256xf32>
    %325 = vector.broadcast %324 : vector<1x256xf32> to vector<8x256xf32>
    %326 = arith.cmpf olt, %325, %244 : vector<8x256xf32>
    %327 = arith.extui %326 : vector<8x256xi1> to vector<8x256xi32>
    %328 = arith.sitofp %327 : vector<8x256xi32> to vector<8x256xf32>
    %329 = arith.addf %318, %328 : vector<8x256xf32>
    %330 = vector.broadcast %324 : vector<1x256xf32> to vector<8x256xf32>
    %331 = arith.cmpf ole, %330, %244 : vector<8x256xf32>
    %332 = arith.extui %331 : vector<8x256xi1> to vector<8x256xi32>
    %333 = arith.sitofp %332 : vector<8x256xi32> to vector<8x256xf32>
    %334 = arith.addf %323, %333 : vector<8x256xf32>
    %cst_44 = arith.constant 3.000000e+00 : f32
    %335 = vector.broadcast %cst_44 : f32 to vector<8x256xf32>
    %336 = arith.cmpf ole, %329, %335 : vector<8x256xf32>
    %cst_45 = arith.constant 3.000000e+00 : f32
    %337 = vector.broadcast %cst_45 : f32 to vector<8x256xf32>
    %338 = arith.cmpf ogt, %334, %337 : vector<8x256xf32>
    %339 = arith.andi %336, %338 : vector<8x256xi1>
    %cst_46 = arith.constant 0xFF800000 : f32
    %340 = vector.broadcast %cst_46 : f32 to vector<8x256xf32>
    %341 = arith.select %339, %244, %340 : vector<8x256xi1>, vector<8x256xf32>
    %cst_47 = arith.constant dense<0xFF800000> : vector<256xf32>
    %342 = vector.multi_reduction <maximumf>, %341, %cst_47 [0] : vector<8x256xf32> to vector<256xf32>
    %343 = vector.shape_cast %342 : vector<256xf32> to vector<1x256xf32>
    %344 = vector.extract_strided_slice %40 {offsets = [24, 0], sizes = [8, 256], strides = [1, 1]} : vector<32x256xf32> to vector<8x256xf32>
    %cst_48 = arith.constant 0.000000e+00 : f32
    %345 = vector.broadcast %cst_48 : f32 to vector<8x256xf32>
    %cst_49 = arith.constant 0.000000e+00 : f32
    %346 = vector.broadcast %cst_49 : f32 to vector<8x256xf32>
    %347 = vector.extract_strided_slice %344 {offsets = [0, 0], sizes = [1, 256], strides = [1, 1]} : vector<8x256xf32> to vector<1x256xf32>
    %348 = vector.broadcast %347 : vector<1x256xf32> to vector<8x256xf32>
    %349 = arith.cmpf olt, %348, %344 : vector<8x256xf32>
    %350 = arith.extui %349 : vector<8x256xi1> to vector<8x256xi32>
    %351 = arith.sitofp %350 : vector<8x256xi32> to vector<8x256xf32>
    %352 = arith.addf %345, %351 : vector<8x256xf32>
    %353 = vector.broadcast %347 : vector<1x256xf32> to vector<8x256xf32>
    %354 = arith.cmpf ole, %353, %344 : vector<8x256xf32>
    %355 = arith.extui %354 : vector<8x256xi1> to vector<8x256xi32>
    %356 = arith.sitofp %355 : vector<8x256xi32> to vector<8x256xf32>
    %357 = arith.addf %346, %356 : vector<8x256xf32>
    %358 = vector.extract_strided_slice %344 {offsets = [1, 0], sizes = [1, 256], strides = [1, 1]} : vector<8x256xf32> to vector<1x256xf32>
    %359 = vector.broadcast %358 : vector<1x256xf32> to vector<8x256xf32>
    %360 = arith.cmpf olt, %359, %344 : vector<8x256xf32>
    %361 = arith.extui %360 : vector<8x256xi1> to vector<8x256xi32>
    %362 = arith.sitofp %361 : vector<8x256xi32> to vector<8x256xf32>
    %363 = arith.addf %352, %362 : vector<8x256xf32>
    %364 = vector.broadcast %358 : vector<1x256xf32> to vector<8x256xf32>
    %365 = arith.cmpf ole, %364, %344 : vector<8x256xf32>
    %366 = arith.extui %365 : vector<8x256xi1> to vector<8x256xi32>
    %367 = arith.sitofp %366 : vector<8x256xi32> to vector<8x256xf32>
    %368 = arith.addf %357, %367 : vector<8x256xf32>
    %369 = vector.extract_strided_slice %344 {offsets = [2, 0], sizes = [1, 256], strides = [1, 1]} : vector<8x256xf32> to vector<1x256xf32>
    %370 = vector.broadcast %369 : vector<1x256xf32> to vector<8x256xf32>
    %371 = arith.cmpf olt, %370, %344 : vector<8x256xf32>
    %372 = arith.extui %371 : vector<8x256xi1> to vector<8x256xi32>
    %373 = arith.sitofp %372 : vector<8x256xi32> to vector<8x256xf32>
    %374 = arith.addf %363, %373 : vector<8x256xf32>
    %375 = vector.broadcast %369 : vector<1x256xf32> to vector<8x256xf32>
    %376 = arith.cmpf ole, %375, %344 : vector<8x256xf32>
    %377 = arith.extui %376 : vector<8x256xi1> to vector<8x256xi32>
    %378 = arith.sitofp %377 : vector<8x256xi32> to vector<8x256xf32>
    %379 = arith.addf %368, %378 : vector<8x256xf32>
    %380 = vector.extract_strided_slice %344 {offsets = [3, 0], sizes = [1, 256], strides = [1, 1]} : vector<8x256xf32> to vector<1x256xf32>
    %381 = vector.broadcast %380 : vector<1x256xf32> to vector<8x256xf32>
    %382 = arith.cmpf olt, %381, %344 : vector<8x256xf32>
    %383 = arith.extui %382 : vector<8x256xi1> to vector<8x256xi32>
    %384 = arith.sitofp %383 : vector<8x256xi32> to vector<8x256xf32>
    %385 = arith.addf %374, %384 : vector<8x256xf32>
    %386 = vector.broadcast %380 : vector<1x256xf32> to vector<8x256xf32>
    %387 = arith.cmpf ole, %386, %344 : vector<8x256xf32>
    %388 = arith.extui %387 : vector<8x256xi1> to vector<8x256xi32>
    %389 = arith.sitofp %388 : vector<8x256xi32> to vector<8x256xf32>
    %390 = arith.addf %379, %389 : vector<8x256xf32>
    %391 = vector.extract_strided_slice %344 {offsets = [4, 0], sizes = [1, 256], strides = [1, 1]} : vector<8x256xf32> to vector<1x256xf32>
    %392 = vector.broadcast %391 : vector<1x256xf32> to vector<8x256xf32>
    %393 = arith.cmpf olt, %392, %344 : vector<8x256xf32>
    %394 = arith.extui %393 : vector<8x256xi1> to vector<8x256xi32>
    %395 = arith.sitofp %394 : vector<8x256xi32> to vector<8x256xf32>
    %396 = arith.addf %385, %395 : vector<8x256xf32>
    %397 = vector.broadcast %391 : vector<1x256xf32> to vector<8x256xf32>
    %398 = arith.cmpf ole, %397, %344 : vector<8x256xf32>
    %399 = arith.extui %398 : vector<8x256xi1> to vector<8x256xi32>
    %400 = arith.sitofp %399 : vector<8x256xi32> to vector<8x256xf32>
    %401 = arith.addf %390, %400 : vector<8x256xf32>
    %402 = vector.extract_strided_slice %344 {offsets = [5, 0], sizes = [1, 256], strides = [1, 1]} : vector<8x256xf32> to vector<1x256xf32>
    %403 = vector.broadcast %402 : vector<1x256xf32> to vector<8x256xf32>
    %404 = arith.cmpf olt, %403, %344 : vector<8x256xf32>
    %405 = arith.extui %404 : vector<8x256xi1> to vector<8x256xi32>
    %406 = arith.sitofp %405 : vector<8x256xi32> to vector<8x256xf32>
    %407 = arith.addf %396, %406 : vector<8x256xf32>
    %408 = vector.broadcast %402 : vector<1x256xf32> to vector<8x256xf32>
    %409 = arith.cmpf ole, %408, %344 : vector<8x256xf32>
    %410 = arith.extui %409 : vector<8x256xi1> to vector<8x256xi32>
    %411 = arith.sitofp %410 : vector<8x256xi32> to vector<8x256xf32>
    %412 = arith.addf %401, %411 : vector<8x256xf32>
    %413 = vector.extract_strided_slice %344 {offsets = [6, 0], sizes = [1, 256], strides = [1, 1]} : vector<8x256xf32> to vector<1x256xf32>
    %414 = vector.broadcast %413 : vector<1x256xf32> to vector<8x256xf32>
    %415 = arith.cmpf olt, %414, %344 : vector<8x256xf32>
    %416 = arith.extui %415 : vector<8x256xi1> to vector<8x256xi32>
    %417 = arith.sitofp %416 : vector<8x256xi32> to vector<8x256xf32>
    %418 = arith.addf %407, %417 : vector<8x256xf32>
    %419 = vector.broadcast %413 : vector<1x256xf32> to vector<8x256xf32>
    %420 = arith.cmpf ole, %419, %344 : vector<8x256xf32>
    %421 = arith.extui %420 : vector<8x256xi1> to vector<8x256xi32>
    %422 = arith.sitofp %421 : vector<8x256xi32> to vector<8x256xf32>
    %423 = arith.addf %412, %422 : vector<8x256xf32>
    %424 = vector.extract_strided_slice %344 {offsets = [7, 0], sizes = [1, 256], strides = [1, 1]} : vector<8x256xf32> to vector<1x256xf32>
    %425 = vector.broadcast %424 : vector<1x256xf32> to vector<8x256xf32>
    %426 = arith.cmpf olt, %425, %344 : vector<8x256xf32>
    %427 = arith.extui %426 : vector<8x256xi1> to vector<8x256xi32>
    %428 = arith.sitofp %427 : vector<8x256xi32> to vector<8x256xf32>
    %429 = arith.addf %418, %428 : vector<8x256xf32>
    %430 = vector.broadcast %424 : vector<1x256xf32> to vector<8x256xf32>
    %431 = arith.cmpf ole, %430, %344 : vector<8x256xf32>
    %432 = arith.extui %431 : vector<8x256xi1> to vector<8x256xi32>
    %433 = arith.sitofp %432 : vector<8x256xi32> to vector<8x256xf32>
    %434 = arith.addf %423, %433 : vector<8x256xf32>
    %cst_50 = arith.constant 3.000000e+00 : f32
    %435 = vector.broadcast %cst_50 : f32 to vector<8x256xf32>
    %436 = arith.cmpf ole, %429, %435 : vector<8x256xf32>
    %cst_51 = arith.constant 3.000000e+00 : f32
    %437 = vector.broadcast %cst_51 : f32 to vector<8x256xf32>
    %438 = arith.cmpf ogt, %434, %437 : vector<8x256xf32>
    %439 = arith.andi %436, %438 : vector<8x256xi1>
    %cst_52 = arith.constant 0xFF800000 : f32
    %440 = vector.broadcast %cst_52 : f32 to vector<8x256xf32>
    %441 = arith.select %439, %344, %440 : vector<8x256xi1>, vector<8x256xf32>
    %cst_53 = arith.constant dense<0xFF800000> : vector<256xf32>
    %442 = vector.multi_reduction <maximumf>, %441, %cst_53 [0] : vector<8x256xf32> to vector<256xf32>
    %443 = vector.shape_cast %442 : vector<256xf32> to vector<1x256xf32>
    %444 = tpu.concatenate %143, %243, %343, %443 in 0 : vector<1x256xf32>, vector<1x256xf32>, vector<1x256xf32>, vector<1x256xf32> -> vector<4x256xf32>
    %445 = vector.extract_strided_slice %41 {offsets = [0, 0], sizes = [8, 256], strides = [1, 1]} : vector<32x256xf32> to vector<8x256xf32>
    %cst_54 = arith.constant 0.000000e+00 : f32
    %446 = vector.broadcast %cst_54 : f32 to vector<8x256xf32>
    %cst_55 = arith.constant 0.000000e+00 : f32
    %447 = vector.broadcast %cst_55 : f32 to vector<8x256xf32>
    %448 = vector.extract_strided_slice %445 {offsets = [0, 0], sizes = [1, 256], strides = [1, 1]} : vector<8x256xf32> to vector<1x256xf32>
    %449 = vector.broadcast %448 : vector<1x256xf32> to vector<8x256xf32>
    %450 = arith.cmpf olt, %449, %445 : vector<8x256xf32>
    %451 = arith.extui %450 : vector<8x256xi1> to vector<8x256xi32>
    %452 = arith.sitofp %451 : vector<8x256xi32> to vector<8x256xf32>
    %453 = arith.addf %446, %452 : vector<8x256xf32>
    %454 = vector.broadcast %448 : vector<1x256xf32> to vector<8x256xf32>
    %455 = arith.cmpf ole, %454, %445 : vector<8x256xf32>
    %456 = arith.extui %455 : vector<8x256xi1> to vector<8x256xi32>
    %457 = arith.sitofp %456 : vector<8x256xi32> to vector<8x256xf32>
    %458 = arith.addf %447, %457 : vector<8x256xf32>
    %459 = vector.extract_strided_slice %445 {offsets = [1, 0], sizes = [1, 256], strides = [1, 1]} : vector<8x256xf32> to vector<1x256xf32>
    %460 = vector.broadcast %459 : vector<1x256xf32> to vector<8x256xf32>
    %461 = arith.cmpf olt, %460, %445 : vector<8x256xf32>
    %462 = arith.extui %461 : vector<8x256xi1> to vector<8x256xi32>
    %463 = arith.sitofp %462 : vector<8x256xi32> to vector<8x256xf32>
    %464 = arith.addf %453, %463 : vector<8x256xf32>
    %465 = vector.broadcast %459 : vector<1x256xf32> to vector<8x256xf32>
    %466 = arith.cmpf ole, %465, %445 : vector<8x256xf32>
    %467 = arith.extui %466 : vector<8x256xi1> to vector<8x256xi32>
    %468 = arith.sitofp %467 : vector<8x256xi32> to vector<8x256xf32>
    %469 = arith.addf %458, %468 : vector<8x256xf32>
    %470 = vector.extract_strided_slice %445 {offsets = [2, 0], sizes = [1, 256], strides = [1, 1]} : vector<8x256xf32> to vector<1x256xf32>
    %471 = vector.broadcast %470 : vector<1x256xf32> to vector<8x256xf32>
    %472 = arith.cmpf olt, %471, %445 : vector<8x256xf32>
    %473 = arith.extui %472 : vector<8x256xi1> to vector<8x256xi32>
    %474 = arith.sitofp %473 : vector<8x256xi32> to vector<8x256xf32>
    %475 = arith.addf %464, %474 : vector<8x256xf32>
    %476 = vector.broadcast %470 : vector<1x256xf32> to vector<8x256xf32>
    %477 = arith.cmpf ole, %476, %445 : vector<8x256xf32>
    %478 = arith.extui %477 : vector<8x256xi1> to vector<8x256xi32>
    %479 = arith.sitofp %478 : vector<8x256xi32> to vector<8x256xf32>
    %480 = arith.addf %469, %479 : vector<8x256xf32>
    %481 = vector.extract_strided_slice %445 {offsets = [3, 0], sizes = [1, 256], strides = [1, 1]} : vector<8x256xf32> to vector<1x256xf32>
    %482 = vector.broadcast %481 : vector<1x256xf32> to vector<8x256xf32>
    %483 = arith.cmpf olt, %482, %445 : vector<8x256xf32>
    %484 = arith.extui %483 : vector<8x256xi1> to vector<8x256xi32>
    %485 = arith.sitofp %484 : vector<8x256xi32> to vector<8x256xf32>
    %486 = arith.addf %475, %485 : vector<8x256xf32>
    %487 = vector.broadcast %481 : vector<1x256xf32> to vector<8x256xf32>
    %488 = arith.cmpf ole, %487, %445 : vector<8x256xf32>
    %489 = arith.extui %488 : vector<8x256xi1> to vector<8x256xi32>
    %490 = arith.sitofp %489 : vector<8x256xi32> to vector<8x256xf32>
    %491 = arith.addf %480, %490 : vector<8x256xf32>
    %492 = vector.extract_strided_slice %445 {offsets = [4, 0], sizes = [1, 256], strides = [1, 1]} : vector<8x256xf32> to vector<1x256xf32>
    %493 = vector.broadcast %492 : vector<1x256xf32> to vector<8x256xf32>
    %494 = arith.cmpf olt, %493, %445 : vector<8x256xf32>
    %495 = arith.extui %494 : vector<8x256xi1> to vector<8x256xi32>
    %496 = arith.sitofp %495 : vector<8x256xi32> to vector<8x256xf32>
    %497 = arith.addf %486, %496 : vector<8x256xf32>
    %498 = vector.broadcast %492 : vector<1x256xf32> to vector<8x256xf32>
    %499 = arith.cmpf ole, %498, %445 : vector<8x256xf32>
    %500 = arith.extui %499 : vector<8x256xi1> to vector<8x256xi32>
    %501 = arith.sitofp %500 : vector<8x256xi32> to vector<8x256xf32>
    %502 = arith.addf %491, %501 : vector<8x256xf32>
    %503 = vector.extract_strided_slice %445 {offsets = [5, 0], sizes = [1, 256], strides = [1, 1]} : vector<8x256xf32> to vector<1x256xf32>
    %504 = vector.broadcast %503 : vector<1x256xf32> to vector<8x256xf32>
    %505 = arith.cmpf olt, %504, %445 : vector<8x256xf32>
    %506 = arith.extui %505 : vector<8x256xi1> to vector<8x256xi32>
    %507 = arith.sitofp %506 : vector<8x256xi32> to vector<8x256xf32>
    %508 = arith.addf %497, %507 : vector<8x256xf32>
    %509 = vector.broadcast %503 : vector<1x256xf32> to vector<8x256xf32>
    %510 = arith.cmpf ole, %509, %445 : vector<8x256xf32>
    %511 = arith.extui %510 : vector<8x256xi1> to vector<8x256xi32>
    %512 = arith.sitofp %511 : vector<8x256xi32> to vector<8x256xf32>
    %513 = arith.addf %502, %512 : vector<8x256xf32>
    %514 = vector.extract_strided_slice %445 {offsets = [6, 0], sizes = [1, 256], strides = [1, 1]} : vector<8x256xf32> to vector<1x256xf32>
    %515 = vector.broadcast %514 : vector<1x256xf32> to vector<8x256xf32>
    %516 = arith.cmpf olt, %515, %445 : vector<8x256xf32>
    %517 = arith.extui %516 : vector<8x256xi1> to vector<8x256xi32>
    %518 = arith.sitofp %517 : vector<8x256xi32> to vector<8x256xf32>
    %519 = arith.addf %508, %518 : vector<8x256xf32>
    %520 = vector.broadcast %514 : vector<1x256xf32> to vector<8x256xf32>
    %521 = arith.cmpf ole, %520, %445 : vector<8x256xf32>
    %522 = arith.extui %521 : vector<8x256xi1> to vector<8x256xi32>
    %523 = arith.sitofp %522 : vector<8x256xi32> to vector<8x256xf32>
    %524 = arith.addf %513, %523 : vector<8x256xf32>
    %525 = vector.extract_strided_slice %445 {offsets = [7, 0], sizes = [1, 256], strides = [1, 1]} : vector<8x256xf32> to vector<1x256xf32>
    %526 = vector.broadcast %525 : vector<1x256xf32> to vector<8x256xf32>
    %527 = arith.cmpf olt, %526, %445 : vector<8x256xf32>
    %528 = arith.extui %527 : vector<8x256xi1> to vector<8x256xi32>
    %529 = arith.sitofp %528 : vector<8x256xi32> to vector<8x256xf32>
    %530 = arith.addf %519, %529 : vector<8x256xf32>
    %531 = vector.broadcast %525 : vector<1x256xf32> to vector<8x256xf32>
    %532 = arith.cmpf ole, %531, %445 : vector<8x256xf32>
    %533 = arith.extui %532 : vector<8x256xi1> to vector<8x256xi32>
    %534 = arith.sitofp %533 : vector<8x256xi32> to vector<8x256xf32>
    %535 = arith.addf %524, %534 : vector<8x256xf32>
    %cst_56 = arith.constant 3.000000e+00 : f32
    %536 = vector.broadcast %cst_56 : f32 to vector<8x256xf32>
    %537 = arith.cmpf ole, %530, %536 : vector<8x256xf32>
    %cst_57 = arith.constant 3.000000e+00 : f32
    %538 = vector.broadcast %cst_57 : f32 to vector<8x256xf32>
    %539 = arith.cmpf ogt, %535, %538 : vector<8x256xf32>
    %540 = arith.andi %537, %539 : vector<8x256xi1>
    %cst_58 = arith.constant 0xFF800000 : f32
    %541 = vector.broadcast %cst_58 : f32 to vector<8x256xf32>
    %542 = arith.select %540, %445, %541 : vector<8x256xi1>, vector<8x256xf32>
    %cst_59 = arith.constant dense<0xFF800000> : vector<256xf32>
    %543 = vector.multi_reduction <maximumf>, %542, %cst_59 [0] : vector<8x256xf32> to vector<256xf32>
    %544 = vector.shape_cast %543 : vector<256xf32> to vector<1x256xf32>
    %545 = vector.extract_strided_slice %41 {offsets = [8, 0], sizes = [8, 256], strides = [1, 1]} : vector<32x256xf32> to vector<8x256xf32>
    %cst_60 = arith.constant 0.000000e+00 : f32
    %546 = vector.broadcast %cst_60 : f32 to vector<8x256xf32>
    %cst_61 = arith.constant 0.000000e+00 : f32
    %547 = vector.broadcast %cst_61 : f32 to vector<8x256xf32>
    %548 = vector.extract_strided_slice %545 {offsets = [0, 0], sizes = [1, 256], strides = [1, 1]} : vector<8x256xf32> to vector<1x256xf32>
    %549 = vector.broadcast %548 : vector<1x256xf32> to vector<8x256xf32>
    %550 = arith.cmpf olt, %549, %545 : vector<8x256xf32>
    %551 = arith.extui %550 : vector<8x256xi1> to vector<8x256xi32>
    %552 = arith.sitofp %551 : vector<8x256xi32> to vector<8x256xf32>
    %553 = arith.addf %546, %552 : vector<8x256xf32>
    %554 = vector.broadcast %548 : vector<1x256xf32> to vector<8x256xf32>
    %555 = arith.cmpf ole, %554, %545 : vector<8x256xf32>
    %556 = arith.extui %555 : vector<8x256xi1> to vector<8x256xi32>
    %557 = arith.sitofp %556 : vector<8x256xi32> to vector<8x256xf32>
    %558 = arith.addf %547, %557 : vector<8x256xf32>
    %559 = vector.extract_strided_slice %545 {offsets = [1, 0], sizes = [1, 256], strides = [1, 1]} : vector<8x256xf32> to vector<1x256xf32>
    %560 = vector.broadcast %559 : vector<1x256xf32> to vector<8x256xf32>
    %561 = arith.cmpf olt, %560, %545 : vector<8x256xf32>
    %562 = arith.extui %561 : vector<8x256xi1> to vector<8x256xi32>
    %563 = arith.sitofp %562 : vector<8x256xi32> to vector<8x256xf32>
    %564 = arith.addf %553, %563 : vector<8x256xf32>
    %565 = vector.broadcast %559 : vector<1x256xf32> to vector<8x256xf32>
    %566 = arith.cmpf ole, %565, %545 : vector<8x256xf32>
    %567 = arith.extui %566 : vector<8x256xi1> to vector<8x256xi32>
    %568 = arith.sitofp %567 : vector<8x256xi32> to vector<8x256xf32>
    %569 = arith.addf %558, %568 : vector<8x256xf32>
    %570 = vector.extract_strided_slice %545 {offsets = [2, 0], sizes = [1, 256], strides = [1, 1]} : vector<8x256xf32> to vector<1x256xf32>
    %571 = vector.broadcast %570 : vector<1x256xf32> to vector<8x256xf32>
    %572 = arith.cmpf olt, %571, %545 : vector<8x256xf32>
    %573 = arith.extui %572 : vector<8x256xi1> to vector<8x256xi32>
    %574 = arith.sitofp %573 : vector<8x256xi32> to vector<8x256xf32>
    %575 = arith.addf %564, %574 : vector<8x256xf32>
    %576 = vector.broadcast %570 : vector<1x256xf32> to vector<8x256xf32>
    %577 = arith.cmpf ole, %576, %545 : vector<8x256xf32>
    %578 = arith.extui %577 : vector<8x256xi1> to vector<8x256xi32>
    %579 = arith.sitofp %578 : vector<8x256xi32> to vector<8x256xf32>
    %580 = arith.addf %569, %579 : vector<8x256xf32>
    %581 = vector.extract_strided_slice %545 {offsets = [3, 0], sizes = [1, 256], strides = [1, 1]} : vector<8x256xf32> to vector<1x256xf32>
    %582 = vector.broadcast %581 : vector<1x256xf32> to vector<8x256xf32>
    %583 = arith.cmpf olt, %582, %545 : vector<8x256xf32>
    %584 = arith.extui %583 : vector<8x256xi1> to vector<8x256xi32>
    %585 = arith.sitofp %584 : vector<8x256xi32> to vector<8x256xf32>
    %586 = arith.addf %575, %585 : vector<8x256xf32>
    %587 = vector.broadcast %581 : vector<1x256xf32> to vector<8x256xf32>
    %588 = arith.cmpf ole, %587, %545 : vector<8x256xf32>
    %589 = arith.extui %588 : vector<8x256xi1> to vector<8x256xi32>
    %590 = arith.sitofp %589 : vector<8x256xi32> to vector<8x256xf32>
    %591 = arith.addf %580, %590 : vector<8x256xf32>
    %592 = vector.extract_strided_slice %545 {offsets = [4, 0], sizes = [1, 256], strides = [1, 1]} : vector<8x256xf32> to vector<1x256xf32>
    %593 = vector.broadcast %592 : vector<1x256xf32> to vector<8x256xf32>
    %594 = arith.cmpf olt, %593, %545 : vector<8x256xf32>
    %595 = arith.extui %594 : vector<8x256xi1> to vector<8x256xi32>
    %596 = arith.sitofp %595 : vector<8x256xi32> to vector<8x256xf32>
    %597 = arith.addf %586, %596 : vector<8x256xf32>
    %598 = vector.broadcast %592 : vector<1x256xf32> to vector<8x256xf32>
    %599 = arith.cmpf ole, %598, %545 : vector<8x256xf32>
    %600 = arith.extui %599 : vector<8x256xi1> to vector<8x256xi32>
    %601 = arith.sitofp %600 : vector<8x256xi32> to vector<8x256xf32>
    %602 = arith.addf %591, %601 : vector<8x256xf32>
    %603 = vector.extract_strided_slice %545 {offsets = [5, 0], sizes = [1, 256], strides = [1, 1]} : vector<8x256xf32> to vector<1x256xf32>
    %604 = vector.broadcast %603 : vector<1x256xf32> to vector<8x256xf32>
    %605 = arith.cmpf olt, %604, %545 : vector<8x256xf32>
    %606 = arith.extui %605 : vector<8x256xi1> to vector<8x256xi32>
    %607 = arith.sitofp %606 : vector<8x256xi32> to vector<8x256xf32>
    %608 = arith.addf %597, %607 : vector<8x256xf32>
    %609 = vector.broadcast %603 : vector<1x256xf32> to vector<8x256xf32>
    %610 = arith.cmpf ole, %609, %545 : vector<8x256xf32>
    %611 = arith.extui %610 : vector<8x256xi1> to vector<8x256xi32>
    %612 = arith.sitofp %611 : vector<8x256xi32> to vector<8x256xf32>
    %613 = arith.addf %602, %612 : vector<8x256xf32>
    %614 = vector.extract_strided_slice %545 {offsets = [6, 0], sizes = [1, 256], strides = [1, 1]} : vector<8x256xf32> to vector<1x256xf32>
    %615 = vector.broadcast %614 : vector<1x256xf32> to vector<8x256xf32>
    %616 = arith.cmpf olt, %615, %545 : vector<8x256xf32>
    %617 = arith.extui %616 : vector<8x256xi1> to vector<8x256xi32>
    %618 = arith.sitofp %617 : vector<8x256xi32> to vector<8x256xf32>
    %619 = arith.addf %608, %618 : vector<8x256xf32>
    %620 = vector.broadcast %614 : vector<1x256xf32> to vector<8x256xf32>
    %621 = arith.cmpf ole, %620, %545 : vector<8x256xf32>
    %622 = arith.extui %621 : vector<8x256xi1> to vector<8x256xi32>
    %623 = arith.sitofp %622 : vector<8x256xi32> to vector<8x256xf32>
    %624 = arith.addf %613, %623 : vector<8x256xf32>
    %625 = vector.extract_strided_slice %545 {offsets = [7, 0], sizes = [1, 256], strides = [1, 1]} : vector<8x256xf32> to vector<1x256xf32>
    %626 = vector.broadcast %625 : vector<1x256xf32> to vector<8x256xf32>
    %627 = arith.cmpf olt, %626, %545 : vector<8x256xf32>
    %628 = arith.extui %627 : vector<8x256xi1> to vector<8x256xi32>
    %629 = arith.sitofp %628 : vector<8x256xi32> to vector<8x256xf32>
    %630 = arith.addf %619, %629 : vector<8x256xf32>
    %631 = vector.broadcast %625 : vector<1x256xf32> to vector<8x256xf32>
    %632 = arith.cmpf ole, %631, %545 : vector<8x256xf32>
    %633 = arith.extui %632 : vector<8x256xi1> to vector<8x256xi32>
    %634 = arith.sitofp %633 : vector<8x256xi32> to vector<8x256xf32>
    %635 = arith.addf %624, %634 : vector<8x256xf32>
    %cst_62 = arith.constant 3.000000e+00 : f32
    %636 = vector.broadcast %cst_62 : f32 to vector<8x256xf32>
    %637 = arith.cmpf ole, %630, %636 : vector<8x256xf32>
    %cst_63 = arith.constant 3.000000e+00 : f32
    %638 = vector.broadcast %cst_63 : f32 to vector<8x256xf32>
    %639 = arith.cmpf ogt, %635, %638 : vector<8x256xf32>
    %640 = arith.andi %637, %639 : vector<8x256xi1>
    %cst_64 = arith.constant 0xFF800000 : f32
    %641 = vector.broadcast %cst_64 : f32 to vector<8x256xf32>
    %642 = arith.select %640, %545, %641 : vector<8x256xi1>, vector<8x256xf32>
    %cst_65 = arith.constant dense<0xFF800000> : vector<256xf32>
    %643 = vector.multi_reduction <maximumf>, %642, %cst_65 [0] : vector<8x256xf32> to vector<256xf32>
    %644 = vector.shape_cast %643 : vector<256xf32> to vector<1x256xf32>
    %645 = vector.extract_strided_slice %41 {offsets = [16, 0], sizes = [8, 256], strides = [1, 1]} : vector<32x256xf32> to vector<8x256xf32>
    %cst_66 = arith.constant 0.000000e+00 : f32
    %646 = vector.broadcast %cst_66 : f32 to vector<8x256xf32>
    %cst_67 = arith.constant 0.000000e+00 : f32
    %647 = vector.broadcast %cst_67 : f32 to vector<8x256xf32>
    %648 = vector.extract_strided_slice %645 {offsets = [0, 0], sizes = [1, 256], strides = [1, 1]} : vector<8x256xf32> to vector<1x256xf32>
    %649 = vector.broadcast %648 : vector<1x256xf32> to vector<8x256xf32>
    %650 = arith.cmpf olt, %649, %645 : vector<8x256xf32>
    %651 = arith.extui %650 : vector<8x256xi1> to vector<8x256xi32>
    %652 = arith.sitofp %651 : vector<8x256xi32> to vector<8x256xf32>
    %653 = arith.addf %646, %652 : vector<8x256xf32>
    %654 = vector.broadcast %648 : vector<1x256xf32> to vector<8x256xf32>
    %655 = arith.cmpf ole, %654, %645 : vector<8x256xf32>
    %656 = arith.extui %655 : vector<8x256xi1> to vector<8x256xi32>
    %657 = arith.sitofp %656 : vector<8x256xi32> to vector<8x256xf32>
    %658 = arith.addf %647, %657 : vector<8x256xf32>
    %659 = vector.extract_strided_slice %645 {offsets = [1, 0], sizes = [1, 256], strides = [1, 1]} : vector<8x256xf32> to vector<1x256xf32>
    %660 = vector.broadcast %659 : vector<1x256xf32> to vector<8x256xf32>
    %661 = arith.cmpf olt, %660, %645 : vector<8x256xf32>
    %662 = arith.extui %661 : vector<8x256xi1> to vector<8x256xi32>
    %663 = arith.sitofp %662 : vector<8x256xi32> to vector<8x256xf32>
    %664 = arith.addf %653, %663 : vector<8x256xf32>
    %665 = vector.broadcast %659 : vector<1x256xf32> to vector<8x256xf32>
    %666 = arith.cmpf ole, %665, %645 : vector<8x256xf32>
    %667 = arith.extui %666 : vector<8x256xi1> to vector<8x256xi32>
    %668 = arith.sitofp %667 : vector<8x256xi32> to vector<8x256xf32>
    %669 = arith.addf %658, %668 : vector<8x256xf32>
    %670 = vector.extract_strided_slice %645 {offsets = [2, 0], sizes = [1, 256], strides = [1, 1]} : vector<8x256xf32> to vector<1x256xf32>
    %671 = vector.broadcast %670 : vector<1x256xf32> to vector<8x256xf32>
    %672 = arith.cmpf olt, %671, %645 : vector<8x256xf32>
    %673 = arith.extui %672 : vector<8x256xi1> to vector<8x256xi32>
    %674 = arith.sitofp %673 : vector<8x256xi32> to vector<8x256xf32>
    %675 = arith.addf %664, %674 : vector<8x256xf32>
    %676 = vector.broadcast %670 : vector<1x256xf32> to vector<8x256xf32>
    %677 = arith.cmpf ole, %676, %645 : vector<8x256xf32>
    %678 = arith.extui %677 : vector<8x256xi1> to vector<8x256xi32>
    %679 = arith.sitofp %678 : vector<8x256xi32> to vector<8x256xf32>
    %680 = arith.addf %669, %679 : vector<8x256xf32>
    %681 = vector.extract_strided_slice %645 {offsets = [3, 0], sizes = [1, 256], strides = [1, 1]} : vector<8x256xf32> to vector<1x256xf32>
    %682 = vector.broadcast %681 : vector<1x256xf32> to vector<8x256xf32>
    %683 = arith.cmpf olt, %682, %645 : vector<8x256xf32>
    %684 = arith.extui %683 : vector<8x256xi1> to vector<8x256xi32>
    %685 = arith.sitofp %684 : vector<8x256xi32> to vector<8x256xf32>
    %686 = arith.addf %675, %685 : vector<8x256xf32>
    %687 = vector.broadcast %681 : vector<1x256xf32> to vector<8x256xf32>
    %688 = arith.cmpf ole, %687, %645 : vector<8x256xf32>
    %689 = arith.extui %688 : vector<8x256xi1> to vector<8x256xi32>
    %690 = arith.sitofp %689 : vector<8x256xi32> to vector<8x256xf32>
    %691 = arith.addf %680, %690 : vector<8x256xf32>
    %692 = vector.extract_strided_slice %645 {offsets = [4, 0], sizes = [1, 256], strides = [1, 1]} : vector<8x256xf32> to vector<1x256xf32>
    %693 = vector.broadcast %692 : vector<1x256xf32> to vector<8x256xf32>
    %694 = arith.cmpf olt, %693, %645 : vector<8x256xf32>
    %695 = arith.extui %694 : vector<8x256xi1> to vector<8x256xi32>
    %696 = arith.sitofp %695 : vector<8x256xi32> to vector<8x256xf32>
    %697 = arith.addf %686, %696 : vector<8x256xf32>
    %698 = vector.broadcast %692 : vector<1x256xf32> to vector<8x256xf32>
    %699 = arith.cmpf ole, %698, %645 : vector<8x256xf32>
    %700 = arith.extui %699 : vector<8x256xi1> to vector<8x256xi32>
    %701 = arith.sitofp %700 : vector<8x256xi32> to vector<8x256xf32>
    %702 = arith.addf %691, %701 : vector<8x256xf32>
    %703 = vector.extract_strided_slice %645 {offsets = [5, 0], sizes = [1, 256], strides = [1, 1]} : vector<8x256xf32> to vector<1x256xf32>
    %704 = vector.broadcast %703 : vector<1x256xf32> to vector<8x256xf32>
    %705 = arith.cmpf olt, %704, %645 : vector<8x256xf32>
    %706 = arith.extui %705 : vector<8x256xi1> to vector<8x256xi32>
    %707 = arith.sitofp %706 : vector<8x256xi32> to vector<8x256xf32>
    %708 = arith.addf %697, %707 : vector<8x256xf32>
    %709 = vector.broadcast %703 : vector<1x256xf32> to vector<8x256xf32>
    %710 = arith.cmpf ole, %709, %645 : vector<8x256xf32>
    %711 = arith.extui %710 : vector<8x256xi1> to vector<8x256xi32>
    %712 = arith.sitofp %711 : vector<8x256xi32> to vector<8x256xf32>
    %713 = arith.addf %702, %712 : vector<8x256xf32>
    %714 = vector.extract_strided_slice %645 {offsets = [6, 0], sizes = [1, 256], strides = [1, 1]} : vector<8x256xf32> to vector<1x256xf32>
    %715 = vector.broadcast %714 : vector<1x256xf32> to vector<8x256xf32>
    %716 = arith.cmpf olt, %715, %645 : vector<8x256xf32>
    %717 = arith.extui %716 : vector<8x256xi1> to vector<8x256xi32>
    %718 = arith.sitofp %717 : vector<8x256xi32> to vector<8x256xf32>
    %719 = arith.addf %708, %718 : vector<8x256xf32>
    %720 = vector.broadcast %714 : vector<1x256xf32> to vector<8x256xf32>
    %721 = arith.cmpf ole, %720, %645 : vector<8x256xf32>
    %722 = arith.extui %721 : vector<8x256xi1> to vector<8x256xi32>
    %723 = arith.sitofp %722 : vector<8x256xi32> to vector<8x256xf32>
    %724 = arith.addf %713, %723 : vector<8x256xf32>
    %725 = vector.extract_strided_slice %645 {offsets = [7, 0], sizes = [1, 256], strides = [1, 1]} : vector<8x256xf32> to vector<1x256xf32>
    %726 = vector.broadcast %725 : vector<1x256xf32> to vector<8x256xf32>
    %727 = arith.cmpf olt, %726, %645 : vector<8x256xf32>
    %728 = arith.extui %727 : vector<8x256xi1> to vector<8x256xi32>
    %729 = arith.sitofp %728 : vector<8x256xi32> to vector<8x256xf32>
    %730 = arith.addf %719, %729 : vector<8x256xf32>
    %731 = vector.broadcast %725 : vector<1x256xf32> to vector<8x256xf32>
    %732 = arith.cmpf ole, %731, %645 : vector<8x256xf32>
    %733 = arith.extui %732 : vector<8x256xi1> to vector<8x256xi32>
    %734 = arith.sitofp %733 : vector<8x256xi32> to vector<8x256xf32>
    %735 = arith.addf %724, %734 : vector<8x256xf32>
    %cst_68 = arith.constant 3.000000e+00 : f32
    %736 = vector.broadcast %cst_68 : f32 to vector<8x256xf32>
    %737 = arith.cmpf ole, %730, %736 : vector<8x256xf32>
    %cst_69 = arith.constant 3.000000e+00 : f32
    %738 = vector.broadcast %cst_69 : f32 to vector<8x256xf32>
    %739 = arith.cmpf ogt, %735, %738 : vector<8x256xf32>
    %740 = arith.andi %737, %739 : vector<8x256xi1>
    %cst_70 = arith.constant 0xFF800000 : f32
    %741 = vector.broadcast %cst_70 : f32 to vector<8x256xf32>
    %742 = arith.select %740, %645, %741 : vector<8x256xi1>, vector<8x256xf32>
    %cst_71 = arith.constant dense<0xFF800000> : vector<256xf32>
    %743 = vector.multi_reduction <maximumf>, %742, %cst_71 [0] : vector<8x256xf32> to vector<256xf32>
    %744 = vector.shape_cast %743 : vector<256xf32> to vector<1x256xf32>
    %745 = vector.extract_strided_slice %41 {offsets = [24, 0], sizes = [8, 256], strides = [1, 1]} : vector<32x256xf32> to vector<8x256xf32>
    %cst_72 = arith.constant 0.000000e+00 : f32
    %746 = vector.broadcast %cst_72 : f32 to vector<8x256xf32>
    %cst_73 = arith.constant 0.000000e+00 : f32
    %747 = vector.broadcast %cst_73 : f32 to vector<8x256xf32>
    %748 = vector.extract_strided_slice %745 {offsets = [0, 0], sizes = [1, 256], strides = [1, 1]} : vector<8x256xf32> to vector<1x256xf32>
    %749 = vector.broadcast %748 : vector<1x256xf32> to vector<8x256xf32>
    %750 = arith.cmpf olt, %749, %745 : vector<8x256xf32>
    %751 = arith.extui %750 : vector<8x256xi1> to vector<8x256xi32>
    %752 = arith.sitofp %751 : vector<8x256xi32> to vector<8x256xf32>
    %753 = arith.addf %746, %752 : vector<8x256xf32>
    %754 = vector.broadcast %748 : vector<1x256xf32> to vector<8x256xf32>
    %755 = arith.cmpf ole, %754, %745 : vector<8x256xf32>
    %756 = arith.extui %755 : vector<8x256xi1> to vector<8x256xi32>
    %757 = arith.sitofp %756 : vector<8x256xi32> to vector<8x256xf32>
    %758 = arith.addf %747, %757 : vector<8x256xf32>
    %759 = vector.extract_strided_slice %745 {offsets = [1, 0], sizes = [1, 256], strides = [1, 1]} : vector<8x256xf32> to vector<1x256xf32>
    %760 = vector.broadcast %759 : vector<1x256xf32> to vector<8x256xf32>
    %761 = arith.cmpf olt, %760, %745 : vector<8x256xf32>
    %762 = arith.extui %761 : vector<8x256xi1> to vector<8x256xi32>
    %763 = arith.sitofp %762 : vector<8x256xi32> to vector<8x256xf32>
    %764 = arith.addf %753, %763 : vector<8x256xf32>
    %765 = vector.broadcast %759 : vector<1x256xf32> to vector<8x256xf32>
    %766 = arith.cmpf ole, %765, %745 : vector<8x256xf32>
    %767 = arith.extui %766 : vector<8x256xi1> to vector<8x256xi32>
    %768 = arith.sitofp %767 : vector<8x256xi32> to vector<8x256xf32>
    %769 = arith.addf %758, %768 : vector<8x256xf32>
    %770 = vector.extract_strided_slice %745 {offsets = [2, 0], sizes = [1, 256], strides = [1, 1]} : vector<8x256xf32> to vector<1x256xf32>
    %771 = vector.broadcast %770 : vector<1x256xf32> to vector<8x256xf32>
    %772 = arith.cmpf olt, %771, %745 : vector<8x256xf32>
    %773 = arith.extui %772 : vector<8x256xi1> to vector<8x256xi32>
    %774 = arith.sitofp %773 : vector<8x256xi32> to vector<8x256xf32>
    %775 = arith.addf %764, %774 : vector<8x256xf32>
    %776 = vector.broadcast %770 : vector<1x256xf32> to vector<8x256xf32>
    %777 = arith.cmpf ole, %776, %745 : vector<8x256xf32>
    %778 = arith.extui %777 : vector<8x256xi1> to vector<8x256xi32>
    %779 = arith.sitofp %778 : vector<8x256xi32> to vector<8x256xf32>
    %780 = arith.addf %769, %779 : vector<8x256xf32>
    %781 = vector.extract_strided_slice %745 {offsets = [3, 0], sizes = [1, 256], strides = [1, 1]} : vector<8x256xf32> to vector<1x256xf32>
    %782 = vector.broadcast %781 : vector<1x256xf32> to vector<8x256xf32>
    %783 = arith.cmpf olt, %782, %745 : vector<8x256xf32>
    %784 = arith.extui %783 : vector<8x256xi1> to vector<8x256xi32>
    %785 = arith.sitofp %784 : vector<8x256xi32> to vector<8x256xf32>
    %786 = arith.addf %775, %785 : vector<8x256xf32>
    %787 = vector.broadcast %781 : vector<1x256xf32> to vector<8x256xf32>
    %788 = arith.cmpf ole, %787, %745 : vector<8x256xf32>
    %789 = arith.extui %788 : vector<8x256xi1> to vector<8x256xi32>
    %790 = arith.sitofp %789 : vector<8x256xi32> to vector<8x256xf32>
    %791 = arith.addf %780, %790 : vector<8x256xf32>
    %792 = vector.extract_strided_slice %745 {offsets = [4, 0], sizes = [1, 256], strides = [1, 1]} : vector<8x256xf32> to vector<1x256xf32>
    %793 = vector.broadcast %792 : vector<1x256xf32> to vector<8x256xf32>
    %794 = arith.cmpf olt, %793, %745 : vector<8x256xf32>
    %795 = arith.extui %794 : vector<8x256xi1> to vector<8x256xi32>
    %796 = arith.sitofp %795 : vector<8x256xi32> to vector<8x256xf32>
    %797 = arith.addf %786, %796 : vector<8x256xf32>
    %798 = vector.broadcast %792 : vector<1x256xf32> to vector<8x256xf32>
    %799 = arith.cmpf ole, %798, %745 : vector<8x256xf32>
    %800 = arith.extui %799 : vector<8x256xi1> to vector<8x256xi32>
    %801 = arith.sitofp %800 : vector<8x256xi32> to vector<8x256xf32>
    %802 = arith.addf %791, %801 : vector<8x256xf32>
    %803 = vector.extract_strided_slice %745 {offsets = [5, 0], sizes = [1, 256], strides = [1, 1]} : vector<8x256xf32> to vector<1x256xf32>
    %804 = vector.broadcast %803 : vector<1x256xf32> to vector<8x256xf32>
    %805 = arith.cmpf olt, %804, %745 : vector<8x256xf32>
    %806 = arith.extui %805 : vector<8x256xi1> to vector<8x256xi32>
    %807 = arith.sitofp %806 : vector<8x256xi32> to vector<8x256xf32>
    %808 = arith.addf %797, %807 : vector<8x256xf32>
    %809 = vector.broadcast %803 : vector<1x256xf32> to vector<8x256xf32>
    %810 = arith.cmpf ole, %809, %745 : vector<8x256xf32>
    %811 = arith.extui %810 : vector<8x256xi1> to vector<8x256xi32>
    %812 = arith.sitofp %811 : vector<8x256xi32> to vector<8x256xf32>
    %813 = arith.addf %802, %812 : vector<8x256xf32>
    %814 = vector.extract_strided_slice %745 {offsets = [6, 0], sizes = [1, 256], strides = [1, 1]} : vector<8x256xf32> to vector<1x256xf32>
    %815 = vector.broadcast %814 : vector<1x256xf32> to vector<8x256xf32>
    %816 = arith.cmpf olt, %815, %745 : vector<8x256xf32>
    %817 = arith.extui %816 : vector<8x256xi1> to vector<8x256xi32>
    %818 = arith.sitofp %817 : vector<8x256xi32> to vector<8x256xf32>
    %819 = arith.addf %808, %818 : vector<8x256xf32>
    %820 = vector.broadcast %814 : vector<1x256xf32> to vector<8x256xf32>
    %821 = arith.cmpf ole, %820, %745 : vector<8x256xf32>
    %822 = arith.extui %821 : vector<8x256xi1> to vector<8x256xi32>
    %823 = arith.sitofp %822 : vector<8x256xi32> to vector<8x256xf32>
    %824 = arith.addf %813, %823 : vector<8x256xf32>
    %825 = vector.extract_strided_slice %745 {offsets = [7, 0], sizes = [1, 256], strides = [1, 1]} : vector<8x256xf32> to vector<1x256xf32>
    %826 = vector.broadcast %825 : vector<1x256xf32> to vector<8x256xf32>
    %827 = arith.cmpf olt, %826, %745 : vector<8x256xf32>
    %828 = arith.extui %827 : vector<8x256xi1> to vector<8x256xi32>
    %829 = arith.sitofp %828 : vector<8x256xi32> to vector<8x256xf32>
    %830 = arith.addf %819, %829 : vector<8x256xf32>
    %831 = vector.broadcast %825 : vector<1x256xf32> to vector<8x256xf32>
    %832 = arith.cmpf ole, %831, %745 : vector<8x256xf32>
    %833 = arith.extui %832 : vector<8x256xi1> to vector<8x256xi32>
    %834 = arith.sitofp %833 : vector<8x256xi32> to vector<8x256xf32>
    %835 = arith.addf %824, %834 : vector<8x256xf32>
    %cst_74 = arith.constant 3.000000e+00 : f32
    %836 = vector.broadcast %cst_74 : f32 to vector<8x256xf32>
    %837 = arith.cmpf ole, %830, %836 : vector<8x256xf32>
    %cst_75 = arith.constant 3.000000e+00 : f32
    %838 = vector.broadcast %cst_75 : f32 to vector<8x256xf32>
    %839 = arith.cmpf ogt, %835, %838 : vector<8x256xf32>
    %840 = arith.andi %837, %839 : vector<8x256xi1>
    %cst_76 = arith.constant 0xFF800000 : f32
    %841 = vector.broadcast %cst_76 : f32 to vector<8x256xf32>
    %842 = arith.select %840, %745, %841 : vector<8x256xi1>, vector<8x256xf32>
    %cst_77 = arith.constant dense<0xFF800000> : vector<256xf32>
    %843 = vector.multi_reduction <maximumf>, %842, %cst_77 [0] : vector<8x256xf32> to vector<256xf32>
    %844 = vector.shape_cast %843 : vector<256xf32> to vector<1x256xf32>
    %845 = tpu.concatenate %544, %644, %744, %844 in 0 : vector<1x256xf32>, vector<1x256xf32>, vector<1x256xf32>, vector<1x256xf32> -> vector<4x256xf32>
    %846 = tpu.concatenate %444, %845 in 0 : vector<4x256xf32>, vector<4x256xf32> -> vector<8x256xf32>
    %cst_78 = arith.constant 0.000000e+00 : f32
    %847 = vector.broadcast %cst_78 : f32 to vector<8x256xf32>
    %848 = arith.subf %847, %846 : vector<8x256xf32>
    %849 = math.exp %848 : vector<8x256xf32>
    %cst_79 = arith.constant 1.000000e+00 : f32
    %850 = vector.broadcast %cst_79 : f32 to vector<8x256xf32>
    %851 = arith.addf %850, %849 : vector<8x256xf32>
    %cst_80 = arith.constant 1.000000e+00 : f32
    %852 = vector.broadcast %cst_80 : f32 to vector<8x256xf32>
    %853 = arith.divf %852, %851 : vector<8x256xf32>
    %c0_81 = arith.constant 0 : index
    %c0_82 = arith.constant 0 : index
    %854 = vector.load %arg11[%c0_81, %c0_82] : memref<256x256xf32, #tpu.memory_space<vmem>>, vector<256x256xf32>
    %cst_83 = arith.constant dense<0.000000e+00> : vector<8x256xf32>
    %855 = tpu.matmul %853, %854, %cst_83 {dimension_numbers = #tpu.dot_dimension_numbers<[1], [0], [0], [1], [0, 0, 1, 1], [], []>} : vector<8x256xf32>, vector<256x256xf32>, vector<8x256xf32> -> vector<8x256xf32>
    %cst_84 = arith.constant dense<0.000000e+00> : vector<8x64xf32>
    %856 = tpu.matmul %855, %24, %cst_84 {dimension_numbers = #tpu.dot_dimension_numbers<[1], [1], [0], [0], [0, 0, 1, 0], [], []>} : vector<8x256xf32>, vector<64x256xf32>, vector<8x64xf32> -> vector<8x64xf32>
    %cst_85 = arith.constant dense<0.000000e+00> : vector<8x64xf32>
    %857 = tpu.matmul %855, %39, %cst_85 {dimension_numbers = #tpu.dot_dimension_numbers<[1], [1], [0], [0], [0, 0, 1, 0], [], []>} : vector<8x256xf32>, vector<64x256xf32>, vector<8x64xf32> -> vector<8x64xf32>
    %858 = vector.extract_strided_slice %857 {offsets = [0, 0], sizes = [1, 8], strides = [1, 1]} : vector<8x64xf32> to vector<1x8xf32>
    %859 = vector.broadcast %2 : f32 to vector<1x8xf32>
    %860 = arith.addf %858, %859 : vector<1x8xf32>
    %c0_86 = arith.constant 0 : index
    %c0_87 = arith.constant 0 : index
    %861 = vector.load %arg13[%c0_86, %c0_87] : memref<1x128xf32, #tpu.memory_space<vmem>>, vector<1x8xf32>
    tpu.vector_store %arg13[%c0_86, %c0_87], %860 {strides = array<i32>} : memref<1x128xf32, #tpu.memory_space<vmem>>, vector<1x8xf32>,
    %862 = vector.extract_strided_slice %856 {offsets = [4, 0], sizes = [1, 8], strides = [1, 1]} : vector<8x64xf32> to vector<1x8xf32>
    %863 = vector.broadcast %2 : f32 to vector<1x8xf32>
    %864 = arith.addf %862, %863 : vector<1x8xf32>
    %c0_88 = arith.constant 0 : index
    %c8 = arith.constant 8 : index
    %865 = vector.load %arg13[%c0_88, %c8] : memref<1x128xf32, #tpu.memory_space<vmem>>, vector<1x8xf32>
    tpu.vector_store %arg13[%c0_88, %c8], %864 {strides = array<i32>} : memref<1x128xf32, #tpu.memory_space<vmem>>, vector<1x8xf32>,
    %866 = vector.extract_strided_slice %857 {offsets = [0, 32], sizes = [1, 8], strides = [1, 1]} : vector<8x64xf32> to vector<1x8xf32>
    %867 = vector.broadcast %2 : f32 to vector<1x8xf32>
    %868 = arith.addf %866, %867 : vector<1x8xf32>
    %c0_89 = arith.constant 0 : index
    %c16 = arith.constant 16 : index
    %869 = vector.load %arg13[%c0_89, %c16] : memref<1x128xf32, #tpu.memory_space<vmem>>, vector<1x8xf32>
    tpu.vector_store %arg13[%c0_89, %c16], %868 {strides = array<i32>} : memref<1x128xf32, #tpu.memory_space<vmem>>, vector<1x8xf32>,
    %870 = vector.extract_strided_slice %856 {offsets = [4, 32], sizes = [1, 8], strides = [1, 1]} : vector<8x64xf32> to vector<1x8xf32>
    %871 = vector.broadcast %2 : f32 to vector<1x8xf32>
    %872 = arith.addf %870, %871 : vector<1x8xf32>
    %c0_90 = arith.constant 0 : index
    %c24 = arith.constant 24 : index
    %873 = vector.load %arg13[%c0_90, %c24] : memref<1x128xf32, #tpu.memory_space<vmem>>, vector<1x8xf32>
    tpu.vector_store %arg13[%c0_90, %c24], %872 {strides = array<i32>} : memref<1x128xf32, #tpu.memory_space<vmem>>, vector<1x8xf32>,
    %874 = vector.extract_strided_slice %857 {offsets = [1, 8], sizes = [1, 8], strides = [1, 1]} : vector<8x64xf32> to vector<1x8xf32>
    %875 = vector.broadcast %2 : f32 to vector<1x8xf32>
    %876 = arith.addf %874, %875 : vector<1x8xf32>
    %c0_91 = arith.constant 0 : index
    %c32 = arith.constant 32 : index
    %877 = vector.load %arg13[%c0_91, %c32] : memref<1x128xf32, #tpu.memory_space<vmem>>, vector<1x8xf32>
    tpu.vector_store %arg13[%c0_91, %c32], %876 {strides = array<i32>} : memref<1x128xf32, #tpu.memory_space<vmem>>, vector<1x8xf32>,
    %878 = vector.extract_strided_slice %856 {offsets = [5, 8], sizes = [1, 8], strides = [1, 1]} : vector<8x64xf32> to vector<1x8xf32>
    %879 = vector.broadcast %2 : f32 to vector<1x8xf32>
    %880 = arith.addf %878, %879 : vector<1x8xf32>
    %c0_92 = arith.constant 0 : index
    %c40 = arith.constant 40 : index
    %881 = vector.load %arg13[%c0_92, %c40] : memref<1x128xf32, #tpu.memory_space<vmem>>, vector<1x8xf32>
    tpu.vector_store %arg13[%c0_92, %c40], %880 {strides = array<i32>} : memref<1x128xf32, #tpu.memory_space<vmem>>, vector<1x8xf32>,
    %882 = vector.extract_strided_slice %857 {offsets = [1, 40], sizes = [1, 8], strides = [1, 1]} : vector<8x64xf32> to vector<1x8xf32>
    %883 = vector.broadcast %2 : f32 to vector<1x8xf32>
    %884 = arith.addf %882, %883 : vector<1x8xf32>
    %c0_93 = arith.constant 0 : index
    %c48 = arith.constant 48 : index
    %885 = vector.load %arg13[%c0_93, %c48] : memref<1x128xf32, #tpu.memory_space<vmem>>, vector<1x8xf32>
    tpu.vector_store %arg13[%c0_93, %c48], %884 {strides = array<i32>} : memref<1x128xf32, #tpu.memory_space<vmem>>, vector<1x8xf32>,
    %886 = vector.extract_strided_slice %856 {offsets = [5, 40], sizes = [1, 8], strides = [1, 1]} : vector<8x64xf32> to vector<1x8xf32>
    %887 = vector.broadcast %2 : f32 to vector<1x8xf32>
    %888 = arith.addf %886, %887 : vector<1x8xf32>
    %c0_94 = arith.constant 0 : index
    %c56 = arith.constant 56 : index
    %889 = vector.load %arg13[%c0_94, %c56] : memref<1x128xf32, #tpu.memory_space<vmem>>, vector<1x8xf32>
    tpu.vector_store %arg13[%c0_94, %c56], %888 {strides = array<i32>} : memref<1x128xf32, #tpu.memory_space<vmem>>, vector<1x8xf32>,
    %890 = vector.extract_strided_slice %857 {offsets = [2, 16], sizes = [1, 8], strides = [1, 1]} : vector<8x64xf32> to vector<1x8xf32>
    %891 = vector.broadcast %2 : f32 to vector<1x8xf32>
    %892 = arith.addf %890, %891 : vector<1x8xf32>
    %c0_95 = arith.constant 0 : index
    %c64 = arith.constant 64 : index
    %893 = vector.load %arg13[%c0_95, %c64] : memref<1x128xf32, #tpu.memory_space<vmem>>, vector<1x8xf32>
    tpu.vector_store %arg13[%c0_95, %c64], %892 {strides = array<i32>} : memref<1x128xf32, #tpu.memory_space<vmem>>, vector<1x8xf32>,
    %894 = vector.extract_strided_slice %856 {offsets = [6, 16], sizes = [1, 8], strides = [1, 1]} : vector<8x64xf32> to vector<1x8xf32>
    %895 = vector.broadcast %2 : f32 to vector<1x8xf32>
    %896 = arith.addf %894, %895 : vector<1x8xf32>
    %c0_96 = arith.constant 0 : index
    %c72 = arith.constant 72 : index
    %897 = vector.load %arg13[%c0_96, %c72] : memref<1x128xf32, #tpu.memory_space<vmem>>, vector<1x8xf32>
    tpu.vector_store %arg13[%c0_96, %c72], %896 {strides = array<i32>} : memref<1x128xf32, #tpu.memory_space<vmem>>, vector<1x8xf32>,
    %898 = vector.extract_strided_slice %857 {offsets = [2, 48], sizes = [1, 8], strides = [1, 1]} : vector<8x64xf32> to vector<1x8xf32>
    %899 = vector.broadcast %2 : f32 to vector<1x8xf32>
    %900 = arith.addf %898, %899 : vector<1x8xf32>
    %c0_97 = arith.constant 0 : index
    %c80 = arith.constant 80 : index
    %901 = vector.load %arg13[%c0_97, %c80] : memref<1x128xf32, #tpu.memory_space<vmem>>, vector<1x8xf32>
    tpu.vector_store %arg13[%c0_97, %c80], %900 {strides = array<i32>} : memref<1x128xf32, #tpu.memory_space<vmem>>, vector<1x8xf32>,
    %902 = vector.extract_strided_slice %856 {offsets = [6, 48], sizes = [1, 8], strides = [1, 1]} : vector<8x64xf32> to vector<1x8xf32>
    %903 = vector.broadcast %2 : f32 to vector<1x8xf32>
    %904 = arith.addf %902, %903 : vector<1x8xf32>
    %c0_98 = arith.constant 0 : index
    %c88 = arith.constant 88 : index
    %905 = vector.load %arg13[%c0_98, %c88] : memref<1x128xf32, #tpu.memory_space<vmem>>, vector<1x8xf32>
    tpu.vector_store %arg13[%c0_98, %c88], %904 {strides = array<i32>} : memref<1x128xf32, #tpu.memory_space<vmem>>, vector<1x8xf32>,
    %906 = vector.extract_strided_slice %857 {offsets = [3, 24], sizes = [1, 8], strides = [1, 1]} : vector<8x64xf32> to vector<1x8xf32>
    %907 = vector.broadcast %2 : f32 to vector<1x8xf32>
    %908 = arith.addf %906, %907 : vector<1x8xf32>
    %c0_99 = arith.constant 0 : index
    %c96 = arith.constant 96 : index
    %909 = vector.load %arg13[%c0_99, %c96] : memref<1x128xf32, #tpu.memory_space<vmem>>, vector<1x8xf32>
    tpu.vector_store %arg13[%c0_99, %c96], %908 {strides = array<i32>} : memref<1x128xf32, #tpu.memory_space<vmem>>, vector<1x8xf32>,
    %910 = vector.extract_strided_slice %856 {offsets = [7, 24], sizes = [1, 8], strides = [1, 1]} : vector<8x64xf32> to vector<1x8xf32>
    %911 = vector.broadcast %2 : f32 to vector<1x8xf32>
    %912 = arith.addf %910, %911 : vector<1x8xf32>
    %c0_100 = arith.constant 0 : index
    %c104 = arith.constant 104 : index
    %913 = vector.load %arg13[%c0_100, %c104] : memref<1x128xf32, #tpu.memory_space<vmem>>, vector<1x8xf32>
    tpu.vector_store %arg13[%c0_100, %c104], %912 {strides = array<i32>} : memref<1x128xf32, #tpu.memory_space<vmem>>, vector<1x8xf32>,
    %914 = vector.extract_strided_slice %857 {offsets = [3, 56], sizes = [1, 8], strides = [1, 1]} : vector<8x64xf32> to vector<1x8xf32>
    %915 = vector.broadcast %2 : f32 to vector<1x8xf32>
    %916 = arith.addf %914, %915 : vector<1x8xf32>
    %c0_101 = arith.constant 0 : index
    %c112 = arith.constant 112 : index
    %917 = vector.load %arg13[%c0_101, %c112] : memref<1x128xf32, #tpu.memory_space<vmem>>, vector<1x8xf32>
    tpu.vector_store %arg13[%c0_101, %c112], %916 {strides = array<i32>} : memref<1x128xf32, #tpu.memory_space<vmem>>, vector<1x8xf32>,
    %918 = vector.extract_strided_slice %856 {offsets = [7, 56], sizes = [1, 8], strides = [1, 1]} : vector<8x64xf32> to vector<1x8xf32>
    %919 = vector.broadcast %2 : f32 to vector<1x8xf32>
    %920 = arith.addf %918, %919 : vector<1x8xf32>
    %c0_102 = arith.constant 0 : index
    %c120 = arith.constant 120 : index
    %921 = vector.load %arg13[%c0_102, %c120] : memref<1x128xf32, #tpu.memory_space<vmem>>, vector<1x8xf32>
    tpu.vector_store %arg13[%c0_102, %c120], %920 {strides = array<i32>} : memref<1x128xf32, #tpu.memory_space<vmem>>, vector<1x8xf32>,
    return
  }
  func.func @transform_0(%arg0: i32) -> (i32, i32) {
    %c0_i32 = arith.constant 0 : i32
    %c0_i32_0 = arith.constant 0 : i32
    %c0_i32_1 = arith.constant 0 : i32
    return %c0_i32, %c0_i32_0 : i32, i32
  }
  func.func @transform_1(%arg0: i32) -> (i32, i32) {
    %c0_i32 = arith.constant 0 : i32
    %c0_i32_0 = arith.constant 0 : i32
    %c0_i32_1 = arith.constant 0 : i32
    return %c0_i32, %c0_i32_0 : i32, i32
  }
  func.func @transform_2(%arg0: i32) -> (i32, i32) {
    %c0_i32 = arith.constant 0 : i32
    %c0_i32_0 = arith.constant 0 : i32
    %c0_i32_1 = arith.constant 0 : i32
    return %c0_i32, %c0_i32_0 : i32, i32
  }
  func.func @transform_3(%arg0: i32) -> (i32, i32) {
    %c0_i32 = arith.constant 0 : i32
    %c0_i32_0 = arith.constant 0 : i32
    %c0_i32_1 = arith.constant 0 : i32
    return %c0_i32, %c0_i32_0 : i32, i32
  }
  func.func @transform_4(%arg0: i32) -> (i32, i32) {
    %c0_i32 = arith.constant 0 : i32
    %c0_i32_0 = arith.constant 0 : i32
    %c0_i32_1 = arith.constant 0 : i32
    return %c0_i32, %c0_i32_0 : i32, i32
  }
  func.func @transform_5(%arg0: i32) -> (i32, i32) {
    %c0_i32 = arith.constant 0 : i32
    %c0_i32_0 = arith.constant 0 : i32
    %c0_i32_1 = arith.constant 0 : i32
    return %c0_i32, %c0_i32_0 : i32, i32
  }
  func.func @transform_6(%arg0: i32) -> (i32, i32) {
    %c0_i32 = arith.constant 0 : i32
    %c0_i32_0 = arith.constant 0 : i32
    %c0_i32_1 = arith.constant 0 : i32
    return %c0_i32, %c0_i32_0 : i32, i32
  }
  func.func @transform_7(%arg0: i32) -> (i32, i32) {
    %c0_i32 = arith.constant 0 : i32
    %c0_i32_0 = arith.constant 0 : i32
    %c0_i32_1 = arith.constant 0 : i32
    return %c0_i32, %c0_i32_0 : i32, i32
  }
  func.func @transform_8(%arg0: i32) -> (i32, i32) {
    %c0_i32 = arith.constant 0 : i32
    %c0_i32_0 = arith.constant 0 : i32
    %c0_i32_1 = arith.constant 0 : i32
    return %c0_i32, %c0_i32_0 : i32, i32
  }
  func.func @transform_9(%arg0: i32) -> (i32, i32) {
    %c0_i32 = arith.constant 0 : i32
    %c0_i32_0 = arith.constant 0 : i32
    %c0_i32_1 = arith.constant 0 : i32
    return %c0_i32, %c0_i32_0 : i32, i32
  }
  func.func @transform_10(%arg0: i32) -> (i32, i32) {
    %c0_i32 = arith.constant 0 : i32
    %c0_i32_0 = arith.constant 0 : i32
    %c0_i32_1 = arith.constant 0 : i32
    return %c0_i32, %c0_i32_0 : i32, i32
  }
  func.func @transform_11(%arg0: i32) -> i32 {
    %c0_i32 = arith.constant 0 : i32
    %c0_i32_0 = arith.constant 0 : i32
    return %c0_i32 : i32
  }
  func.func @transform_12(%arg0: i32) -> (i32, i32) {
    %c0_i32 = arith.constant 0 : i32
    %c0_i32_0 = arith.constant 0 : i32
    %c0_i32_1 = arith.constant 0 : i32
    return %c0_i32, %c0_i32_0 : i32, i32
  }
  func.func @transform_13(%arg0: i32) -> (i32, i32) {
    %c0_i32 = arith.constant 0 : i32
    %c0_i32_0 = arith.constant 0 : i32
    %c0_i32_1 = arith.constant 0 : i32
    return %c0_i32, %c0_i32_0 : i32, i32
  }
}

</mosaic_0001>

<bundles_post_ra>
// kernel: contrast2_forward.1
= control target key start
LH: loop header
LB: loop body
LE: loop exit
PB: predicated region body
PF: predicated region fallthrough
CT: control target
= control target key end

     0   :  { %19 = vsyncpa [#allocation4], 0  ;;  %s5749_s0 = inlined_call_operand.vmem [shape: f32[64,16], index: 0, kind: input, shape index: {}]   ;;  %s5750_s1 = inlined_call_operand.vmem [shape: f32[64,64], index: 1, kind: input, shape index: {}]   ;;  %s5751_s2 = inlined_call_operand.vmem [shape: f32[64,64], index: 2, kind: input, shape index: {}]   ;;  %s5752_s3 = inlined_call_operand.vmem [shape: f32[16,64], index: 3, kind: input, shape index: {}]   ;;  %s5753_s4 = inlined_call_operand.vmem [shape: f32[1,32], index: 4, kind: input, shape index: {}]   ;;  %s5754_s5 = inlined_call_operand.vmem [shape: f32[1,32], index: 5, kind: input, shape index: {}]   ;;  %s5755_s6 = inlined_call_operand.vmem [shape: f32[32,256], index: 6, kind: input, shape index: {}]   ;;  %s5756_s7 = inlined_call_operand.vmem [shape: f32[1,256], index: 7, kind: input, shape index: {}]   ;;  %s5757_s8 = inlined_call_operand.vmem [shape: f32[32,256], index: 8, kind: input, shape index: {}]   ;;  %s5758_s9 = inlined_call_operand.vmem [shape: f32[1,256], index: 9, kind: input, shape index: {}]   ;;  %s5759_s10 = inlined_call_operand.vmem [shape: f32[256,256], index: 10, kind: input, shape index: {}]   ;;  %s5760_s11 = inlined_call_operand.vmem [shape: f32[4], index: 11, kind: input, shape index: {}]   ;;  %s5761_s12 = inlined_call_operand.vmem [shape: f32[1,128], index: 12, kind: output, shape index: {0}]   ;;  %s5762_s13 = inlined_call_operand.hbm [shape: f32[32,256], index: 13, kind: output, shape index: {1}]  }
   0x1   :  { %20 = vsyncpa [#allocation3], 0  ;;  %s49_s27 = sshll.u32 %s5760_s11, 4  ;;  %s50_s27 = int_to_ptr.vmem [resolvable:$true] %s49_s27 }
   0x2   :  { %s3741_s28 = scalar_lea.vmem %s50_s27, 16  ;;  %p3746_p1 = scmp.lt.s32.totalorder %s50_s27, %s50_s27 }
   0x3   :  { %p3742_p0 = scmp.ne.s32.totalorder %s50_s27, %s3741_s28  ;;  %p3747_p2 = scmp.lt.s32.totalorder %s3741_s28, %s3741_s28 }
   0x5   :  { %p3748_p3 = por %p3747_p2, %p3746_p1 }
   0x7   :  { %p3749_p4 = pnand %p3748_p3, %p3742_p0 }
   0x9   :  { %3752 = shalt.err (!%p3749_p4)
}
   0xa   :  { %s3777_s29 = smov [#allocation2]  }
   0xb   :  { %52 = dma.vmem_to_smem %s50_s27, 16, %s3777_s29, [#allocation4]  }
   0xc   :  { %3773 = dma.done.wait [#allocation4], 16  }
   0xd   :  { %3774 = vsyncadd [#allocation4], 4294967280 }
   0xe   :  { %56 = sfence }
   0xf   :  { %v85_v0 = vld [vmem:[%s5752_s3 + $0x8] sm:$0xff]  ;;  %v84_v1 = vld [vmem:[%s5752_s3] sm:$0xff]  ;;  %vm86_vm0 = vcmask 130048   ;;  %v62_v4 = vld [vmem:[%s5749_s0 + $0x10] sm:$0xff]  ;;  %vm223_vm1 = vcmask 523264   ;;  %s3778_s29 = smov 96  }
  0x10   :  { %v60_v2 = vld [vmem:[%s5749_s0] sm:$0xff]  ;;  %3644 = vmatprep.subr.mxu0 %v85_v0  ;;  %v61_v3 = vld [vmem:[%s5749_s0 + $0x8] sm:$0xff]  ;;  %v63_v5 = vld [vmem:[%s5749_s0 + $0x18] sm:$0xff]  ;;  %v3779_v34 = vmov 0.0   ;;  %vm361_vm2 = vcmask 261120   ;;  %s3782_s30 = smov 32  }
  0x11   :  { %3648 = vmatprep.mubr.msk.f32.mxu0 %vm86_vm0, %v60_v2  ;;  %3645 = vmatpush3.msra.mxu0 %v85_v0  ;;  %v64_v6 = vld [vmem:[%s5749_s0 + $0x20] sm:$0xff]  ;;  %v65_v7 = vld [vmem:[%s5749_s0 + $0x28] sm:$0xff]  ;;  %v66_v8 = vld [vmem:[%s5749_s0 + $0x30] sm:$0xff]  ;;  %s3784_s14 = smov 56   ;;  %s3785_s15 = smov 40  }
  0x12   :  { %3646 = vmatprep.subr.mxu0 %v84_v1  ;;  %v67_v9 = vld [vmem:[%s5749_s0 + $0x38] sm:$0xff]  ;;  %v3908_v10 = vld [vmem:[%s5750_s1] sm:$0xff]  ;;  %v359_v12 = vld [vmem:[%s5755_s6 + $0x30] sm:$0xff]  ;;  %s3787_s16 = smov 64   ;;  %s3788_s11 = smov 112  }
  0x13   :  { %3647 = vmatpush3.msra.mxu0 %v84_v1  ;;  %3676 = vmatprep.mubr.msk.f32.mxu1 %vm223_vm1, %v3908_v10  ;;  %v360_v11 = vld [vmem:[%s5755_s6 + $0x38] sm:$0xff]  ;;  %v358_v13 = vld [vmem:[%s5755_s6 + $0x28] sm:$0xff]  ;;  %v357_v14 = vld [vmem:[%s5755_s6 + $0x20] sm:$0xff]  ;;  %s3789_s18 = smov 24   ;;  %s3790_s0 = smov 48  }
  0x14   :  { %3649 = vmatmul.mubr.msk.f32.vlgmr.msra.gmra.mxu0 %vm86_vm0, %v61_v3  ;;  %410 = vmatprep.subr.mxu0 %v360_v11  ;;  %v356_v15 = vld [vmem:[%s5755_s6 + $0x18] sm:$0xff]  ;;  %v355_v16 = vld [vmem:[%s5755_s6 + $0x10] sm:$0xff]  ;;  %v354_v17 = vld [vmem:[%s5755_s6 + $0x8] sm:$0xff] }
  0x15   :  { %3651 = vmatprep.mubr.msk.f32.mxu0 %vm86_vm0, %v62_v4  ;;  %411 = vmatpush1.msra.mxu0 %v359_v12  ;;  %v353_v18 = vld [vmem:[%s5755_s6] sm:$0xff]  ;;  %v3939_v27 = vld [vmem:[%s5750_s1 + $0x8] sm:$0xff]  ;;  %v3944_v28 = vld [vmem:[%s5750_s1 + $0x10] sm:$0xff]  ;;  %s3780_s6 = smov 8  }
  0x16   :  { %412 = vmatprep.subr.mxu0 %v358_v13  ;;  %v3953_v29 = vld [vmem:[%s5750_s1 + $0x18] sm:$0xff]  ;;  %v3958_v30 = vld [vmem:[%s5750_s1 + $0x20] sm:$0xff]  ;;  %v3967_v31 = vld [vmem:[%s5750_s1 + $0x28] sm:$0xff] }
  0x17   :  { %413 = vmatpush1.msra.mxu0 %v357_v14  ;;  %v3972_v32 = vld [vmem:[%s5750_s1 + $0x30] sm:$0xff]  ;;  %v3981_v33 = vld [vmem:[%s5750_s1 + $0x38] sm:$0xff]  ;;  %v3296_v38 = vld [vmem:[%s5753_s4] ss:$0 sm:$0xff] }
  0x18   :  { %3652 = vmatmul.mubr.msk.f32.gmra.mxu0 %vm86_vm0, %v63_v5  ;;  %414 = vmatprep.subr.mxu0 %v356_v15  ;;  %v4007_v60 = vld [vmem:[%s5751_s2] sm:$0xff]  ;;  %v4015_v61 = vld [vmem:[%s5751_s2 + $0x8] sm:$0xff]  ;;  %v4020_v62 = vld [vmem:[%s5751_s2 + $0x10] sm:$0xff] }
  0x19   :  { %3654 = vmatprep.mubr.msk.f32.mxu0 %vm86_vm0, %v64_v6  ;;  %415 = vmatpush1.msra.mxu0 %v355_v16  ;;  %v4029_v63 = vld [vmem:[%s5751_s2 + $0x18] sm:$0xff]  ;;  %v4034_v0 = vld [vmem:[%s5751_s2 + $0x20] sm:$0xff]  ;;  %v4043_v1 = vld [vmem:[%s5751_s2 + $0x28] sm:$0xff] }
  0x1a   :  { %416 = vmatprep.subr.mxu0 %v354_v17  ;;  %v4048_v2 = vld [vmem:[%s5751_s2 + $0x30] sm:$0xff]  ;;  %v4057_v3 = vld [vmem:[%s5751_s2 + $0x38] sm:$0xff]  ;;  %s3791_s2 = smov [#allocation5]  }
  0x1b   :  { %417 = vmatpush1.msra.mxu0 %v353_v18  ;;  %s3272_s19 = sshll.u32 %s3791_s2, 4  ;;  %s3273_s19 = int_to_ptr.vmem [resolvable:$true] %s3272_s19 }
  0x1c   :  { %3655 = vmatmul.mubr.msk.f32.gmra.mxu0 %vm86_vm0, %v65_v7  ;;  %s3753_s20 = scalar_lea.vmem %s3273_s19, 1024  ;;  %p3758_p6 = scmp.lt.s32.totalorder %s3273_s19, %s3273_s19 }
  0x1d   :  { %3657 = vmatprep.mubr.msk.f32.mxu0 %vm86_vm0, %v66_v8  ;;  %p3754_p5 = scmp.ne.s32.totalorder %s3273_s19, %s3753_s20  ;;  %p3759_p7 = scmp.lt.s32.totalorder %s3753_s20, %s3753_s20 }
  0x1f   :  { %p3760_p8 = por %p3759_p7, %p3758_p6 }
  0x20   :  { %3658 = vmatmul.mubr.msk.f32.gmra.mxu0 %vm86_vm0, %v67_v9 }
  0x21   :  { %450 = vmatprep.mubr.f32.mxu0 %v3779_v34  ;;  %p3761_p9 = pnand %p3760_p8, %p3754_p5 }
  0xd4   :  { %v3650_v19 = vpop.f32.mrf.mxu0 }
  0xd6   :  { %v177_v20 = vpop.f32.mrf.mxu0 }
  0xd8   :  { %v3653_v21 = vpop.f32.mrf.mxu0 }
  0xda   :  { %v187_v22 = vpop.f32.mrf.mxu0 }
  0xdc   :  { %v3656_v23 = vpop.f32.mrf.mxu0 }
  0xdd   :  { %698 = vrot.lane.b32.xlu1 %v3656_v23, %s3778_s29 }
  0xde   :  { %v197_v24 = vpop.f32.mrf.mxu0 }
  0xe0   :  { %v3659_v25 = vpop.f32.mrf.mxu0 }
  0xe1   :  { %696 = vrot.lane.b32.xlu1 %v197_v24, %s3778_s29  ;;  %702 = vrot.lane.b32.xlu0 %v3659_v25, %s3778_s29 }
  0xe2   :  { %3660 = vmatprep.subr.mxu1 %v3659_v25  ;;  %v207_v26 = vpop.f32.mrf.mxu0 }
  0xe3   :  { %3661 = vmatpush3.msra.mxu1 %v3659_v25  ;;  %v844_v25 = vld [vmem:[%s5757_s8 + $0x18] sm:$0xff] }
  0xe4   :  { %3662 = vmatprep.subr.mxu1 %v207_v26 }
  0xe5   :  { %3663 = vmatpush3.msra.mxu1 %v207_v26  ;;  %692 = vrot.lane.b32.xlu1 %v187_v22, %s3778_s29 }
  0xe6   :  { %700 = vrot.lane.b32.xlu0 %v207_v26, %s3778_s29  ;;  %3664 = vmatprep.subr.mxu1 %v3656_v23  ;;  %v843_v26 = vld [vmem:[%s5757_s8 + $0x10] sm:$0xff] }
  0xe7   :  { %3665 = vmatpush3.msra.mxu1 %v3656_v23  ;;  %v846_v23 = vld [vmem:[%s5757_s8 + $0x28] sm:$0xff] }
  0xe8   :  { %3666 = vmatprep.subr.mxu1 %v197_v24 }
  0xe9   :  { %3667 = vmatpush3.msra.mxu1 %v197_v24  ;;  %688 = vrot.lane.b32.xlu1 %v177_v20, %s3778_s29  ;;  %v845_v24 = vld [vmem:[%s5757_s8 + $0x20] sm:$0xff] }
  0xea   :  { %694 = vrot.lane.b32.xlu0 %v3653_v21, %s3778_s29  ;;  %3668 = vmatprep.subr.mxu1 %v3653_v21 }
  0xeb   :  { %3669 = vmatpush3.msra.mxu1 %v3653_v21  ;;  %v848_v21 = vld [vmem:[%s5757_s8 + $0x38] sm:$0xff] }
  0xec   :  { %3670 = vmatprep.subr.mxu1 %v187_v22 }
  0xed   :  { %3671 = vmatpush3.msra.mxu1 %v187_v22  ;;  %v847_v22 = vld [vmem:[%s5757_s8 + $0x30] sm:$0xff] }
  0xee   :  { %690 = vrot.lane.b32.xlu0 %v3650_v19, %s3778_s29  ;;  %3672 = vmatprep.subr.mxu1 %v3650_v19  ;;  %s3287_s29 = sld [smem:[#allocation2 + $0x2]] }
  0xef   :  { %3673 = vmatpush3.msra.mxu1 %v3650_v19 }
  0xf0   :  { %3674 = vmatprep.subr.mxu1 %v177_v20 }
  0xf1   :  { %3675 = vmatpush3.msra.mxu1 %v177_v20 }
  0xf2   :  { %3677 = vmatmul.mubr.msk.f32.vlgmr.msra.gmra.mxu1 %vm223_vm1, %v3939_v27 }
  0xf3   :  { %3679 = vmatprep.mubr.msk.f32.mxu1 %vm223_vm1, %v3944_v28 }
  0xf6   :  { %3680 = vmatmul.mubr.msk.f32.gmra.mxu1 %vm223_vm1, %v3953_v29 }
  0xf7   :  { %3682 = vmatprep.mubr.msk.f32.mxu1 %vm223_vm1, %v3958_v30 }
  0xfa   :  { %3683 = vmatmul.mubr.msk.f32.gmra.mxu1 %vm223_vm1, %v3967_v31 }
  0xfb   :  { %3685 = vmatprep.mubr.msk.f32.mxu1 %vm223_vm1, %v3972_v32 }
  0xfe   :  { %3686 = vmatmul.mubr.msk.f32.gmra.mxu1 %vm223_vm1, %v3981_v33 }
  0xff   :  { %575 = vmatprep.mubr.f32.mxu1 %v3779_v34 }
 0x14f   :  { %v699_v36 = vpop.permute.xlu1 %698 }
 0x153   :  { %v703_v35 = vpop.permute.xlu0 %702  ;;  %v697_v43 = vpop.permute.xlu1 %696 }
 0x154   :  { %3688 = vmatprep.subr.mxu0 %v703_v35 }
 0x157   :  { %v693_v48 = vpop.permute.xlu1 %692 }
 0x158   :  { %v701_v41 = vpop.permute.xlu0 %700 }
 0x15b   :  { %v689_v53 = vpop.permute.xlu1 %688 }
 0x15c   :  { %v695_v46 = vpop.permute.xlu0 %694 }
 0x160   :  { %v691_v51 = vpop.permute.xlu0 %690 }
 0x1b2   :  { %v3678_v37 = vpop.f32.mrf.mxu1 }
 0x1b3   :  { %v320_v44 = vadd.f32 %v3678_v37, %v3296_v38 }
 0x1b4   :  { %v314_v39 = vpop.f32.mrf.mxu1 }
 0x1b5   :  { %v315_v40 = vadd.f32 %v3296_v38, %v314_v39 }
 0x1b6   :  { %v3681_v42 = vpop.f32.mrf.mxu1 }
 0x1b7   :  { %3305 = vmatmul.mubr.msk.f32.vlgmr.msra.gmra.mxu0 %vm361_vm2, %v315_v40  ;;  %v330_v50 = vadd.f32 %v3681_v42, %v3296_v38 }
 0x1b8   :  { %3689 = vmatpush3.msra.mxu0 %v703_v35  ;;  %456 = vmatprep.mubr.f32.mxu0 %v3779_v34  ;;  %v324_v45 = vpop.f32.mrf.mxu1  ;;  %v841_v35 = vld [vmem:[%s5757_s8] sm:$0xff] }
 0x1b9   :  { %3690 = vmatprep.subr.mxu0 %v701_v41  ;;  %v325_v47 = vadd.f32 %v3296_v38, %v324_v45 }
 0x1ba   :  { %3691 = vmatpush3.msra.mxu0 %v701_v41  ;;  %v3684_v49 = vpop.f32.mrf.mxu1 }
 0x1bb   :  { %3692 = vmatprep.subr.mxu0 %v699_v36  ;;  %3306 = vmatmul.mubr.msk.f32.gmra.mxu0 %vm361_vm2, %v320_v44  ;;  %v340_v56 = vadd.f32 %v3684_v49, %v3296_v38 }
 0x1bc   :  { %3693 = vmatpush3.msra.mxu0 %v699_v36  ;;  %462 = vmatprep.mubr.f32.mxu0 %v3779_v34  ;;  %v334_v52 = vpop.f32.mrf.mxu1 }
 0x1bd   :  { %3694 = vmatprep.subr.mxu0 %v697_v43  ;;  %v335_v54 = vadd.f32 %v3296_v38, %v334_v52 }
 0x1be   :  { %3695 = vmatpush3.msra.mxu0 %v697_v43  ;;  %v3687_v55 = vpop.f32.mrf.mxu1 }
 0x1bf   :  { %3696 = vmatprep.subr.mxu0 %v695_v46  ;;  %3307 = vmatmul.mubr.msk.f32.gmra.mxu0 %vm361_vm2, %v325_v47  ;;  %v350_v59 = vadd.f32 %v3687_v55, %v3296_v38 }
 0x1c0   :  { %3697 = vmatpush3.msra.mxu0 %v695_v46  ;;  %468 = vmatprep.mubr.f32.mxu0 %v3779_v34  ;;  %v344_v57 = vpop.f32.mrf.mxu1 }
 0x1c1   :  { %3698 = vmatprep.subr.mxu0 %v693_v48  ;;  %v345_v58 = vadd.f32 %v3296_v38, %v344_v57 }
 0x1c2   :  { %3699 = vmatpush3.msra.mxu0 %v693_v48 }
 0x1c3   :  { %3700 = vmatprep.subr.mxu0 %v691_v51  ;;  %3308 = vmatmul.mubr.msk.f32.gmra.mxu0 %vm361_vm2, %v330_v50 }
 0x1c4   :  { %3701 = vmatpush3.msra.mxu0 %v691_v51  ;;  %474 = vmatprep.mubr.f32.mxu0 %v3779_v34 }
 0x1c5   :  { %3702 = vmatprep.subr.mxu0 %v689_v53 }
 0x1c6   :  { %3703 = vmatpush3.msra.mxu0 %v689_v53 }
 0x1c7   :  { %3309 = vmatmul.mubr.msk.f32.gmra.mxu0 %vm361_vm2, %v335_v54 }
 0x1c8   :  { %480 = vmatprep.mubr.f32.mxu0 %v3779_v34 }
 0x1cb   :  { %3310 = vmatmul.mubr.msk.f32.gmra.mxu0 %vm361_vm2, %v340_v56 }
 0x1cc   :  { %486 = vmatprep.mubr.f32.mxu0 %v3779_v34 }
 0x1cf   :  { %3311 = vmatmul.mubr.msk.f32.gmra.mxu0 %vm361_vm2, %v345_v58 }
 0x1d0   :  { %492 = vmatprep.mubr.f32.mxu0 %v3779_v34 }
 0x1d3   :  { %3312 = vmatmul.mubr.msk.f32.gmra.mxu0 %vm361_vm2, %v350_v59 }
 0x1d4   :  { %3704 = vmatprep.mubr.msk.f32.mxu0 %vm223_vm1, %v4007_v60 }
 0x1d7   :  { %3705 = vmatmul.mubr.msk.f32.vlgmr.msra.gmra.mxu0 %vm223_vm1, %v4015_v61 }
 0x1d8   :  { %3707 = vmatprep.mubr.msk.f32.mxu0 %vm223_vm1, %v4020_v62 }
 0x1db   :  { %3708 = vmatmul.mubr.msk.f32.gmra.mxu0 %vm223_vm1, %v4029_v63 }
 0x1dc   :  { %3710 = vmatprep.mubr.msk.f32.mxu0 %vm223_vm1, %v4034_v0 }
 0x1df   :  { %3711 = vmatmul.mubr.msk.f32.gmra.mxu0 %vm223_vm1, %v4043_v1 }
 0x1e0   :  { %3713 = vmatprep.mubr.msk.f32.mxu0 %vm223_vm1, %v4048_v2 }
 0x1e3   :  { %3714 = vmatmul.mubr.msk.f32.gmra.mxu0 %vm223_vm1, %v4057_v3 }
 0x1e4   :  { %1062 = vmatprep.mubr.f32.mxu0 %v3779_v34 }
 0x277   :  { %v452_v4 = vpop.f32.mrf.mxu0 }
 0x279   :  { %v454_v5 = vpop.f32.mrf.mxu0 }
 0x27b   :  { %v458_v6 = vpop.f32.mrf.mxu0 }
 0x27d   :  { %v460_v7 = vpop.f32.mrf.mxu0 }
 0x27f   :  { %v464_v8 = vpop.f32.mrf.mxu0 }
 0x281   :  { %v466_v9 = vpop.f32.mrf.mxu0 }
 0x283   :  { %v470_v11 = vpop.f32.mrf.mxu0 }
 0x285   :  { %v472_v12 = vpop.f32.mrf.mxu0 }
 0x287   :  { %v476_v13 = vpop.f32.mrf.mxu0 }
 0x289   :  { %v478_v14 = vpop.f32.mrf.mxu0 }
 0x28b   :  { %v482_v15 = vpop.f32.mrf.mxu0 }
 0x28d   :  { %v484_v16 = vpop.f32.mrf.mxu0 }
 0x28f   :  { %v488_v17 = vpop.f32.mrf.mxu0 }
 0x291   :  { %v490_v18 = vpop.f32.mrf.mxu0 }
 0x293   :  { %v494_v19 = vpop.f32.mrf.mxu0 }
 0x295   :  { %v496_v20 = vpop.f32.mrf.mxu0 }
 0x296   :  { %527 = vmatprep.subr.mxu1 %v496_v20  ;;  %v501_v20 = vlaneseq }
 0x297   :  { %528 = vmatpush1.msra.mxu1 %v494_v19 }
 0x298   :  { %529 = vmatprep.subr.mxu1 %v490_v18 }
 0x299   :  { %530 = vmatpush1.msra.mxu1 %v488_v17 }
 0x29a   :  { %531 = vmatprep.subr.mxu1 %v484_v16 }
 0x29b   :  { %532 = vmatpush1.msra.mxu1 %v482_v15 }
 0x29c   :  { %533 = vmatprep.subr.mxu1 %v478_v14 }
 0x29d   :  { %534 = vmatpush1.msra.mxu1 %v476_v13 }
 0x29e   :  { %535 = vmatprep.subr.mxu1 %v472_v12 }
 0x29f   :  { %536 = vmatpush1.msra.mxu1 %v470_v11 }
 0x2a0   :  { %537 = vmatprep.subr.mxu1 %v466_v9 }
 0x2a1   :  { %538 = vmatpush1.msra.mxu1 %v464_v8 }
 0x2a2   :  { %539 = vmatprep.subr.mxu1 %v460_v7 }
 0x2a3   :  { %540 = vmatpush1.msra.mxu1 %v458_v6 }
 0x2a4   :  { %541 = vmatprep.subr.mxu1 %v454_v5 }
 0x2a5   :  { %542 = vmatpush1.msra.mxu1 %v452_v4 }
 0x2a6   :  { %3313 = vmatmul.mubr.msk.f32.vlgmr.msra.gmra.mxu1 %vm223_vm1, %v3908_v10  ;;  %897 = vmatprep.subr.mxu1 %v848_v21  ;;  %v842_v10 = vld [vmem:[%s5757_s8 + $0x8] sm:$0xff]  ;;  %s3781_s8 = smov 120  }
 0x2a7   :  { %898 = vmatpush1.msra.mxu1 %v847_v22  ;;  %581 = vmatprep.mubr.f32.mxu1 %v3779_v34 }
 0x2a8   :  { %899 = vmatprep.subr.mxu1 %v846_v23  ;;  %v4148_v23 = vshrl.u32 %v501_v20, 7 }
 0x2a9   :  { %900 = vmatpush1.msra.mxu1 %v845_v24 }
 0x2aa   :  { %3314 = vmatmul.mubr.msk.f32.gmra.mxu1 %vm223_vm1, %v3939_v27  ;;  %901 = vmatprep.subr.mxu1 %v844_v25  ;;  %v3706_v27 = vpop.f32.mrf.mxu0  ;;  %v4151_v25 = vsub.s32 1, %v4148_v23 }
 0x2ab   :  { %587 = vmatprep.mubr.f32.mxu1 %v3779_v34  ;;  %902 = vmatpush1.msra.mxu1 %v843_v26  ;;  %v4154_v26 = vsub.s32 0, %v4148_v23 }
 0x2ac   :  { %903 = vmatprep.subr.mxu1 %v842_v10  ;;  %v499_v10 = vld [vmem:[%s5756_s7] sm:$0x3]  ;;  %s3786_s7 = smov 80  }
 0x2ad   :  { %904 = vmatpush1.msra.mxu1 %v841_v35  ;;  %v4160_v35 = vrot.slane %v499_v10, %v4151_v25 }
 0x2ae   :  { %3315 = vmatmul.mubr.msk.f32.gmra.mxu1 %vm223_vm1, %v3944_v28  ;;  %v3321_v28 = vld [vmem:[%s5754_s5] ss:$0 sm:$0xff]  ;;  %s57_s5 = sld [smem:[#allocation2]] }
 0x2af   :  { %593 = vmatprep.mubr.f32.mxu1 %v3779_v34  ;;  %v808_v36 = vadd.f32 %v3706_v27, %v3321_v28  ;;  %v4163_v27 = vrot.slane %v499_v10, %v4154_v26 }
 0x2b2   :  { %3316 = vmatmul.mubr.msk.f32.gmra.mxu1 %vm223_vm1, %v3953_v29  ;;  %v802_v29 = vpop.f32.mrf.mxu0 }
 0x2b3   :  { %599 = vmatprep.mubr.f32.mxu1 %v3779_v34 }
 0x2b6   :  { %3317 = vmatmul.mubr.msk.f32.gmra.mxu1 %vm223_vm1, %v3958_v30  ;;  %v803_v30 = vadd.f32 %v3321_v28, %v802_v29 }
 0x2b7   :  { %605 = vmatprep.mubr.f32.mxu1 %v3779_v34 }
 0x2ba   :  { %3318 = vmatmul.mubr.msk.f32.gmra.mxu1 %vm223_vm1, %v3967_v31  ;;  %v3709_v31 = vpop.f32.mrf.mxu0 }
 0x2bb   :  { %611 = vmatprep.mubr.f32.mxu1 %v3779_v34 }
 0x2be   :  { %3319 = vmatmul.mubr.msk.f32.gmra.mxu1 %vm223_vm1, %v3972_v32  ;;  %v812_v32 = vpop.f32.mrf.mxu0 }
 0x2bf   :  { %617 = vmatprep.mubr.f32.mxu1 %v3779_v34  ;;  %v813_v37 = vadd.f32 %v3321_v28, %v812_v32 }
 0x2c0   :  { %v3712_v38 = vpop.f32.mrf.mxu0 }
 0x2c1   :  { %v828_v42 = vadd.f32 %v3712_v38, %v3321_v28 }
 0x2c2   :  { %3320 = vmatmul.mubr.msk.f32.gmra.mxu1 %vm223_vm1, %v3981_v33  ;;  %v818_v33 = vadd.f32 %v3709_v31, %v3321_v28  ;;  %v822_v39 = vpop.f32.mrf.mxu0  ;;  %v4168_v31 = vstv %s57_s5  ;;  %s3783_s5 = smov 16  }
 0x2c3   :  { %937 = vmatprep.mubr.f32.mxu1 %v3779_v34  ;;  %v823_v40 = vadd.f32 %v3321_v28, %v822_v39 }
 0x2c4   :  { %v3715_v41 = vpop.f32.mrf.mxu0 }
 0x2c5   :  { %v838_v45 = vadd.f32 %v3715_v41, %v3321_v28 }
 0x2c6   :  { %3330 = vmatmul.mubr.msk.f32.vlgmr.msra.gmra.mxu1 %vm361_vm2, %v803_v30  ;;  %v832_v43 = vpop.f32.mrf.mxu0 }
 0x2c7   :  { %943 = vmatprep.mubr.f32.mxu1 %v3779_v34  ;;  %v833_v44 = vadd.f32 %v3321_v28, %v832_v43 }
 0x2ca   :  { %3331 = vmatmul.mubr.msk.f32.gmra.mxu1 %vm361_vm2, %v808_v36 }
 0x2cb   :  { %949 = vmatprep.mubr.f32.mxu1 %v3779_v34 }
 0x2ce   :  { %3332 = vmatmul.mubr.msk.f32.gmra.mxu1 %vm361_vm2, %v813_v37 }
 0x2cf   :  { %955 = vmatprep.mubr.f32.mxu1 %v3779_v34 }
 0x2d2   :  { %3333 = vmatmul.mubr.msk.f32.gmra.mxu1 %vm361_vm2, %v818_v33 }
 0x2d3   :  { %961 = vmatprep.mubr.f32.mxu1 %v3779_v34 }
 0x2d6   :  { %3334 = vmatmul.mubr.msk.f32.gmra.mxu1 %vm361_vm2, %v823_v40 }
 0x2d7   :  { %967 = vmatprep.mubr.f32.mxu1 %v3779_v34 }
 0x2da   :  { %3335 = vmatmul.mubr.msk.f32.gmra.mxu1 %vm361_vm2, %v828_v42 }
 0x2db   :  { %973 = vmatprep.mubr.f32.mxu1 %v3779_v34 }
 0x2de   :  { %3336 = vmatmul.mubr.msk.f32.gmra.mxu1 %vm361_vm2, %v833_v44 }
 0x2df   :  { %979 = vmatprep.mubr.f32.mxu1 %v3779_v34 }
 0x2e2   :  { %3337 = vmatmul.mubr.msk.f32.gmra.mxu1 %vm361_vm2, %v838_v45 }
 0x366   :  { %v4128_v46 = vpop.f32.mrf.mxu1 }
 0x368   :  { %v4130_v47 = vpop.f32.mrf.mxu1 }
 0x36a   :  { %v4132_v48 = vpop.f32.mrf.mxu1 }
 0x36c   :  { %v4134_v49 = vpop.f32.mrf.mxu1 }
 0x36e   :  { %v4136_v50 = vpop.f32.mrf.mxu1 }
 0x370   :  { %v4138_v51 = vpop.f32.mrf.mxu1 }
 0x372   :  { %v4140_v52 = vpop.f32.mrf.mxu1 }
 0x374   :  { %v4142_v53 = vpop.f32.mrf.mxu1 }
 0x376   :  { %v4144_v54 = vpop.f32.mrf.mxu1 }
 0x378   :  { %v4146_v55 = vpop.f32.mrf.mxu1 }
 0x379   :  { %v604_v43 = vadd.f32 %v4146_v55, %v4160_v35  ;;  %v598_v55 = vadd.f32 %v4142_v53, %v4160_v35  ;;  %v592_v53 = vadd.f32 %v4138_v51, %v4160_v35  ;;  %v586_v51 = vadd.f32 %v4134_v49, %v4160_v35 }
 0x37a   :  { %v607_v56 = vpop.f32.mrf.mxu1  ;;  %v580_v49 = vadd.f32 %v4130_v47, %v4160_v35 }
 0x37b   :  { %v608_v40 = vadd.f32 %v607_v56, %v4163_v27  ;;  %v602_v56 = vadd.f32 %v4144_v54, %v4163_v27  ;;  %vm633_vm9 = vcmp.gt.f32.partialorder %v604_v43, 0.0  ;;  %v596_v54 = vadd.f32 %v4140_v52, %v4163_v27 }
 0x37c   :  { %v609_v57 = vpop.f32.mrf.mxu1  ;;  %vm631_vm11 = vcmp.gt.f32.partialorder %v598_v55, 0.0  ;;  %v590_v52 = vadd.f32 %v4136_v50, %v4163_v27  ;;  %vm629_vm13 = vcmp.gt.f32.partialorder %v592_v53, 0.0  ;;  %v584_v50 = vadd.f32 %v4132_v48, %v4163_v27 }
 0x37d   :  { %v610_v38 = vadd.f32 %v609_v57, %v4160_v35  ;;  %v651_v57 = vmul.f32 %v4168_v31, %v608_v40  ;;  %vm634_vm8 = vcmp.gt.f32.partialorder %v608_v40, 0.0  ;;  %vm632_vm10 = vcmp.gt.f32.partialorder %v602_v56, 0.0 }
 0x37e   :  { %v613_v58 = vpop.f32.mrf.mxu1  ;;  %vm630_vm12 = vcmp.gt.f32.partialorder %v596_v54, 0.0  ;;  %vm628_vm14 = vcmp.gt.f32.partialorder %v590_v52, 0.0  ;;  %vm627_vm15 = vcmp.gt.f32.partialorder %v586_v51, 0.0  ;;  %v578_v48 = vadd.f32 %v4128_v46, %v4163_v27 }
 0x37f   :  { %v614_v32 = vadd.f32 %v613_v58, %v4163_v27  ;;  %v652_v44 = vmul.f32 %v4168_v31, %v610_v38  ;;  %vm635_vm7 = vcmp.gt.f32.partialorder %v610_v38, 0.0  ;;  %v650_v58 = vmul.f32 %v4168_v31, %v604_v43 }
 0x380   :  { %v615_v59 = vpop.f32.mrf.mxu1  ;;  %v642_v47 = vmul.f32 %v4168_v31, %v580_v49  ;;  %vm626_vm0 = vcmp.gt.f32.partialorder %v584_v50, 0.0  ;;  %vm625_vm2 = vcmp.gt.f32.partialorder %v580_v49, 0.0  ;;  %v641_v46 = vmul.f32 %v4168_v31, %v578_v48 }
 0x381   :  { %v616_v30 = vadd.f32 %v615_v59, %v4160_v35  ;;  %v653_v41 = vmul.f32 %v4168_v31, %v614_v32  ;;  %vm636_vm6 = vcmp.gt.f32.partialorder %v614_v32, 0.0  ;;  %v668_v59 = vsel %vm635_vm7, %v610_v38, %v652_v44 }
 0x382   :  { %v619_v4 = vpop.f32.mrf.mxu1 }
 0x383   :  { %v620_v29 = vadd.f32 %v619_v4, %v4163_v27  ;;  %v654_v33 = vmul.f32 %v4168_v31, %v616_v30  ;;  %vm637_vm5 = vcmp.gt.f32.partialorder %v616_v30, 0.0  ;;  %v649_v4 = vmul.f32 %v4168_v31, %v602_v56 }
 0x384   :  { %v621_v5 = vpop.f32.mrf.mxu1 }
 0x385   :  { %v622_v28 = vadd.f32 %v621_v5, %v4160_v35  ;;  %v655_v37 = vmul.f32 %v4168_v31, %v620_v29  ;;  %vm638_vm4 = vcmp.gt.f32.partialorder %v620_v29, 0.0  ;;  %v670_v45 = vsel %vm637_vm5, %v616_v30, %v654_v33 }
 0x386   :  { %v939_v6 = vpop.f32.mrf.mxu1  ;;  %v648_v5 = vmul.f32 %v4168_v31, %v598_v55 }
 0x387   :  { %v656_v36 = vmul.f32 %v4168_v31, %v622_v28  ;;  %vm639_vm3 = vcmp.gt.f32.partialorder %v622_v28, 0.0  ;;  %v671_v42 = vsel %vm638_vm4, %v620_v29, %v655_v37 }
 0x388   :  { %v941_v7 = vpop.f32.mrf.mxu1 }
 0x389   :  { %v672_v39 = vsel %vm639_vm3, %v622_v28, %v656_v36  ;;  %vm624_vm3 = vcmp.gt.f32.partialorder %v578_v48, 0.0 }
 0x38a   :  { %v945_v8 = vpop.f32.mrf.mxu1 }
 0x38c   :  { %v947_v9 = vpop.f32.mrf.mxu1 }
 0x38e   :  { %v951_v11 = vpop.f32.mrf.mxu1 }
 0x390   :  { %v953_v12 = vpop.f32.mrf.mxu1 }
 0x392   :  { %v957_v13 = vpop.f32.mrf.mxu1 }
 0x394   :  { %v959_v14 = vpop.f32.mrf.mxu1 }
 0x396   :  { %v963_v15 = vpop.f32.mrf.mxu1 }
 0x398   :  { %v965_v16 = vpop.f32.mrf.mxu1 }
 0x39a   :  { %v969_v17 = vpop.f32.mrf.mxu1 }
 0x39c   :  { %v971_v18 = vpop.f32.mrf.mxu1 }
 0x39e   :  { %v975_v19 = vpop.f32.mrf.mxu1 }
 0x3a0   :  { %v977_v21 = vpop.f32.mrf.mxu1 }
 0x3a2   :  { %v981_v22 = vpop.f32.mrf.mxu1 }
 0x3a4   :  { %v983_v24 = vpop.f32.mrf.mxu1 }
 0x3a5   :  { %1014 = vmatprep.subr.mxu0 %v983_v24 }
 0x3a6   :  { %1015 = vmatpush1.msra.mxu0 %v981_v22 }
 0x3a7   :  { %1016 = vmatprep.subr.mxu0 %v977_v21  ;;  %v4265_v21 = vsub.s32 2, %v4148_v23 }
 0x3a8   :  { %1017 = vmatpush1.msra.mxu0 %v975_v19 }
 0x3a9   :  { %1018 = vmatprep.subr.mxu0 %v971_v18 }
 0x3aa   :  { %1019 = vmatpush1.msra.mxu0 %v969_v17  ;;  %v4251_v17 = vsel %vm624_vm3, %v578_v48, %v641_v46  ;;  %v2931_v46 = vld [vmem:[%s5759_s10 + $0xb8] sm:$0xff] }
 0x3ab   :  { %1020 = vmatprep.subr.mxu0 %v965_v16  ;;  %v1179_v18 = vrot.slane %v4251_v17, %v4154_v26  ;;  %v1227_v24 = vrot.slane %v4251_v17, %v4265_v21 }
 0x3ac   :  { %1021 = vmatpush1.msra.mxu0 %v963_v15 }
 0x3ad   :  { %1022 = vmatprep.subr.mxu0 %v959_v14  ;;  %vm1184_vm4 = vcmp.lt.f32.partialorder %v1179_v18, %v4251_v17  ;;  %vm1192_vm7 = vcmp.le.f32.partialorder %v1179_v18, %v4251_v17 }
 0x3ae   :  { %1023 = vmatpush1.msra.mxu0 %v957_v13  ;;  %v3346_v22 = vsel %vm1184_vm4, 1.0, %v3779_v34  ;;  %v3348_v30 = vsel %vm1192_vm7, 1.0, %v3779_v34 }
 0x3af   :  { %1024 = vmatprep.subr.mxu0 %v953_v12  ;;  %v644_v12 = vmul.f32 %v4168_v31, %v586_v51 }
 0x3b0   :  { %1025 = vmatpush1.msra.mxu0 %v951_v11 }
 0x3b1   :  { %1026 = vmatprep.subr.mxu0 %v947_v9  ;;  %v4209_v9 = vsel %vm631_vm11, %v598_v55, %v648_v5  ;;  %v4236_v15 = vsel %vm627_vm15, %v586_v51, %v644_v12  ;;  %vm1232_vm11 = vcmp.lt.f32.partialorder %v1227_v24, %v4251_v17  ;;  %v2937_v55 = vld [vmem:[%s5759_s10 + $0xe8] sm:$0xff]  ;;  %v2935_v5 = vld [vmem:[%s5759_s10 + $0xd8] sm:$0xff]  ;;  %v2932_v12 = vld [vmem:[%s5759_s10 + $0xc0] sm:$0xff] }
 0x3b2   :  { %1027 = vmatpush1.msra.mxu0 %v945_v8  ;;  %v646_v8 = vmul.f32 %v4168_v31, %v592_v53 }
 0x3b3   :  { %1028 = vmatprep.subr.mxu0 %v941_v7  ;;  %v647_v7 = vmul.f32 %v4168_v31, %v596_v54 }
 0x3b4   :  { %1029 = vmatpush1.msra.mxu0 %v939_v6  ;;  %v666_v6 = vsel %vm633_vm9, %v604_v43, %v650_v58  ;;  %v4223_v13 = vsel %vm629_vm13, %v592_v53, %v646_v8  ;;  %vm1240_vm13 = vcmp.le.f32.partialorder %v1227_v24, %v4251_v17  ;;  %v4325_v53 = vsub.s32 5, %v4148_v23 }
 0x3b5   :  { %3338 = vmatmul.mubr.msk.f32.vlgmr.msra.gmra.mxu0 %vm223_vm1, %v4007_v60  ;;  %3059 = vmatprep.subr.mxu0 %v672_v39  ;;  %v669_v60 = vsel %vm636_vm6, %v614_v32, %v653_v41  ;;  %v4216_v11 = vsel %vm630_vm12, %v596_v54, %v647_v7  ;;  %v4298_v39 = vsub.s32 4, %v4148_v23  ;;  %v2936_v54 = vld [vmem:[%s5759_s10 + $0xe0] sm:$0xff]  ;;  %v4344_v8 = vsub.s32 6, %v4148_v23 }
 0x3b6   :  { %3060 = vmatpush1.xpose.msra.mxu0 %v671_v42  ;;  %1068 = vmatprep.mubr.f32.mxu0 %v3779_v34  ;;  %v3354_v42 = vsel %vm1232_vm11, 1.0, %v3779_v34 }
 0x3b7   :  { %3061 = vmatprep.subr.mxu0 %v670_v45  ;;  %v1275_v58 = vrot.slane %v4251_v17, %v4298_v39  ;;  %v1323_v24 = vrot.slane %v4251_v17, %v4344_v8 }
 0x3b9   :  { %3339 = vmatmul.mubr.msk.f32.gmra.mxu0 %vm223_vm1, %v4015_v61  ;;  %v667_v61 = vsel %vm634_vm8, %v608_v40, %v651_v57  ;;  %v2939_v57 = vld [vmem:[%s5759_s10 + $0xf8] sm:$0xff]  ;;  %vm1280_vm4 = vcmp.lt.f32.partialorder %v1275_v58, %v4251_v17  ;;  %vm1328_vm11 = vcmp.lt.f32.partialorder %v1323_v24, %v4251_v17 }
 0x3ba   :  { %3062 = vmatpush1.xpose.msra.mxu0 %v669_v60  ;;  %1074 = vmatprep.mubr.f32.mxu0 %v3779_v34  ;;  %v2938_v60 = vld [vmem:[%s5759_s10 + $0xf0] sm:$0xff] }
 0x3bb   :  { %3063 = vmatprep.subr.mxu0 %v668_v59  ;;  %2972 = vmatprep.subr.mxu1 %v2939_v57 }
 0x3bc   :  { %2973 = vmatpush1.msra.mxu1 %v2938_v60 }
 0x3bd   :  { %3340 = vmatmul.mubr.msk.f32.gmra.mxu0 %vm223_vm1, %v4020_v62  ;;  %v665_v62 = vsel %vm632_vm10, %v602_v56, %v649_v4  ;;  %v3356_v56 = vsel %vm1240_vm13, 1.0, %v3779_v34  ;;  %2974 = vmatprep.subr.mxu1 %v2937_v55  ;;  %v2923_v55 = vld [vmem:[%s5759_s10 + $0x78] sm:$0xff] }
 0x3be   :  { %3064 = vmatpush1.xpose.msra.mxu0 %v667_v61  ;;  %1080 = vmatprep.mubr.f32.mxu0 %v3779_v34 }
 0x3bf   :  { %3065 = vmatprep.subr.mxu0 %v666_v6  ;;  %2975 = vmatpush1.msra.mxu1 %v2936_v54  ;;  %v3370_v54 = vsel %vm1328_vm11, 1.0, %v3779_v34 }
 0x3c0   :  { %2976 = vmatprep.subr.mxu1 %v2935_v5  ;;  %v2921_v5 = vld [vmem:[%s5759_s10 + $0x68] sm:$0xff] }
 0x3c1   :  { %3341 = vmatmul.mubr.msk.f32.gmra.mxu0 %vm223_vm1, %v4029_v63  ;;  %v645_v63 = vmul.f32 %v4168_v31, %v590_v52 }
 0x3c2   :  { %3066 = vmatpush1.xpose.msra.mxu0 %v665_v62  ;;  %1086 = vmatprep.mubr.f32.mxu0 %v3779_v34 }
 0x3c3   :  { %3067 = vmatprep.subr.mxu0 %v4209_v9  ;;  %v4231_v14 = vsel %vm628_vm14, %v590_v52, %v645_v63  ;;  %v2934_v52 = vld [vmem:[%s5759_s10 + $0xd0] sm:$0xff] }
 0x3c4   :  { %2977 = vmatpush1.msra.mxu1 %v2934_v52  ;;  %v1395_v52 = vrot.slane %v4236_v15, %v4154_v26 }
 0x3c5   :  { %3342 = vmatmul.mubr.msk.f32.gmra.mxu0 %vm223_vm1, %v4034_v0  ;;  %v643_v0 = vmul.f32 %v4168_v31, %v584_v50 }
 0x3c6   :  { %3068 = vmatpush1.xpose.msra.mxu0 %v4216_v11  ;;  %1092 = vmatprep.mubr.f32.mxu0 %v3779_v34 }
 0x3c7   :  { %3069 = vmatprep.subr.mxu0 %v4223_v13  ;;  %v4242_v16 = vsel %vm626_vm0, %v584_v50, %v643_v0  ;;  %v2933_v50 = vld [vmem:[%s5759_s10 + $0xc8] sm:$0xff] }
 0x3c8   :  { %2978 = vmatprep.subr.mxu1 %v2933_v50 }
 0x3c9   :  { %3343 = vmatmul.mubr.msk.f32.gmra.mxu0 %vm223_vm1, %v4043_v1  ;;  %v4246_v1 = vsel %vm625_vm2, %v580_v49, %v642_v47  ;;  %v1299_v47 = vrot.slane %v4251_v17, %v4325_v53  ;;  %2979 = vmatpush1.msra.mxu1 %v2932_v12 }
 0x3ca   :  { %3070 = vmatpush1.xpose.msra.mxu0 %v4231_v14  ;;  %1098 = vmatprep.mubr.f32.mxu0 %v3779_v34  ;;  %v1183_v19 = vrot.slane %v4246_v1, %v4154_v26  ;;  %v1207_v20 = vrot.slane %v4246_v1, %v4151_v25  ;;  %v1231_v35 = vrot.slane %v4246_v1, %v4265_v21 }
 0x3cb   :  { %3071 = vmatprep.subr.mxu0 %v4236_v15  ;;  %v1279_v59 = vrot.slane %v4246_v1, %v4298_v39  ;;  %2980 = vmatprep.subr.mxu1 %v2931_v46  ;;  %vm1304_vm7 = vcmp.lt.f32.partialorder %v1299_v47, %v4251_v17 }
 0x3cc   :  { %vm1185_vm5 = vcmp.lt.f32.partialorder %v1183_v19, %v4246_v1  ;;  %vm1209_vm6 = vcmp.lt.f32.partialorder %v1207_v20, %v4246_v1  ;;  %vm1193_vm8 = vcmp.le.f32.partialorder %v1183_v19, %v4246_v1  ;;  %vm1217_vm10 = vcmp.le.f32.partialorder %v1207_v20, %v4246_v1  ;;  %v2930_v19 = vld [vmem:[%s5759_s10 + $0xb0] sm:$0xff] }
 0x3cd   :  { %3344 = vmatmul.mubr.msk.f32.gmra.mxu0 %vm223_vm1, %v4048_v2  ;;  %v1203_v2 = vrot.slane %v4251_v17, %v4151_v25  ;;  %v3347_v27 = vsel %vm1185_vm5, 1.0, %v3779_v34  ;;  %v3351_v28 = vsel %vm1209_vm6, 1.0, %v3779_v34  ;;  %v3349_v31 = vsel %vm1193_vm8, 1.0, %v3779_v34  ;;  %2981 = vmatpush1.msra.mxu1 %v2930_v19  ;;  %v2917_v19 = vld [vmem:[%s5759_s10 + $0x48] sm:$0xff] }
 0x3ce   :  { %3072 = vmatpush1.xpose.msra.mxu0 %v4242_v16  ;;  %1104 = vmatprep.mubr.f32.mxu0 %v3779_v34  ;;  %v1215_v37 = vadd.f32 %v3351_v28, %v3347_v27  ;;  %v3353_v38 = vsel %vm1217_vm10, 1.0, %v3779_v34  ;;  %vm1233_vm12 = vcmp.lt.f32.partialorder %v1231_v35, %v4246_v1  ;;  %vm1241_vm14 = vcmp.le.f32.partialorder %v1231_v35, %v4246_v1  ;;  %v2929_v35 = vld [vmem:[%s5759_s10 + $0xa8] sm:$0xff] }
 0x3cf   :  { %3073 = vmatprep.subr.mxu0 %v4246_v1  ;;  %vm1216_vm9 = vcmp.le.f32.partialorder %v1203_v2, %v4251_v17  ;;  %v1223_v41 = vadd.f32 %v3353_v38, %v3349_v31  ;;  %v3355_v43 = vsel %vm1233_vm12, 1.0, %v3779_v34  ;;  %v3357_v4 = vsel %vm1241_vm14, 1.0, %v3779_v34  ;;  %2982 = vmatprep.subr.mxu1 %v2929_v35  ;;  %v2926_v38 = vld [vmem:[%s5759_s10 + $0x90] sm:$0xff]  ;;  %v2915_v35 = vld [vmem:[%s5759_s10 + $0x38] sm:$0xff] }
 0x3d0   :  { %v3352_v32 = vsel %vm1216_vm9, 1.0, %v3779_v34  ;;  %v1239_v45 = vadd.f32 %v3355_v43, %v1215_v37  ;;  %vm1288_vm5 = vcmp.le.f32.partialorder %v1275_v58, %v4251_v17  ;;  %vm1289_vm6 = vcmp.le.f32.partialorder %v1279_v59, %v4246_v1 }
 0x3d1   :  { %3345 = vmatmul.mubr.msk.f32.gmra.mxu0 %vm223_vm1, %v4057_v3  ;;  %vm1208_vm1 = vcmp.lt.f32.partialorder %v1203_v2, %v4251_v17  ;;  %v4272_v3 = vsub.s32 3, %v4148_v23  ;;  %v1222_v40 = vadd.f32 %v3352_v32, %v3348_v30  ;;  %v1247_v6 = vadd.f32 %v3357_v4, %v1223_v41  ;;  %v2928_v30 = vld [vmem:[%s5759_s10 + $0xa0] sm:$0xff]  ;;  %v2925_v41 = vld [vmem:[%s5759_s10 + $0x88] sm:$0xff] }
 0x3d2   :  { %3074 = vmatpush1.xpose.msra.mxu0 %v4251_v17  ;;  %v3350_v10 = vsel %vm1208_vm1, 1.0, %v3779_v34  ;;  %vm1281_vm1 = vcmp.lt.f32.partialorder %v1279_v59, %v4246_v1  ;;  %v1303_v2 = vrot.slane %v4246_v1, %v4325_v53  ;;  %v3362_v20 = vsel %vm1280_vm4, 1.0, %v3779_v34  ;;  %2983 = vmatpush1.msra.mxu1 %v2928_v30 }
 0x3d3   :  { %v1251_v29 = vrot.slane %v4251_v17, %v4272_v3  ;;  %v1214_v36 = vadd.f32 %v3350_v10, %v3346_v22  ;;  %v1255_v33 = vrot.slane %v4246_v1, %v4272_v3  ;;  %v1246_v61 = vadd.f32 %v3356_v56, %v1222_v40 }
 0x3d4   :  { %v3363_v22 = vsel %vm1281_vm1, 1.0, %v3779_v34  ;;  %v4372_v10 = vsub.s32 7, %v4148_v23  ;;  %v3365_v31 = vsel %vm1289_vm6, 1.0, %v3779_v34  ;;  %vm1312_vm8 = vcmp.le.f32.partialorder %v1299_v47, %v4251_v17 }
 0x3d5   :  { %v1238_v44 = vadd.f32 %v3354_v42, %v1214_v36  ;;  %vm1256_vm15 = vcmp.lt.f32.partialorder %v1251_v29, %v4251_v17  ;;  %vm1257_vm0 = vcmp.lt.f32.partialorder %v1255_v33, %v4246_v1  ;;  %vm1264_vm2 = vcmp.le.f32.partialorder %v1251_v29, %v4251_v17  ;;  %v2927_v36 = vld [vmem:[%s5759_s10 + $0x98] sm:$0xff] }
 0x3d6   :  { %vm1265_vm3 = vcmp.le.f32.partialorder %v1255_v33, %v4246_v1  ;;  %v3358_v7 = vsel %vm1256_vm15, 1.0, %v3779_v34  ;;  %v3359_v62 = vsel %vm1257_vm0, 1.0, %v3779_v34  ;;  %v3360_v51 = vsel %vm1264_vm2, 1.0, %v3779_v34  ;;  %2984 = vmatprep.subr.mxu1 %v2927_v36 }
 0x3d7   :  { %v1262_v63 = vadd.f32 %v3358_v7, %v1238_v44  ;;  %v1263_v49 = vadd.f32 %v3359_v62, %v1239_v45  ;;  %v3361_v48 = vsel %vm1265_vm3, 1.0, %v3779_v34  ;;  %v1270_v0 = vadd.f32 %v3360_v51, %v1246_v61  ;;  %v2924_v44 = vld [vmem:[%s5759_s10 + $0x80] sm:$0xff]  ;;  %2985 = vmatpush1.msra.mxu1 %v2926_v38  ;;  %v2922_v61 = vld [vmem:[%s5759_s10 + $0x70] sm:$0xff] }
 0x3d8   :  { %v1271_v18 = vadd.f32 %v3361_v48, %v1247_v6  ;;  %v3364_v29 = vsel %vm1288_vm5, 1.0, %v3779_v34  ;;  %vm1305_vm9 = vcmp.lt.f32.partialorder %v1303_v2, %v4246_v1  ;;  %vm1313_vm10 = vcmp.le.f32.partialorder %v1303_v2, %v4246_v1  ;;  %2986 = vmatprep.subr.mxu1 %v2925_v41  ;;  %v2920_v51 = vld [vmem:[%s5759_s10 + $0x60] sm:$0xff] }
 0x3d9   :  { %v1286_v27 = vadd.f32 %v3362_v20, %v1262_v63  ;;  %v1287_v28 = vadd.f32 %v3363_v22, %v1263_v49  ;;  %v1294_v23 = vadd.f32 %v3364_v29, %v1270_v0  ;;  %v1327_v37 = vrot.slane %v4246_v1, %v4344_v8  ;;  %2987 = vmatpush1.msra.mxu1 %v2924_v44  ;;  %v2919_v49 = vld [vmem:[%s5759_s10 + $0x58] sm:$0xff]  ;;  %v2918_v0 = vld [vmem:[%s5759_s10 + $0x50] sm:$0xff]  ;;  %v2916_v20 = vld [vmem:[%s5759_s10 + $0x40] sm:$0xff] }
 0x3da   :  { %v1295_v32 = vadd.f32 %v3365_v31, %v1271_v18  ;;  %vm1336_vm12 = vcmp.le.f32.partialorder %v1323_v24, %v4251_v17  ;;  %v1347_v33 = vrot.slane %v4251_v17, %v4372_v10  ;;  %v1351_v40 = vrot.slane %v4246_v1, %v4372_v10  ;;  %2988 = vmatprep.subr.mxu1 %v2923_v55  ;;  %v2914_v29 = vld [vmem:[%s5759_s10 + $0x30] sm:$0xff]  ;;  %v2912_v41 = vld [vmem:[%s5759_s10 + $0x20] sm:$0xff] }
 0x3db   :  { %v3366_v42 = vsel %vm1304_vm7, 1.0, %v3779_v34  ;;  %v3368_v43 = vsel %vm1312_vm8, 1.0, %v3779_v34  ;;  %v3367_v45 = vsel %vm1305_vm9, 1.0, %v3779_v34  ;;  %v3369_v57 = vsel %vm1313_vm10, 1.0, %v3779_v34  ;;  %2989 = vmatpush1.msra.mxu1 %v2922_v61  ;;  %v2910_v55 = vld [vmem:[%s5759_s10 + $0x10] sm:$0xff] }
 0x3dc   :  { %v1310_v56 = vadd.f32 %v3366_v42, %v1286_v27  ;;  %v1318_v60 = vadd.f32 %v3368_v43, %v1294_v23  ;;  %v1311_v58 = vadd.f32 %v3367_v45, %v1287_v28  ;;  %v1319_v59 = vadd.f32 %v3369_v57, %v1295_v32  ;;  %2990 = vmatprep.subr.mxu1 %v2921_v5  ;;  %v2913_v32 = vld [vmem:[%s5759_s10 + $0x28] sm:$0xff]  ;;  %v2908_v5 = vld [vmem:[%s5759_s10] sm:$0xff] }
 0x3dd   :  { %v3372_v4 = vsel %vm1336_vm12, 1.0, %v3779_v34  ;;  %vm1329_vm13 = vcmp.lt.f32.partialorder %v1327_v37, %v4246_v1  ;;  %vm1337_vm14 = vcmp.le.f32.partialorder %v1327_v37, %v4246_v1  ;;  %vm1352_vm15 = vcmp.lt.f32.partialorder %v1347_v33, %v4251_v17  ;;  %2991 = vmatpush1.msra.mxu1 %v2920_v51 }
 0x3de   :  { %vm1353_vm0 = vcmp.lt.f32.partialorder %v1351_v40, %v4246_v1  ;;  %v1391_v6 = vrot.slane %v4242_v16, %v4154_v26  ;;  %v1415_v7 = vrot.slane %v4242_v16, %v4151_v25  ;;  %v1419_v62 = vrot.slane %v4236_v15, %v4151_v25  ;;  %2992 = vmatprep.subr.mxu1 %v2919_v49 }
 0x3df   :  { %v1334_v50 = vadd.f32 %v3370_v54, %v1310_v56  ;;  %v1342_v63 = vadd.f32 %v3372_v4, %v1318_v60  ;;  %v3371_v12 = vsel %vm1329_vm13, 1.0, %v3779_v34  ;;  %v3373_v48 = vsel %vm1337_vm14, 1.0, %v3779_v34  ;;  %2993 = vmatpush1.msra.mxu1 %v2918_v0  ;;  %v2911_v56 = vld [vmem:[%s5759_s10 + $0x18] sm:$0xff]  ;;  %v2909_v54 = vld [vmem:[%s5759_s10 + $0x8] sm:$0xff] }
 0x3e0   :  { %vm1360_vm2 = vcmp.le.f32.partialorder %v1347_v33, %v4251_v17  ;;  %vm1361_vm3 = vcmp.le.f32.partialorder %v1351_v40, %v4246_v1  ;;  %v1335_v47 = vadd.f32 %v3371_v12, %v1311_v58  ;;  %v1343_v46 = vadd.f32 %v3373_v48, %v1319_v59  ;;  %2994 = vmatprep.subr.mxu1 %v2917_v19  ;;  %v2969_v12 = vld [vmem:[%s5759_s10 + $0x1e8] sm:$0xff]  ;;  %v2967_v19 = vld [vmem:[%s5759_s10 + $0x1d8] sm:$0xff] }
 0x3e1   :  { %v3374_v18 = vsel %vm1352_vm15, 1.0, %v3779_v34  ;;  %v3375_v2 = vsel %vm1353_vm0, 1.0, %v3779_v34  ;;  %vm1396_vm4 = vcmp.lt.f32.partialorder %v1391_v6, %v4242_v16  ;;  %vm1397_vm1 = vcmp.lt.f32.partialorder %v1395_v52, %v4236_v15  ;;  %2995 = vmatpush1.msra.mxu1 %v2916_v20 }
 0x3e2   :  { %vm1420_vm5 = vcmp.lt.f32.partialorder %v1415_v7, %v4242_v16  ;;  %vm1421_vm6 = vcmp.lt.f32.partialorder %v1419_v62, %v4236_v15  ;;  %v3376_v22 = vsel %vm1360_vm2, 1.0, %v3779_v34  ;;  %v3377_v24 = vsel %vm1361_vm3, 1.0, %v3779_v34  ;;  %2996 = vmatprep.subr.mxu1 %v2915_v35  ;;  %v2966_v35 = vld [vmem:[%s5759_s10 + $0x1d0] sm:$0xff] }
 0x3e3   :  { %vm1404_vm7 = vcmp.le.f32.partialorder %v1391_v6, %v4242_v16  ;;  %vm1405_vm8 = vcmp.le.f32.partialorder %v1395_v52, %v4236_v15  ;;  %vm1428_vm9 = vcmp.le.f32.partialorder %v1415_v7, %v4242_v16  ;;  %vm1429_vm10 = vcmp.le.f32.partialorder %v1419_v62, %v4236_v15  ;;  %2997 = vmatpush1.msra.mxu1 %v2914_v29  ;;  %v2971_v7 = vld [vmem:[%s5759_s10 + $0x1f8] sm:$0xff]  ;;  %v2965_v29 = vld [vmem:[%s5759_s10 + $0x1c8] sm:$0xff] }
 0x3e4   :  { %v1439_v27 = vrot.slane %v4242_v16, %v4265_v21  ;;  %v1443_v28 = vrot.slane %v4236_v15, %v4265_v21  ;;  %v3378_v30 = vsel %vm1396_vm4, 1.0, %v3779_v34  ;;  %v3379_v31 = vsel %vm1397_vm1, 1.0, %v3779_v34  ;;  %2998 = vmatprep.subr.mxu1 %v2913_v32  ;;  %v2964_v32 = vld [vmem:[%s5759_s10 + $0x1c0] sm:$0xff] }
 0x3e5   :  { %v3382_v23 = vsel %vm1420_vm5, 1.0, %v3779_v34  ;;  %v3383_v36 = vsel %vm1421_vm6, 1.0, %v3779_v34  ;;  %v1358_v37 = vadd.f32 %v3374_v18, %v1334_v50  ;;  %v1359_v38 = vadd.f32 %v3375_v2, %v1335_v47  ;;  %2999 = vmatpush1.msra.mxu1 %v2912_v41  ;;  %v2970_v50 = vld [vmem:[%s5759_s10 + $0x1f0] sm:$0xff]  ;;  %v2968_v47 = vld [vmem:[%s5759_s10 + $0x1e0] sm:$0xff] }
 0x3e6   :  { %v1366_v33 = vadd.f32 %v3376_v22, %v1342_v63  ;;  %v1367_v40 = vadd.f32 %v3377_v24, %v1343_v46  ;;  %v3380_v42 = vsel %vm1404_vm7, 1.0, %v3779_v34  ;;  %v3381_v43 = vsel %vm1405_vm8, 1.0, %v3779_v34  ;;  %3000 = vmatprep.subr.mxu1 %v2911_v56  ;;  %v4623_v41 = vld [vmem:[%s5758_s9] sm:$0x3] }
 0x3e7   :  { %v3384_v44 = vsel %vm1428_vm9, 1.0, %v3779_v34  ;;  %v3385_v45 = vsel %vm1429_vm10, 1.0, %v3779_v34  ;;  %v1426_v57 = vadd.f32 %v3382_v23, %v3378_v30  ;;  %v1427_v60 = vadd.f32 %v3383_v36, %v3379_v31  ;;  %3001 = vmatpush1.msra.mxu1 %v2910_v55  ;;  %v2956_v46 = vld [vmem:[%s5759_s10 + $0x180] sm:$0xff] }
 0x3e8   :  { %vm1444_vm11 = vcmp.lt.f32.partialorder %v1439_v27, %v4242_v16  ;;  %vm1445_vm12 = vcmp.lt.f32.partialorder %v1443_v28, %v4236_v15  ;;  %v1463_v58 = vrot.slane %v4242_v16, %v4272_v3  ;;  %v1467_v59 = vrot.slane %v4236_v15, %v4272_v3  ;;  %3002 = vmatprep.subr.mxu1 %v2909_v54  ;;  %v2960_v54 = vld [vmem:[%s5759_s10 + $0x1a0] sm:$0xff] }
 0x3e9   :  { %vm1368_vm13 = vcmp.le.f32.partialorder %v1358_v37, 3.0  ;;  %vm1369_vm14 = vcmp.le.f32.partialorder %v1359_v38, 3.0  ;;  %v1434_v4 = vadd.f32 %v3384_v44, %v3380_v42  ;;  %v1435_v61 = vadd.f32 %v3385_v45, %v3381_v43  ;;  %3003 = vmatpush1.msra.mxu1 %v2908_v5  ;;  %v2963_v42 = vld [vmem:[%s5759_s10 + $0x1b8] sm:$0xff]  ;;  %v2962_v45 = vld [vmem:[%s5759_s10 + $0x1b0] sm:$0xff] }
 0x3ea   :  { %v3386_v6 = vsel %vm1444_vm11, 1.0, %v3779_v34  ;;  %v3387_v52 = vsel %vm1445_vm12, 1.0, %v3779_v34  ;;  %vm1452_vm15 = vcmp.le.f32.partialorder %v1439_v27, %v4242_v16  ;;  %vm1453_vm0 = vcmp.le.f32.partialorder %v1443_v28, %v4236_v15  ;;  %3004 = vmatprep.subr.mxu1 %v2971_v7  ;;  %v2959_v5 = vld [vmem:[%s5759_s10 + $0x198] sm:$0xff] }
 0x3eb   :  { %vm1370_vm2 = vcmp.gt.f32.partialorder %v1366_v33, 3.0  ;;  %vm1371_vm3 = vcmp.gt.f32.partialorder %v1367_v40, 3.0  ;;  %v1450_v62 = vadd.f32 %v3386_v6, %v1426_v57  ;;  %v1451_v51 = vadd.f32 %v3387_v52, %v1427_v60  ;;  %3005 = vmatpush2.msra.mxu1 %v2970_v50 }
 0x3ec   :  { %vm1468_vm4 = vcmp.lt.f32.partialorder %v1463_v58, %v4242_v16  ;;  %vm1469_vm1 = vcmp.lt.f32.partialorder %v1467_v59, %v4236_v15  ;;  %v1487_v63 = vrot.slane %v4242_v16, %v4298_v39  ;;  %v1491_v49 = vrot.slane %v4236_v15, %v4298_v39  ;;  %vm4576_vm5 = vmand %vm1368_vm13, %vm1370_vm2  ;;  %3006 = vmatprep.subr.mxu1 %v2969_v12 }
 0x3ed   :  { %v3388_v48 = vsel %vm1452_vm15, 1.0, %v3779_v34  ;;  %v3389_v0 = vsel %vm1453_vm0, 1.0, %v3779_v34  ;;  %vm1476_vm6 = vcmp.le.f32.partialorder %v1463_v58, %v4242_v16  ;;  %vm1477_vm7 = vcmp.le.f32.partialorder %v1467_v59, %v4236_v15  ;;  %vm4587_vm8 = vmand %vm1369_vm14, %vm1371_vm3  ;;  %3007 = vmatpush2.msra.mxu1 %v2968_v47  ;;  %v2961_v58 = vld [vmem:[%s5759_s10 + $0x1a8] sm:$0xff] }
 0x3ee   :  { %v1458_v18 = vadd.f32 %v3388_v48, %v1434_v4  ;;  %v1459_v2 = vadd.f32 %v3389_v0, %v1435_v61  ;;  %v3390_v22 = vsel %vm1468_vm4, 1.0, %v3779_v34  ;;  %v3391_v24 = vsel %vm1469_vm1, 1.0, %v3779_v34  ;;  %3008 = vmatprep.subr.mxu1 %v2967_v19  ;;  %v2957_v48 = vld [vmem:[%s5759_s10 + $0x188] sm:$0xff]  ;;  %v2955_v19 = vld [vmem:[%s5759_s10 + $0x178] sm:$0xff] }
 0x3ef   :  { %v1474_v27 = vadd.f32 %v3390_v22, %v1450_v62  ;;  %v1475_v28 = vadd.f32 %v3391_v24, %v1451_v51  ;;  %vm1492_vm9 = vcmp.lt.f32.partialorder %v1487_v63, %v4242_v16  ;;  %vm1493_vm10 = vcmp.lt.f32.partialorder %v1491_v49, %v4236_v15  ;;  %3009 = vmatpush2.msra.mxu1 %v2966_v35  ;;  %v2958_v51 = vld [vmem:[%s5759_s10 + $0x190] sm:$0xff] }
 0x3f0   :  { %v3392_v30 = vsel %vm1476_vm6, 1.0, %v3779_v34  ;;  %v3393_v31 = vsel %vm1477_vm7, 1.0, %v3779_v34  ;;  %v1511_v23 = vrot.slane %v4242_v16, %v4325_v53  ;;  %v1515_v36 = vrot.slane %v4236_v15, %v4325_v53  ;;  %3010 = vmatprep.subr.mxu1 %v2965_v29 }
 0x3f1   :  { %v1374_v37 = vsel %vm4576_vm5, %v4251_v17, -inf  ;;  %v1375_v38 = vsel %vm4587_vm8, %v4246_v1, -inf  ;;  %v1482_v33 = vadd.f32 %v3392_v30, %v1458_v18  ;;  %v1483_v40 = vadd.f32 %v3393_v31, %v1459_v2  ;;  %3011 = vmatpush2.msra.mxu1 %v2964_v32 }
 0x3f2   :  { %v3394_v43 = vsel %vm1492_vm9, 1.0, %v3779_v34  ;;  %v3395_v44 = vsel %vm1493_vm10, 1.0, %v3779_v34  ;;  %vm1500_vm11 = vcmp.le.f32.partialorder %v1487_v63, %v4242_v16  ;;  %vm1501_vm12 = vcmp.le.f32.partialorder %v1491_v49, %v4236_v15  ;;  %3012 = vmatprep.subr.mxu1 %v2963_v42 }
 0x3f3   :  { %v1498_v56 = vadd.f32 %v3394_v43, %v1474_v27  ;;  %v1499_v57 = vadd.f32 %v3395_v44, %v1475_v28  ;;  %v1535_v60 = vrot.slane %v4242_v16, %v4344_v8  ;;  %v1539_v55 = vrot.slane %v4236_v15, %v4344_v8  ;;  %3013 = vmatpush2.msra.mxu1 %v2962_v45  ;;  %v2954_v27 = vld [vmem:[%s5759_s10 + $0x170] sm:$0xff]  ;;  %v2951_v43 = vld [vmem:[%s5759_s10 + $0x158] sm:$0xff] }
 0x3f4   :  { %vm1516_vm13 = vcmp.lt.f32.partialorder %v1511_v23, %v4242_v16  ;;  %vm1517_vm14 = vcmp.lt.f32.partialorder %v1515_v36, %v4236_v15  ;;  %vm1524_vm15 = vcmp.le.f32.partialorder %v1511_v23, %v4242_v16  ;;  %vm1525_vm0 = vcmp.le.f32.partialorder %v1515_v36, %v4236_v15  ;;  %3014 = vmatprep.subr.mxu1 %v2961_v58  ;;  %v2953_v23 = vld [vmem:[%s5759_s10 + $0x168] sm:$0xff] }
 0x3f5   :  { %v4652_v59 = vrot.slane %v4623_v41, %v4154_v26  ;;  %v3396_v4 = vsel %vm1500_vm11, 1.0, %v3779_v34  ;;  %v3397_v61 = vsel %vm1501_vm12, 1.0, %v3779_v34  ;;  %v1376_v6 = vrot.slane %v1374_v37, 4  ;;  %3015 = vmatpush2.msra.mxu1 %v2960_v54 }
 0x3f6   :  { %v1382_v52 = vrot.slane %v1375_v38, 4  ;;  %v1506_v7 = vadd.f32 %v3396_v4, %v1482_v33  ;;  %v1507_v62 = vadd.f32 %v3397_v61, %v1483_v40  ;;  %v3398_v50 = vsel %vm1516_vm13, 1.0, %v3779_v34  ;;  %3016 = vmatprep.subr.mxu1 %v2959_v5  ;;  %v2952_v33 = vld [vmem:[%s5759_s10 + $0x160] sm:$0xff] }
 0x3f7   :  { %v3399_v63 = vsel %vm1517_vm14, 1.0, %v3779_v34  ;;  %v3400_v49 = vsel %vm1524_vm15, 1.0, %v3779_v34  ;;  %v3401_v12 = vsel %vm1525_vm0, 1.0, %v3779_v34  ;;  %v1522_v0 = vadd.f32 %v3398_v50, %v1498_v56  ;;  %3017 = vmatpush2.msra.mxu1 %v2958_v51  ;;  %v2950_v56 = vld [vmem:[%s5759_s10 + $0x150] sm:$0xff]  ;;  %v2948_v4 = vld [vmem:[%s5759_s10 + $0x140] sm:$0xff] }
 0x3f8   :  { %v1523_v47 = vadd.f32 %v3399_v63, %v1499_v57  ;;  %vm1540_vm2 = vcmp.lt.f32.partialorder %v1535_v60, %v4242_v16  ;;  %vm1541_vm3 = vcmp.lt.f32.partialorder %v1539_v55, %v4236_v15  ;;  %vm1548_vm4 = vcmp.le.f32.partialorder %v1535_v60, %v4242_v16  ;;  %3018 = vmatprep.subr.mxu1 %v2957_v48  ;;  %v2949_v60 = vld [vmem:[%s5759_s10 + $0x148] sm:$0xff]  ;;  %v2946_v51 = vld [vmem:[%s5759_s10 + $0x130] sm:$0xff] }
 0x3f9   :  { %vm1549_vm1 = vcmp.le.f32.partialorder %v1539_v55, %v4236_v15  ;;  %v1603_v18 = vrot.slane %v4231_v14, %v4154_v26  ;;  %v1627_v2 = vrot.slane %v4231_v14, %v4151_v25  ;;  %v1530_v20 = vadd.f32 %v3400_v49, %v1506_v7  ;;  %3019 = vmatpush2.msra.mxu1 %v2956_v46 }
 0x3fa   :  { %v1531_v22 = vadd.f32 %v3401_v12, %v1507_v62  ;;  %v1607_v24 = vrot.slane %v4223_v13, %v4154_v26  ;;  %v1631_v35 = vrot.slane %v4223_v13, %v4151_v25  ;;  %v4705_v28 = vmax.f32 %v1374_v37, %v1376_v6  ;;  %3020 = vmatprep.subr.mxu1 %v2955_v19  ;;  %v2947_v6 = vld [vmem:[%s5759_s10 + $0x138] sm:$0xff]  ;;  %v2945_v12 = vld [vmem:[%s5759_s10 + $0x128] sm:$0xff] }
 0x3fb   :  { %v4707_v29 = vmax.f32 %v1375_v38, %v1382_v52  ;;  %v3402_v30 = vsel %vm1540_vm2, 1.0, %v3779_v34  ;;  %v3403_v31 = vsel %vm1541_vm3, 1.0, %v3779_v34  ;;  %v3404_v37 = vsel %vm1548_vm4, 1.0, %v3779_v34  ;;  %3021 = vmatpush2.msra.mxu1 %v2954_v27 }
 0x3fc   :  { %v4718_v36 = vadd.f32 %v3402_v30, %v1522_v0  ;;  %v4720_v32 = vadd.f32 %v3403_v31, %v1523_v47  ;;  %v3405_v38 = vsel %vm1549_vm1, 1.0, %v3779_v34  ;;  %v1559_v40 = vrot.slane %v4242_v16, %v4372_v10  ;;  %3022 = vmatprep.subr.mxu1 %v2953_v23  ;;  %v2944_v47 = vld [vmem:[%s5759_s10 + $0x120] sm:$0xff]  ;;  %v2941_v23 = vld [vmem:[%s5759_s10 + $0x108] sm:$0xff] }
 0x3fd   :  { %v4735_v42 = vrot.slane %v4236_v15, %v4372_v10  ;;  %vm1608_vm5 = vcmp.lt.f32.partialorder %v1603_v18, %v4231_v14  ;;  %vm1632_vm6 = vcmp.lt.f32.partialorder %v1627_v2, %v4231_v14  ;;  %v4742_v44 = vadd.f32 %v3404_v37, %v1530_v20  ;;  %3023 = vmatpush2.msra.mxu1 %v2952_v33  ;;  %v2943_v20 = vld [vmem:[%s5759_s10 + $0x118] sm:$0xff] }
 0x3fe   :  { %v4744_v45 = vadd.f32 %v3405_v38, %v1531_v22  ;;  %vm1609_vm7 = vcmp.lt.f32.partialorder %v1607_v24, %v4223_v13  ;;  %vm1633_vm8 = vcmp.lt.f32.partialorder %v1631_v35, %v4223_v13  ;;  %vm1616_vm9 = vcmp.le.f32.partialorder %v1603_v18, %v4231_v14  ;;  %3024 = vmatprep.subr.mxu1 %v2951_v43  ;;  %v2940_v43 = vld [vmem:[%s5759_s10 + $0x100] sm:$0xff] }
 0x3ff   :  { %vm1617_vm10 = vcmp.le.f32.partialorder %v1607_v24, %v4223_v13  ;;  %vm1640_vm11 = vcmp.le.f32.partialorder %v1627_v2, %v4231_v14  ;;  %v1651_v57 = vrot.slane %v4231_v14, %v4265_v21  ;;  %v3410_v55 = vsel %vm1608_vm5, 1.0, %v3779_v34  ;;  %3025 = vmatpush2.msra.mxu1 %v2950_v56 }
 0x400   :  { %v3414_v58 = vsel %vm1632_vm6, 1.0, %v3779_v34  ;;  %vm1641_vm12 = vcmp.le.f32.partialorder %v1631_v35, %v4223_v13  ;;  %v1655_v54 = vrot.slane %v4223_v13, %v4265_v21  ;;  %vm1564_vm13 = vcmp.lt.f32.partialorder %v1559_v40, %v4242_v16  ;;  %3026 = vmatprep.subr.mxu1 %v2949_v60  ;;  %v2942_v35 = vld [vmem:[%s5759_s10 + $0x110] sm:$0xff]  ;;  %s5038_s10 = sld [smem:[#allocation2 + $0x1]] }
 0x401   :  { %vm1565_vm14 = vcmp.lt.f32.partialorder %v4735_v42, %v4236_v15  ;;  %v3411_v61 = vsel %vm1609_vm7, 1.0, %v3779_v34  ;;  %v3415_v5 = vsel %vm1633_vm8, 1.0, %v3779_v34  ;;  %vm1572_vm15 = vcmp.le.f32.partialorder %v1559_v40, %v4242_v16  ;;  %3027 = vmatpush2.msra.mxu1 %v2948_v4 }
 0x402   :  { %v3412_v52 = vsel %vm1616_vm9, 1.0, %v3779_v34  ;;  %v3413_v7 = vsel %vm1617_vm10, 1.0, %v3779_v34  ;;  %v3416_v62 = vsel %vm1640_vm11, 1.0, %v3779_v34  ;;  %v1638_v50 = vadd.f32 %v3414_v58, %v3410_v55  ;;  %3028 = vmatprep.subr.mxu1 %v2947_v6 }
 0x403   :  { %v3417_v63 = vsel %vm1641_vm12, 1.0, %v3779_v34  ;;  %vm1656_vm0 = vcmp.lt.f32.partialorder %v1651_v57, %v4231_v14  ;;  %v1675_v49 = vrot.slane %v4231_v14, %v4272_v3  ;;  %v3406_v48 = vsel %vm1564_vm13, 1.0, %v3779_v34  ;;  %3029 = vmatpush2.msra.mxu1 %v2946_v51 }
 0x404   :  { %vm1573_vm2 = vcmp.le.f32.partialorder %v4735_v42, %v4236_v15  ;;  %v1639_v0 = vadd.f32 %v3415_v5, %v3411_v61  ;;  %vm1657_vm3 = vcmp.lt.f32.partialorder %v1655_v54, %v4223_v13  ;;  %v3407_v46 = vsel %vm1565_vm14, 1.0, %v3779_v34  ;;  %3030 = vmatprep.subr.mxu1 %v2945_v12 }
 0x405   :  { %v3408_v18 = vsel %vm1572_vm15, 1.0, %v3779_v34  ;;  %v1646_v2 = vadd.f32 %v3416_v62, %v3412_v52  ;;  %v1679_v19 = vrot.slane %v4223_v13, %v4272_v3  ;;  %v1647_v22 = vadd.f32 %v3417_v63, %v3413_v7  ;;  %3031 = vmatpush2.msra.mxu1 %v2944_v47 }
 0x406   :  { %v3418_v24 = vsel %vm1656_vm0, 1.0, %v3779_v34  ;;  %vm1664_vm4 = vcmp.le.f32.partialorder %v1651_v57, %v4231_v14  ;;  %vm1665_vm1 = vcmp.le.f32.partialorder %v1655_v54, %v4223_v13  ;;  %v3419_v27 = vsel %vm1657_vm3, 1.0, %v3779_v34  ;;  %3032 = vmatprep.subr.mxu1 %v2943_v20 }
 0x407   :  { %v1662_v30 = vadd.f32 %v3418_v24, %v1638_v50  ;;  %vm1680_vm5 = vcmp.lt.f32.partialorder %v1675_v49, %v4231_v14  ;;  %v1699_v31 = vrot.slane %v4231_v14, %v4298_v39  ;;  %v4842_v37 = vadd.f32 %v3406_v48, %v4718_v36  ;;  %3033 = vmatpush2.msra.mxu1 %v2942_v35 }
 0x408   :  { %v3409_v38 = vsel %vm1573_vm2, 1.0, %v3779_v34  ;;  %v1663_v33 = vadd.f32 %v3419_v27, %v1639_v0  ;;  %v1703_v40 = vrot.slane %v4223_v13, %v4298_v39  ;;  %v3420_v56 = vsel %vm1664_vm4, 1.0, %v3779_v34  ;;  %3034 = vmatprep.subr.mxu1 %v2941_v23 }
 0x409   :  { %v3421_v36 = vsel %vm1665_vm1, 1.0, %v3779_v34  ;;  %vm1681_vm6 = vcmp.lt.f32.partialorder %v1679_v19, %v4223_v13  ;;  %vm1688_vm7 = vcmp.le.f32.partialorder %v1675_v49, %v4231_v14  ;;  %v1670_v42 = vadd.f32 %v3420_v56, %v1646_v2  ;;  %3035 = vmatpush2.msra.mxu1 %v2940_v43 }
 0x40a   :  { %v1671_v60 = vadd.f32 %v3421_v36, %v1647_v22  ;;  %v3422_v55 = vsel %vm1680_vm5, 1.0, %v3779_v34  ;;  %vm1689_vm8 = vcmp.le.f32.partialorder %v1679_v19, %v4223_v13  ;;  %v4866_v57 = vadd.f32 %v3407_v46, %v4720_v32 }
 0x40b   :  { %v4869_v58 = vadd.f32 %v3408_v18, %v4742_v44  ;;  %v1686_v54 = vadd.f32 %v3422_v55, %v1662_v30  ;;  %vm1704_vm9 = vcmp.lt.f32.partialorder %v1699_v31, %v4231_v14  ;;  %v3423_v4 = vsel %vm1681_vm6, 1.0, %v3779_v34 }
 0x40c   :  { %v3424_v61 = vsel %vm1688_vm7, 1.0, %v3779_v34  ;;  %vm1705_vm10 = vcmp.lt.f32.partialorder %v1703_v40, %v4223_v13  ;;  %v1723_v5 = vrot.slane %v4231_v14, %v4325_v53  ;;  %v3425_v6 = vsel %vm1689_vm8, 1.0, %v3779_v34 }
 0x40d   :  { %vm1712_vm11 = vcmp.le.f32.partialorder %v1699_v31, %v4231_v14  ;;  %vm1713_vm12 = vcmp.le.f32.partialorder %v1703_v40, %v4223_v13  ;;  %v1727_v32 = vrot.slane %v4223_v13, %v4325_v53  ;;  %v1687_v44 = vadd.f32 %v3423_v4, %v1663_v33 }
 0x40e   :  { %v1694_v52 = vadd.f32 %v3424_v61, %v1670_v42  ;;  %v1695_v7 = vadd.f32 %v3425_v6, %v1671_v60  ;;  %v3426_v62 = vsel %vm1704_vm9, 1.0, %v3779_v34  ;;  %v4884_v51 = vadd.f32 %v3409_v38, %v4744_v45 }
 0x40f   :  { %v3427_v50 = vsel %vm1705_vm10, 1.0, %v3779_v34  ;;  %v1710_v63 = vadd.f32 %v3426_v62, %v1686_v54  ;;  %v1747_v49 = vrot.slane %v4231_v14, %v4344_v8  ;;  %v3428_v12 = vsel %vm1712_vm11, 1.0, %v3779_v34 }
 0x410   :  { %v3429_v48 = vsel %vm1713_vm12, 1.0, %v3779_v34  ;;  %vm1728_vm13 = vcmp.lt.f32.partialorder %v1723_v5, %v4231_v14  ;;  %vm1736_vm14 = vcmp.le.f32.partialorder %v1723_v5, %v4231_v14  ;;  %vm1729_vm15 = vcmp.lt.f32.partialorder %v1727_v32, %v4223_v13 }
 0x411   :  { %v1751_v45 = vrot.slane %v4223_v13, %v4344_v8  ;;  %v1815_v0 = vrot.slane %v4216_v11, %v4154_v26  ;;  %v1819_v47 = vrot.slane %v4209_v9, %v4154_v26  ;;  %v1711_v46 = vadd.f32 %v3427_v50, %v1687_v44 }
 0x412   :  { %v1718_v18 = vadd.f32 %v3428_v12, %v1694_v52  ;;  %v1719_v2 = vadd.f32 %v3429_v48, %v1695_v7  ;;  %vm1737_vm0 = vcmp.le.f32.partialorder %v1727_v32, %v4223_v13  ;;  %v3430_v19 = vsel %vm1728_vm13, 1.0, %v3779_v34 }
 0x413   :  { %vm1752_vm2 = vcmp.lt.f32.partialorder %v1747_v49, %v4231_v14  ;;  %v1839_v20 = vrot.slane %v4216_v11, %v4151_v25  ;;  %v1843_v22 = vrot.slane %v4209_v9, %v4151_v25  ;;  %v3431_v24 = vsel %vm1729_vm15, 1.0, %v3779_v34 }
 0x414   :  { %v1734_v35 = vadd.f32 %v3430_v19, %v1710_v63  ;;  %v3432_v27 = vsel %vm1736_vm14, 1.0, %v3779_v34  ;;  %v1771_v30 = vrot.slane %v4231_v14, %v4372_v10  ;;  %v3433_v31 = vsel %vm1737_vm0, 1.0, %v3779_v34 }
 0x415   :  { %vm1753_vm3 = vcmp.lt.f32.partialorder %v1751_v45, %v4223_v13  ;;  %vm1820_vm4 = vcmp.lt.f32.partialorder %v1815_v0, %v4216_v11  ;;  %vm1821_vm1 = vcmp.lt.f32.partialorder %v1819_v47, %v4209_v9  ;;  %v1735_v23 = vadd.f32 %v3431_v24, %v1711_v46 }
 0x416   :  { %v1742_v38 = vadd.f32 %v3432_v27, %v1718_v18  ;;  %v1743_v33 = vadd.f32 %v3433_v31, %v1719_v2  ;;  %v3434_v40 = vsel %vm1752_vm2, 1.0, %v3779_v34  ;;  %vm1760_vm5 = vcmp.le.f32.partialorder %v1747_v49, %v4231_v14 }
 0x417   :  { %vm1761_vm6 = vcmp.le.f32.partialorder %v1751_v45, %v4223_v13  ;;  %vm1844_vm7 = vcmp.lt.f32.partialorder %v1839_v20, %v4216_v11  ;;  %vm1845_vm8 = vcmp.lt.f32.partialorder %v1843_v22, %v4209_v9  ;;  %v3435_v43 = vsel %vm1753_vm3, 1.0, %v3779_v34 }
 0x418   :  { %v1758_v56 = vadd.f32 %v3434_v40, %v1734_v35  ;;  %v3442_v36 = vsel %vm1820_vm4, 1.0, %v3779_v34  ;;  %v3443_v42 = vsel %vm1821_vm1, 1.0, %v3779_v34  ;;  %vm1828_vm9 = vcmp.le.f32.partialorder %v1815_v0, %v4216_v11 }
 0x419   :  { %vm1829_vm10 = vcmp.le.f32.partialorder %v1819_v47, %v4209_v9  ;;  %vm1852_vm11 = vcmp.le.f32.partialorder %v1839_v20, %v4216_v11  ;;  %v1863_v60 = vrot.slane %v4216_v11, %v4265_v21  ;;  %v3446_v55 = vsel %vm1844_vm7, 1.0, %v3779_v34 }
 0x41a   :  { %v3447_v54 = vsel %vm1845_vm8, 1.0, %v3779_v34  ;;  %vm1853_vm12 = vcmp.le.f32.partialorder %v1843_v22, %v4209_v9  ;;  %v1867_v4 = vrot.slane %v4209_v9, %v4265_v21  ;;  %v1759_v61 = vadd.f32 %v3435_v43, %v1735_v23 }
 0x41b   :  { %v3436_v5 = vsel %vm1760_vm5, 1.0, %v3779_v34  ;;  %v3437_v6 = vsel %vm1761_vm6, 1.0, %v3779_v34  ;;  %v1775_v32 = vrot.slane %v4223_v13, %v4372_v10  ;;  %vm1776_vm13 = vcmp.lt.f32.partialorder %v1771_v30, %v4231_v14 }
 0x41c   :  { %vm1784_vm14 = vcmp.le.f32.partialorder %v1771_v30, %v4231_v14  ;;  %v3444_v44 = vsel %vm1828_vm9, 1.0, %v3779_v34  ;;  %v3445_v52 = vsel %vm1829_vm10, 1.0, %v3779_v34  ;;  %v1850_v7 = vadd.f32 %v3446_v55, %v3442_v36 }
 0x41d   :  { %v1851_v62 = vadd.f32 %v3447_v54, %v3443_v42  ;;  %v3448_v50 = vsel %vm1852_vm11, 1.0, %v3779_v34  ;;  %v3449_v63 = vsel %vm1853_vm12, 1.0, %v3779_v34  ;;  %vm1868_vm15 = vcmp.lt.f32.partialorder %v1863_v60, %v4216_v11 }
 0x41e   :  { %vm1869_vm0 = vcmp.lt.f32.partialorder %v1867_v4, %v4209_v9  ;;  %v1887_v49 = vrot.slane %v4216_v11, %v4272_v3  ;;  %v1891_v12 = vrot.slane %v4209_v9, %v4272_v3  ;;  %v1766_v48 = vadd.f32 %v3436_v5, %v1742_v38 }
 0x41f   :  { %v1767_v45 = vadd.f32 %v3437_v6, %v1743_v33  ;;  %vm1777_vm2 = vcmp.lt.f32.partialorder %v1775_v32, %v4223_v13  ;;  %v3438_v0 = vsel %vm1776_vm13, 1.0, %v3779_v34  ;;  %vm1785_vm3 = vcmp.le.f32.partialorder %v1775_v32, %v4223_v13 }
 0x420   :  { %v3440_v47 = vsel %vm1784_vm14, 1.0, %v3779_v34  ;;  %v1858_v46 = vadd.f32 %v3448_v50, %v3444_v44  ;;  %v1859_v18 = vadd.f32 %v3449_v63, %v3445_v52  ;;  %vm1580_vm4 = vcmp.le.f32.partialorder %v4842_v37, 3.0 }
 0x421   :  { %vm1582_vm1 = vcmp.gt.f32.partialorder %v4869_v58, 3.0  ;;  %v3450_v2 = vsel %vm1868_vm15, 1.0, %v3779_v34  ;;  %v3451_v19 = vsel %vm1869_vm0, 1.0, %v3779_v34  ;;  %vm1876_vm5 = vcmp.le.f32.partialorder %v1863_v60, %v4216_v11 }
 0x422   :  { %vm1877_vm6 = vcmp.le.f32.partialorder %v1867_v4, %v4209_v9  ;;  %v1874_v20 = vadd.f32 %v3450_v2, %v1850_v7  ;;  %v1875_v22 = vadd.f32 %v3451_v19, %v1851_v62  ;;  %vm1892_vm7 = vcmp.lt.f32.partialorder %v1887_v49, %v4216_v11 }
 0x423   :  { %vm1893_vm8 = vcmp.lt.f32.partialorder %v1891_v12, %v4209_v9  ;;  %vm1581_vm9 = vcmp.le.f32.partialorder %v4866_v57, 3.0  ;;  %vm1583_vm10 = vcmp.gt.f32.partialorder %v4884_v51, 3.0  ;;  %v3439_v24 = vsel %vm1777_vm2, 1.0, %v3779_v34 }
 0x424   :  { %v1782_v35 = vadd.f32 %v3438_v0, %v1758_v56  ;;  %v1911_v27 = vrot.slane %v4216_v11, %v4298_v39  ;;  %v1915_v30 = vrot.slane %v4209_v9, %v4298_v39  ;;  %v3441_v31 = vsel %vm1785_vm3, 1.0, %v3779_v34 }
 0x425   :  { %v1790_v23 = vadd.f32 %v3440_v47, %v1766_v48  ;;  %v3452_v38 = vsel %vm1876_vm5, 1.0, %v3779_v34  ;;  %v3453_v33 = vsel %vm1877_vm6, 1.0, %v3779_v34  ;;  %v3454_v43 = vsel %vm1892_vm7, 1.0, %v3779_v34  ;;  %vm1584_vm7 = vmand %vm1580_vm4, %vm1582_vm1 }
 0x426   :  { %v1882_v40 = vadd.f32 %v3452_v38, %v1858_v46  ;;  %v3455_v56 = vsel %vm1893_vm8, 1.0, %v3779_v34  ;;  %vm1900_vm11 = vcmp.le.f32.partialorder %v1887_v49, %v4216_v11  ;;  %v1883_v36 = vadd.f32 %v3453_v33, %v1859_v18  ;;  %vm5016_vm4 = vmand %vm1581_vm9, %vm1583_vm10 }
 0x427   :  { %v1898_v42 = vadd.f32 %v3454_v43, %v1874_v20  ;;  %v1899_v60 = vadd.f32 %v3455_v56, %v1875_v22  ;;  %vm1901_vm12 = vcmp.le.f32.partialorder %v1891_v12, %v4209_v9  ;;  %vm1916_vm13 = vcmp.lt.f32.partialorder %v1911_v27, %v4216_v11 }
 0x428   :  { %vm1917_vm14 = vcmp.lt.f32.partialorder %v1915_v30, %v4209_v9  ;;  %v1935_v55 = vrot.slane %v4216_v11, %v4325_v53  ;;  %v1939_v54 = vrot.slane %v4209_v9, %v4325_v53  ;;  %v1783_v4 = vadd.f32 %v3439_v24, %v1759_v61 }
 0x429   :  { %v1791_v5 = vadd.f32 %v3441_v31, %v1767_v45  ;;  %vm1792_vm15 = vcmp.le.f32.partialorder %v1782_v35, 3.0  ;;  %v3456_v6 = vsel %vm1900_vm11, 1.0, %v3779_v34  ;;  %vm1794_vm0 = vcmp.gt.f32.partialorder %v1790_v23, 3.0 }
 0x42a   :  { %v3457_v32 = vsel %vm1901_vm12, 1.0, %v3779_v34  ;;  %v1906_v44 = vadd.f32 %v3456_v6, %v1882_v40  ;;  %vm1924_vm2 = vcmp.le.f32.partialorder %v1911_v27, %v4216_v11  ;;  %v3458_v7 = vsel %vm1916_vm13, 1.0, %v3779_v34  ;;  %vm5026_vm13 = vmand %vm1792_vm15, %vm1794_vm0 }
 0x42b   :  { %v1907_v52 = vadd.f32 %v3457_v32, %v1883_v36  ;;  %v3459_v62 = vsel %vm1917_vm14, 1.0, %v3779_v34  ;;  %vm1925_vm3 = vcmp.le.f32.partialorder %v1915_v30, %v4209_v9  ;;  %v1922_v50 = vadd.f32 %v3458_v7, %v1898_v42 }
 0x42c   :  { %v1923_v63 = vadd.f32 %v3459_v62, %v1899_v60  ;;  %vm1940_vm5 = vcmp.lt.f32.partialorder %v1935_v55, %v4216_v11  ;;  %vm1941_vm6 = vcmp.lt.f32.partialorder %v1939_v54, %v4209_v9  ;;  %v3460_v61 = vsel %vm1924_vm2, 1.0, %v3779_v34 }
 0x42d   :  { %vm1948_vm8 = vcmp.le.f32.partialorder %v1935_v55, %v4216_v11  ;;  %v1959_v49 = vrot.slane %v4216_v11, %v4344_v8  ;;  %v1963_v12 = vrot.slane %v4209_v9, %v4344_v8  ;;  %vm1793_vm11 = vcmp.le.f32.partialorder %v1783_v4, 3.0 }
 0x42e   :  { %vm1795_vm12 = vcmp.gt.f32.partialorder %v1791_v5, 3.0  ;;  %v3461_v48 = vsel %vm1925_vm3, 1.0, %v3779_v34  ;;  %v1930_v45 = vadd.f32 %v3460_v61, %v1906_v44  ;;  %v3462_v0 = vsel %vm1940_vm5, 1.0, %v3779_v34 }
 0x42f   :  { %v1931_v58 = vadd.f32 %v3461_v48, %v1907_v52  ;;  %v3463_v47 = vsel %vm1941_vm6, 1.0, %v3779_v34  ;;  %vm1949_vm1 = vcmp.le.f32.partialorder %v1939_v54, %v4209_v9  ;;  %v1586_v46 = vsel %vm1584_vm7, %v4242_v16, -inf  ;;  %vm1797_vm9 = vmand %vm1793_vm11, %vm1795_vm12 }
 0x430   :  { %v1946_v57 = vadd.f32 %v3462_v0, %v1922_v50  ;;  %v1947_v51 = vadd.f32 %v3463_v47, %v1923_v63  ;;  %v3464_v2 = vsel %vm1948_vm8, 1.0, %v3779_v34  ;;  %vm1964_vm10 = vcmp.lt.f32.partialorder %v1959_v49, %v4216_v11 }
 0x431   :  { %vm1965_vm14 = vcmp.lt.f32.partialorder %v1963_v12, %v4209_v9  ;;  %vm1972_vm2 = vcmp.le.f32.partialorder %v1959_v49, %v4216_v11  ;;  %v1983_v19 = vrot.slane %v4216_v11, %v4372_v10  ;;  %v3465_v20 = vsel %vm1949_vm1, 1.0, %v3779_v34 }
 0x432   :  { %v1954_v22 = vadd.f32 %v3464_v2, %v1930_v45  ;;  %vm1973_vm15 = vcmp.le.f32.partialorder %v1963_v12, %v4209_v9  ;;  %v1987_v24 = vrot.slane %v4209_v9, %v4372_v10  ;;  %v1587_v35 = vsel %vm5016_vm4, %v4236_v15, -inf }
 0x433   :  { %v1588_v27 = vrot.slane %v1586_v46, 4  ;;  %v1798_v30 = vsel %vm5026_vm13, %v4231_v14, -inf  ;;  %v1955_v31 = vadd.f32 %v3465_v20, %v1931_v58  ;;  %v1799_v23 = vsel %vm1797_vm9, %v4223_v13, -inf }
 0x434   :  { %v3466_v38 = vsel %vm1964_vm10, 1.0, %v3779_v34  ;;  %v3467_v33 = vsel %vm1965_vm14, 1.0, %v3779_v34  ;;  %v3468_v40 = vsel %vm1972_vm2, 1.0, %v3779_v34  ;;  %v3469_v36 = vsel %vm1973_vm15, 1.0, %v3779_v34 }
 0x435   :  { %v1970_v43 = vadd.f32 %v3466_v38, %v1946_v57  ;;  %v1971_v56 = vadd.f32 %v3467_v33, %v1947_v51  ;;  %vm1988_vm0 = vcmp.lt.f32.partialorder %v1983_v19, %v4216_v11  ;;  %v1978_v42 = vadd.f32 %v3468_v40, %v1954_v22 }
 0x436   :  { %vm1989_vm3 = vcmp.lt.f32.partialorder %v1987_v24, %v4209_v9  ;;  %vm1996_vm5 = vcmp.le.f32.partialorder %v1983_v19, %v4216_v11  ;;  %vm1997_vm6 = vcmp.le.f32.partialorder %v1987_v24, %v4209_v9  ;;  %v1378_v60 = vrot.slane %v4705_v28, 2 }
 0x437   :  { %v1384_v55 = vrot.slane %v4707_v29, 2  ;;  %v1594_v54 = vrot.slane %v1587_v35, 4  ;;  %v1979_v4 = vadd.f32 %v3469_v36, %v1955_v31  ;;  %v1589_v5 = vmax.f32 %v1586_v46, %v1588_v27 }
 0x438   :  { %v1800_v6 = vrot.slane %v1798_v30, 4  ;;  %v1806_v32 = vrot.slane %v1799_v23, 4  ;;  %v3470_v44 = vsel %vm1988_vm0, 1.0, %v3779_v34  ;;  %v5064_v52 = vrot.slane %v4623_v41, %v4151_v25 }
 0x439   :  { %v3471_v7 = vsel %vm1989_vm3, 1.0, %v3779_v34  ;;  %v3472_v62 = vsel %vm1996_vm5, 1.0, %v3779_v34  ;;  %v3473_v50 = vsel %vm1997_vm6, 1.0, %v3779_v34  ;;  %v5070_v61 = vstv %s5038_s10 }
 0x43a   :  { %v1994_v49 = vadd.f32 %v3470_v44, %v1970_v43  ;;  %v1995_v12 = vadd.f32 %v3471_v7, %v1971_v56  ;;  %v2002_v48 = vadd.f32 %v3472_v62, %v1978_v42  ;;  %v2003_v37 = vadd.f32 %v3473_v50, %v1979_v4 }
 0x43b   :  { %v1379_v0 = vmax.f32 %v4705_v28, %v1378_v60  ;;  %v1385_v41 = vmax.f32 %v4707_v29, %v1384_v55  ;;  %v1590_v47 = vrot.slane %v1589_v5, 2  ;;  %v1595_v46 = vmax.f32 %v1587_v35, %v1594_v54 }
 0x43c   :  { %v1801_v51 = vmax.f32 %v1798_v30, %v1800_v6  ;;  %v1807_v2 = vmax.f32 %v1799_v23, %v1806_v32  ;;  %vm2004_vm8 = vcmp.le.f32.partialorder %v1994_v49, 3.0  ;;  %vm2005_vm11 = vcmp.le.f32.partialorder %v1995_v12, 3.0 }
 0x43d   :  { %vm2006_vm12 = vcmp.gt.f32.partialorder %v2002_v48, 3.0  ;;  %vm2007_vm1 = vcmp.gt.f32.partialorder %v2003_v37, 3.0  ;;  %v1380_v22 = vrot.slane %v1379_v0, 1  ;;  %v1386_v24 = vrot.slane %v1385_v41, 1 }
 0x43e   :  { %v1596_v35 = vrot.slane %v1595_v46, 2  ;;  %vm2008_vm13 = vmand %vm2004_vm8, %vm2006_vm12  ;;  %v5082_v27 = vmax.f32 %v1589_v5, %v1590_v47  ;;  %v1802_v30 = vrot.slane %v1801_v51, 2  ;;  %v1808_v38 = vrot.slane %v1807_v2, 2 }
 0x43f   :  { %vm2009_vm9 = vmand %vm2005_vm11, %vm2007_vm1  ;;  %v2010_v56 = vsel %vm2008_vm13, %v4216_v11, -inf  ;;  %v5094_v42 = vmax.f32 %v1379_v0, %v1380_v22  ;;  %v5096_v60 = vmax.f32 %v1385_v41, %v1386_v24 }
 0x440   :  { %v5098_v55 = vmax.f32 %v1595_v46, %v1596_v35  ;;  %v2011_v54 = vsel %vm2009_vm9, %v4209_v9, -inf  ;;  %v1592_v4 = vrot.slane %v5082_v27, 1  ;;  %v5102_v5 = vmax.f32 %v1801_v51, %v1802_v30 }
 0x441   :  { %v5106_v6 = vmax.f32 %v1807_v2, %v1808_v38  ;;  %v2012_v32 = vrot.slane %v2010_v56, 4  ;;  %v2018_v7 = vrot.slane %v2011_v54, 4 }
 0x443   :  { %v5122_v37 = vmax.f32 %v2010_v56, %v2012_v32  ;;  %v5137_v22 = vmax.f32 %v2011_v54, %v2018_v7 }
 0x475   :  { %v1064_v63 = vpop.f32.mrf.mxu0 }
 0x476   :  { %v1065_v45 = vadd.f32 %v1064_v63, %v4652_v59 }
 0x477   :  { %v1066_v58 = vpop.f32.mrf.mxu0 }
 0x478   :  { %vm1111_vm7 = vcmp.gt.f32.partialorder %v1065_v45, 0.0  ;;  %v1128_v18 = vmul.f32 %v5070_v61, %v1065_v45  ;;  %v1067_v57 = vadd.f32 %v1066_v58, %v5064_v52 }
 0x479   :  { %v1070_v29 = vpop.f32.mrf.mxu0 }
 0x47a   :  { %v5077_v19 = vsel %vm1111_vm7, %v1065_v45, %v1128_v18  ;;  %vm1112_vm4 = vcmp.gt.f32.partialorder %v1067_v57, 0.0  ;;  %v1129_v20 = vmul.f32 %v5070_v61, %v1067_v57  ;;  %v1071_v43 = vadd.f32 %v1070_v29, %v4652_v59 }
 0x47b   :  { %v2036_v31 = vrot.slane %v5077_v19, %v4154_v26  ;;  %v2060_v23 = vrot.slane %v5077_v19, %v4151_v25  ;;  %v1072_v36 = vpop.f32.mrf.mxu0  ;;  %v2084_v62 = vrot.slane %v5077_v19, %v4265_v21  ;;  %v2108_v0 = vrot.slane %v5077_v19, %v4272_v3 }
 0x47c   :  { %v5080_v28 = vsel %vm1112_vm4, %v1067_v57, %v1129_v20  ;;  %v1130_v44 = vmul.f32 %v5070_v61, %v1071_v43  ;;  %v1073_v12 = vadd.f32 %v1072_v36, %v5064_v52  ;;  %vm1113_vm7 = vcmp.gt.f32.partialorder %v1071_v43, 0.0 }
 0x47d   :  { %v2040_v33 = vrot.slane %v5080_v28, %v4154_v26  ;;  %v2064_v40 = vrot.slane %v5080_v28, %v4151_v25  ;;  %vm2041_vm10 = vcmp.lt.f32.partialorder %v2036_v31, %v5077_v19  ;;  %vm2065_vm14 = vcmp.lt.f32.partialorder %v2060_v23, %v5077_v19  ;;  %v1076_v50 = vpop.f32.mrf.mxu0 }
 0x47e   :  { %vm2049_vm0 = vcmp.le.f32.partialorder %v2036_v31, %v5077_v19  ;;  %v3474_v63 = vsel %vm2041_vm10, 1.0, %v3779_v34  ;;  %v3478_v49 = vsel %vm2065_vm14, 1.0, %v3779_v34  ;;  %vm2073_vm5 = vcmp.le.f32.partialorder %v2060_v23, %v5077_v19 }
 0x47f   :  { %vm2042_vm2 = vcmp.lt.f32.partialorder %v2040_v33, %v5080_v28  ;;  %vm2066_vm15 = vcmp.lt.f32.partialorder %v2064_v40, %v5080_v28  ;;  %vm2050_vm3 = vcmp.le.f32.partialorder %v2040_v33, %v5080_v28  ;;  %vm2074_vm6 = vcmp.le.f32.partialorder %v2064_v40, %v5080_v28  ;;  %v1078_v57 = vpop.f32.mrf.mxu0 }
 0x480   :  { %v3475_v48 = vsel %vm2042_vm2, 1.0, %v3779_v34  ;;  %v3479_v45 = vsel %vm2066_vm15, 1.0, %v3779_v34  ;;  %v3476_v58 = vsel %vm2049_vm0, 1.0, %v3779_v34  ;;  %v3477_v41 = vsel %vm2050_vm3, 1.0, %v3779_v34 }
 0x481   :  { %v2071_v47 = vadd.f32 %v3478_v49, %v3474_v63  ;;  %v3480_v46 = vsel %vm2073_vm5, 1.0, %v3779_v34  ;;  %v2088_v18 = vrot.slane %v5080_v28, %v4265_v21  ;;  %v2072_v51 = vadd.f32 %v3479_v45, %v3475_v48  ;;  %v1082_v33 = vpop.f32.mrf.mxu0 }
 0x482   :  { %v3481_v2 = vsel %vm2074_vm6, 1.0, %v3779_v34  ;;  %vm2089_vm8 = vcmp.lt.f32.partialorder %v2084_v62, %v5077_v19  ;;  %v2112_v20 = vrot.slane %v5080_v28, %v4272_v3  ;;  %v5135_v29 = vsel %vm1113_vm7, %v1071_v43, %v1130_v44 }
 0x483   :  { %vm1114_vm11 = vcmp.gt.f32.partialorder %v1073_v12, 0.0  ;;  %vm2090_vm12 = vcmp.lt.f32.partialorder %v2088_v18, %v5080_v28  ;;  %v1131_v24 = vmul.f32 %v5070_v61, %v1073_v12  ;;  %v5142_v35 = vadd.f32 %v1076_v50, %v4652_v59 }
 0x484   :  { %v2079_v30 = vadd.f32 %v3480_v46, %v3476_v58  ;;  %vm2097_vm4 = vcmp.le.f32.partialorder %v2084_v62, %v5077_v19  ;;  %v2080_v31 = vadd.f32 %v3481_v2, %v3477_v41  ;;  %v3482_v23 = vsel %vm2089_vm8, 1.0, %v3779_v34 }
 0x485   :  { %v3483_v38 = vsel %vm2090_vm12, 1.0, %v3779_v34  ;;  %vm2098_vm1 = vcmp.le.f32.partialorder %v2088_v18, %v5080_v28  ;;  %v2095_v40 = vadd.f32 %v3482_v23, %v2071_v47  ;;  %vm2113_vm13 = vcmp.lt.f32.partialorder %v2108_v0, %v5077_v19 }
 0x486   :  { %v2096_v43 = vadd.f32 %v3483_v38, %v2072_v51  ;;  %vm2114_vm9 = vcmp.lt.f32.partialorder %v2112_v20, %v5080_v28  ;;  %v5151_v56 = vadd.f32 %v1078_v57, %v5064_v52  ;;  %v3484_v36 = vsel %vm2097_vm4, 1.0, %v3779_v34 }
 0x487   :  { %vm2121_vm10 = vcmp.le.f32.partialorder %v2108_v0, %v5077_v19  ;;  %v2132_v54 = vrot.slane %v5077_v19, %v4298_v39  ;;  %v3485_v32 = vsel %vm2098_vm1, 1.0, %v3779_v34  ;;  %v2103_v44 = vadd.f32 %v3484_v36, %v2079_v30  ;;  %v1084_v36 = vpop.f32.mrf.mxu0 }
 0x488   :  { %vm2122_vm14 = vcmp.le.f32.partialorder %v2112_v20, %v5080_v28  ;;  %v2136_v7 = vrot.slane %v5080_v28, %v4298_v39  ;;  %v5162_v62 = vadd.f32 %v1082_v33, %v4652_v59  ;;  %v2104_v50 = vadd.f32 %v3485_v32, %v2080_v31 }
 0x489   :  { %v3486_v63 = vsel %vm2113_vm13, 1.0, %v3779_v34  ;;  %v3487_v49 = vsel %vm2114_vm9, 1.0, %v3779_v34  ;;  %v5167_v48 = vsel %vm1114_vm11, %v1073_v12, %v1131_v24  ;;  %v3488_v0 = vsel %vm2121_vm10, 1.0, %v3779_v34 }
 0x48a   :  { %v2119_v45 = vadd.f32 %v3486_v63, %v2095_v40  ;;  %v2120_v58 = vadd.f32 %v3487_v49, %v2096_v43  ;;  %v3489_v41 = vsel %vm2122_vm14, 1.0, %v3779_v34  ;;  %vm2137_vm2 = vcmp.lt.f32.partialorder %v2132_v54, %v5077_v19 }
 0x48b   :  { %vm2145_vm15 = vcmp.le.f32.partialorder %v2132_v54, %v5077_v19  ;;  %v2156_v47 = vrot.slane %v5077_v19, %v4325_v53  ;;  %v2127_v46 = vadd.f32 %v3488_v0, %v2103_v44  ;;  %vm2138_vm0 = vcmp.lt.f32.partialorder %v2136_v7, %v5080_v28 }
 0x48c   :  { %vm2146_vm3 = vcmp.le.f32.partialorder %v2136_v7, %v5080_v28  ;;  %v2160_v12 = vrot.slane %v5080_v28, %v4325_v53  ;;  %v5181_v18 = vmul.f32 %v5070_v61, %v5142_v35  ;;  %v5185_v57 = vmul.f32 %v5070_v61, %v5151_v56 }
 0x48d   :  { %v5189_v51 = vmul.f32 %v5070_v61, %v5162_v62  ;;  %v2128_v2 = vadd.f32 %v3489_v41, %v2104_v50  ;;  %v3490_v20 = vsel %vm2137_vm2, 1.0, %v3779_v34  ;;  %v3492_v24 = vsel %vm2145_vm15, 1.0, %v3779_v34 }
 0x48e   :  { %v2180_v30 = vrot.slane %v5077_v19, %v4344_v8  ;;  %v2184_v31 = vrot.slane %v5080_v28, %v4344_v8  ;;  %v3491_v23 = vsel %vm2138_vm0, 1.0, %v3779_v34  ;;  %v2143_v38 = vadd.f32 %v3490_v20, %v2119_v45 }
 0x48f   :  { %v3493_v33 = vsel %vm2146_vm3, 1.0, %v3779_v34  ;;  %vm2161_vm5 = vcmp.lt.f32.partialorder %v2156_v47, %v5077_v19  ;;  %v2144_v40 = vadd.f32 %v3491_v23, %v2120_v58  ;;  %v2151_v43 = vadd.f32 %v3492_v24, %v2127_v46 }
 0x490   :  { %vm2162_vm6 = vcmp.lt.f32.partialorder %v2160_v12, %v5080_v28  ;;  %vm2169_vm7 = vcmp.le.f32.partialorder %v2156_v47, %v5077_v19  ;;  %v2152_v54 = vadd.f32 %v3493_v33, %v2128_v2  ;;  %vm2170_vm8 = vcmp.le.f32.partialorder %v2160_v12, %v5080_v28 }
 0x491   :  { %v2204_v32 = vrot.slane %v5077_v19, %v4372_v10  ;;  %v2208_v44 = vrot.slane %v5080_v28, %v4372_v10  ;;  %v3494_v7 = vsel %vm2161_vm5, 1.0, %v3779_v34  ;;  %vm2185_vm11 = vcmp.lt.f32.partialorder %v2180_v30, %v5077_v19 }
 0x492   :  { %vm2186_vm12 = vcmp.lt.f32.partialorder %v2184_v31, %v5080_v28  ;;  %vm2193_vm4 = vcmp.le.f32.partialorder %v2180_v30, %v5077_v19  ;;  %v3495_v50 = vsel %vm2162_vm6, 1.0, %v3779_v34  ;;  %v2167_v63 = vadd.f32 %v3494_v7, %v2143_v38 }
 0x493   :  { %v3496_v49 = vsel %vm2169_vm7, 1.0, %v3779_v34  ;;  %vm2194_vm1 = vcmp.le.f32.partialorder %v2184_v31, %v5080_v28  ;;  %v5215_v45 = vadd.f32 %v1084_v36, %v5064_v52  ;;  %v2168_v58 = vadd.f32 %v3495_v50, %v2144_v40 }
 0x494   :  { %v3497_v0 = vsel %vm2170_vm8, 1.0, %v3779_v34  ;;  %v2175_v41 = vadd.f32 %v3496_v49, %v2151_v43  ;;  %v3498_v46 = vsel %vm2185_vm11, 1.0, %v3779_v34  ;;  %v3499_v12 = vsel %vm2186_vm12, 1.0, %v3779_v34 }
 0x495   :  { %v2176_v47 = vadd.f32 %v3497_v0, %v2152_v54  ;;  %v3500_v2 = vsel %vm2193_vm4, 1.0, %v3779_v34  ;;  %v3501_v20 = vsel %vm2194_vm1, 1.0, %v3779_v34  ;;  %v2248_v24 = vrot.slane %v5135_v29, %v4154_v26 }
 0x496   :  { %v2252_v30 = vrot.slane %v5167_v48, %v4154_v26  ;;  %v2272_v31 = vrot.slane %v5135_v29, %v4151_v25  ;;  %v2191_v23 = vadd.f32 %v3498_v46, %v2167_v63  ;;  %vm2209_vm13 = vcmp.lt.f32.partialorder %v2204_v32, %v5077_v19 }
 0x497   :  { %vm2210_vm9 = vcmp.lt.f32.partialorder %v2208_v44, %v5080_v28  ;;  %v2276_v38 = vrot.slane %v5167_v48, %v4151_v25  ;;  %v2192_v33 = vadd.f32 %v3499_v12, %v2168_v58  ;;  %v2199_v40 = vadd.f32 %v3500_v2, %v2175_v41 }
 0x498   :  { %vm2253_vm10 = vcmp.lt.f32.partialorder %v2248_v24, %v5135_v29  ;;  %vm2254_vm14 = vcmp.lt.f32.partialorder %v2252_v30, %v5167_v48  ;;  %v2200_v43 = vadd.f32 %v3501_v20, %v2176_v47  ;;  %vm2217_vm2 = vcmp.le.f32.partialorder %v2204_v32, %v5077_v19 }
 0x499   :  { %vm2218_vm15 = vcmp.le.f32.partialorder %v2208_v44, %v5080_v28  ;;  %vm2261_vm0 = vcmp.le.f32.partialorder %v2248_v24, %v5135_v29  ;;  %v3502_v36 = vsel %vm2209_vm13, 1.0, %v3779_v34  ;;  %v3503_v54 = vsel %vm2210_vm9, 1.0, %v3779_v34 }
 0x49a   :  { %vm2262_vm3 = vcmp.le.f32.partialorder %v2252_v30, %v5167_v48  ;;  %vm2277_vm5 = vcmp.lt.f32.partialorder %v2272_v31, %v5135_v29  ;;  %v3506_v7 = vsel %vm2253_vm10, 1.0, %v3779_v34  ;;  %v3507_v50 = vsel %vm2254_vm14, 1.0, %v3779_v34 }
 0x49b   :  { %vm2278_vm6 = vcmp.lt.f32.partialorder %v2276_v38, %v5167_v48  ;;  %vm2285_vm7 = vcmp.le.f32.partialorder %v2272_v31, %v5135_v29  ;;  %v3508_v63 = vsel %vm2261_vm0, 1.0, %v3779_v34  ;;  %v3510_v49 = vsel %vm2277_vm5, 1.0, %v3779_v34 }
 0x49c   :  { %v3511_v58 = vsel %vm2278_vm6, 1.0, %v3779_v34  ;;  %vm2286_vm8 = vcmp.le.f32.partialorder %v2276_v38, %v5167_v48  ;;  %v2215_v0 = vadd.f32 %v3502_v36, %v2191_v23  ;;  %v3504_v41 = vsel %vm2217_vm2, 1.0, %v3779_v34 }
 0x49d   :  { %v3505_v47 = vsel %vm2218_vm15, 1.0, %v3779_v34  ;;  %v3512_v46 = vsel %vm2285_vm7, 1.0, %v3779_v34  ;;  %v2216_v12 = vadd.f32 %v3503_v54, %v2192_v33  ;;  %v3509_v2 = vsel %vm2262_vm3, 1.0, %v3779_v34 }
 0x49e   :  { %v3513_v20 = vsel %vm2286_vm8, 1.0, %v3779_v34  ;;  %v2296_v24 = vrot.slane %v5135_v29, %v4265_v21  ;;  %vm1115_vm11 = vcmp.gt.f32.partialorder %v5142_v35, 0.0  ;;  %v2283_v30 = vadd.f32 %v3510_v49, %v3506_v7 }
 0x49f   :  { %v2284_v31 = vadd.f32 %v3511_v58, %v3507_v50  ;;  %v2291_v32 = vadd.f32 %v3512_v46, %v3508_v63  ;;  %v2300_v23 = vrot.slane %v5167_v48, %v4265_v21  ;;  %vm1116_vm12 = vcmp.gt.f32.partialorder %v5151_v56, 0.0 }
 0x4a0   :  { %vm1117_vm4 = vcmp.gt.f32.partialorder %v5162_v62, 0.0  ;;  %vm2301_vm1 = vcmp.lt.f32.partialorder %v2296_v24, %v5135_v29  ;;  %vm2309_vm13 = vcmp.le.f32.partialorder %v2296_v24, %v5135_v29  ;;  %v2320_v44 = vrot.slane %v5135_v29, %v4272_v3 }
 0x4a1   :  { %v2324_v38 = vrot.slane %v5167_v48, %v4272_v3  ;;  %v2223_v33 = vadd.f32 %v3504_v41, %v2199_v40  ;;  %v2292_v36 = vadd.f32 %v3513_v20, %v3509_v2  ;;  %vm2302_vm9 = vcmp.lt.f32.partialorder %v2300_v23, %v5167_v48 }
 0x4a2   :  { %vm2310_vm10 = vcmp.le.f32.partialorder %v2300_v23, %v5167_v48  ;;  %v2224_v54 = vadd.f32 %v3505_v47, %v2200_v43  ;;  %vm2225_vm14 = vcmp.le.f32.partialorder %v2215_v0, 3.0  ;;  %v3514_v7 = vsel %vm2301_vm1, 1.0, %v3779_v34 }
 0x4a3   :  { %v3515_v50 = vsel %vm2302_vm9, 1.0, %v3779_v34  ;;  %v2307_v63 = vadd.f32 %v3514_v7, %v2283_v30  ;;  %v3516_v58 = vsel %vm2309_vm13, 1.0, %v3779_v34  ;;  %v2344_v46 = vrot.slane %v5135_v29, %v4298_v39 }
 0x4a4   :  { %v2308_v49 = vadd.f32 %v3515_v50, %v2284_v31  ;;  %v3517_v40 = vsel %vm2310_vm10, 1.0, %v3779_v34  ;;  %v2315_v41 = vadd.f32 %v3516_v58, %v2291_v32  ;;  %vm2325_vm2 = vcmp.lt.f32.partialorder %v2320_v44, %v5135_v29 }
 0x4a5   :  { %vm2326_vm15 = vcmp.lt.f32.partialorder %v2324_v38, %v5167_v48  ;;  %vm2226_vm0 = vcmp.le.f32.partialorder %v2216_v12, 3.0  ;;  %vm2227_vm3 = vcmp.gt.f32.partialorder %v2223_v33, 3.0  ;;  %v2316_v43 = vadd.f32 %v3517_v40, %v2292_v36 }
 0x4a6   :  { %vm2333_vm5 = vcmp.le.f32.partialorder %v2320_v44, %v5135_v29  ;;  %vm2228_vm6 = vcmp.gt.f32.partialorder %v2224_v54, 3.0  ;;  %v3518_v47 = vsel %vm2325_vm2, 1.0, %v3779_v34  ;;  %v3519_v2 = vsel %vm2326_vm15, 1.0, %v3779_v34  ;;  %vm5320_vm10 = vmand %vm2225_vm14, %vm2227_vm3 }
 0x4a7   :  { %vm2334_vm7 = vcmp.le.f32.partialorder %v2324_v38, %v5167_v48  ;;  %v2331_v20 = vadd.f32 %v3518_v47, %v2307_v63  ;;  %v3520_v24 = vsel %vm2333_vm5, 1.0, %v3779_v34  ;;  %v2348_v30 = vrot.slane %v5167_v48, %v4298_v39  ;;  %vm2230_vm2 = vmand %vm2226_vm0, %vm2228_vm6 }
 0x4a8   :  { %vm2349_vm8 = vcmp.lt.f32.partialorder %v2344_v46, %v5135_v29  ;;  %v2332_v31 = vadd.f32 %v3519_v2, %v2308_v49  ;;  %v3521_v32 = vsel %vm2334_vm7, 1.0, %v3779_v34  ;;  %v2339_v23 = vadd.f32 %v3520_v24, %v2315_v41 }
 0x4a9   :  { %v2368_v44 = vrot.slane %v5135_v29, %v4325_v53  ;;  %v2340_v36 = vadd.f32 %v3521_v32, %v2316_v43  ;;  %vm2350_vm1 = vcmp.lt.f32.partialorder %v2348_v30, %v5167_v48  ;;  %vm2357_vm13 = vcmp.le.f32.partialorder %v2344_v46, %v5135_v29 }
 0x4aa   :  { %vm2358_vm9 = vcmp.le.f32.partialorder %v2348_v30, %v5167_v48  ;;  %v5299_v38 = vsel %vm1115_vm11, %v5142_v35, %v5181_v18  ;;  %v2014_v7 = vrot.slane %v5122_v37, 2  ;;  %v3522_v50 = vsel %vm2349_vm8, 1.0, %v3779_v34 }
 0x4ab   :  { %v2372_v63 = vrot.slane %v5167_v48, %v4325_v53  ;;  %v5309_v49 = vsel %vm1116_vm12, %v5151_v56, %v5185_v57  ;;  %v5315_v58 = vsel %vm1117_vm4, %v5162_v62, %v5189_v51  ;;  %vm1118_vm11 = vcmp.gt.f32.partialorder %v5215_v45, 0.0 }
 0x4ac   :  { %v2355_v18 = vadd.f32 %v3522_v50, %v2331_v20  ;;  %v3523_v56 = vsel %vm2350_vm1, 1.0, %v3779_v34  ;;  %v3524_v57 = vsel %vm2357_vm13, 1.0, %v3779_v34  ;;  %v3525_v46 = vsel %vm2358_vm9, 1.0, %v3779_v34 }
 0x4ad   :  { %vm2373_vm12 = vcmp.lt.f32.partialorder %v2368_v44, %v5135_v29  ;;  %v2356_v62 = vadd.f32 %v3523_v56, %v2332_v31  ;;  %v2363_v51 = vadd.f32 %v3524_v57, %v2339_v23  ;;  %v2364_v33 = vadd.f32 %v3525_v46, %v2340_v36 }
 0x4ae   :  { %vm2381_vm4 = vcmp.le.f32.partialorder %v2368_v44, %v5135_v29  ;;  %vm2374_vm14 = vcmp.lt.f32.partialorder %v2372_v63, %v5167_v48  ;;  %vm2382_vm15 = vcmp.le.f32.partialorder %v2372_v63, %v5167_v48  ;;  %v2392_v0 = vrot.slane %v5135_v29, %v4344_v8 }
 0x4af   :  { %v2396_v12 = vrot.slane %v5167_v48, %v4344_v8  ;;  %v1135_v54 = vmul.f32 %v5070_v61, %v5215_v45  ;;  %v2231_v40 = vsel %vm5320_vm10, %v5077_v19, -inf  ;;  %v5343_v41 = vsel %vm2230_vm2, %v5080_v28, -inf }
 0x4b0   :  { %v3526_v43 = vsel %vm2373_vm12, 1.0, %v3779_v34  ;;  %v3528_v2 = vsel %vm2381_vm4, 1.0, %v3779_v34  ;;  %vm2397_vm0 = vcmp.lt.f32.partialorder %v2392_v0, %v5135_v29  ;;  %v2416_v20 = vrot.slane %v5135_v29, %v4372_v10 }
 0x4b1   :  { %v2379_v47 = vadd.f32 %v3526_v43, %v2355_v18  ;;  %v3527_v24 = vsel %vm2374_vm14, 1.0, %v3779_v34  ;;  %v3529_v30 = vsel %vm2382_vm15, 1.0, %v3779_v34  ;;  %v2387_v31 = vadd.f32 %v3528_v2, %v2363_v51 }
 0x4b2   :  { %vm2405_vm3 = vcmp.le.f32.partialorder %v2392_v0, %v5135_v29  ;;  %v2233_v32 = vrot.slane %v2231_v40, 4  ;;  %v2380_v23 = vadd.f32 %v3527_v24, %v2356_v62  ;;  %v2388_v44 = vadd.f32 %v3529_v30, %v2364_v33 }
 0x4b3   :  { %vm2398_vm5 = vcmp.lt.f32.partialorder %v2396_v12, %v5167_v48  ;;  %v3530_v36 = vsel %vm2397_vm0, 1.0, %v3779_v34  ;;  %vm2406_vm6 = vcmp.le.f32.partialorder %v2396_v12, %v5167_v48  ;;  %v2460_v50 = vrot.slane %v5299_v38, %v4154_v26 }
 0x4b4   :  { %v2464_v63 = vrot.slane %v5309_v49, %v4154_v26  ;;  %v2403_v35 = vadd.f32 %v3530_v36, %v2379_v47  ;;  %v3532_v18 = vsel %vm2405_vm3, 1.0, %v3779_v34  ;;  %v2420_v56 = vrot.slane %v5167_v48, %v4372_v10 }
 0x4b5   :  { %vm2421_vm7 = vcmp.lt.f32.partialorder %v2416_v20, %v5135_v29  ;;  %v5367_v57 = vsel %vm1118_vm11, %v5215_v45, %v1135_v54  ;;  %v3531_v46 = vsel %vm2398_vm5, 1.0, %v3779_v34  ;;  %v2411_v62 = vadd.f32 %v3532_v18, %v2387_v31 }
 0x4b6   :  { %vm2429_vm8 = vcmp.le.f32.partialorder %v2416_v20, %v5135_v29  ;;  %v5371_v51 = vmax.f32 %v2231_v40, %v2233_v32  ;;  %v2239_v33 = vrot.slane %v5343_v41, 4  ;;  %v2404_v0 = vadd.f32 %v3531_v46, %v2380_v23 }
 0x4b7   :  { %v3533_v12 = vsel %vm2406_vm6, 1.0, %v3779_v34  ;;  %v3534_v43 = vsel %vm2421_vm7, 1.0, %v3779_v34  ;;  %vm2465_vm1 = vcmp.lt.f32.partialorder %v2460_v50, %v5299_v38  ;;  %vm2466_vm13 = vcmp.lt.f32.partialorder %v2464_v63, %v5309_v49 }
 0x4b8   :  { %vm2473_vm9 = vcmp.le.f32.partialorder %v2460_v50, %v5299_v38  ;;  %v2412_v45 = vadd.f32 %v3533_v12, %v2388_v44  ;;  %vm2422_vm11 = vcmp.lt.f32.partialorder %v2420_v56, %v5167_v48  ;;  %v2427_v54 = vadd.f32 %v3534_v43, %v2403_v35 }
 0x4b9   :  { %v3536_v40 = vsel %vm2429_vm8, 1.0, %v3779_v34  ;;  %vm2474_vm10 = vcmp.le.f32.partialorder %v2464_v63, %v5309_v49  ;;  %v2484_v2 = vrot.slane %v5299_v38, %v4151_v25  ;;  %v2488_v20 = vrot.slane %v5309_v49, %v4151_v25 }
 0x4ba   :  { %v2435_v47 = vadd.f32 %v3536_v40, %v2411_v62  ;;  %v3538_v24 = vsel %vm2465_vm1, 1.0, %v3779_v34  ;;  %v3539_v30 = vsel %vm2466_vm13, 1.0, %v3779_v34  ;;  %v3540_v31 = vsel %vm2473_vm9, 1.0, %v3779_v34 }
 0x4bb   :  { %v2508_v32 = vrot.slane %v5299_v38, %v4265_v21  ;;  %vm2489_vm2 = vcmp.lt.f32.partialorder %v2484_v2, %v5299_v38  ;;  %vm2490_vm12 = vcmp.lt.f32.partialorder %v2488_v20, %v5309_v49  ;;  %vm2497_vm4 = vcmp.le.f32.partialorder %v2484_v2, %v5299_v38 }
 0x4bc   :  { %v2512_v23 = vrot.slane %v5309_v49, %v4265_v21  ;;  %v3541_v44 = vsel %vm2474_vm10, 1.0, %v3779_v34  ;;  %v3542_v36 = vsel %vm2489_vm2, 1.0, %v3779_v34  ;;  %v3543_v50 = vsel %vm2490_vm12, 1.0, %v3779_v34 }
 0x4bd   :  { %vm2498_vm14 = vcmp.le.f32.partialorder %v2488_v20, %v5309_v49  ;;  %vm2430_vm15 = vcmp.le.f32.partialorder %v2420_v56, %v5167_v48  ;;  %vm2437_vm0 = vcmp.le.f32.partialorder %v2427_v54, 3.0  ;;  %v2495_v63 = vadd.f32 %v3542_v36, %v3538_v24 }
 0x4be   :  { %v3544_v35 = vsel %vm2497_vm4, 1.0, %v3779_v34  ;;  %v2496_v18 = vadd.f32 %v3543_v50, %v3539_v30  ;;  %v3545_v46 = vsel %vm2498_vm14, 1.0, %v3779_v34  ;;  %vm2513_vm3 = vcmp.lt.f32.partialorder %v2508_v32, %v5299_v38 }
 0x4bf   :  { %v2503_v62 = vadd.f32 %v3544_v35, %v3540_v31  ;;  %vm2439_vm5 = vcmp.gt.f32.partialorder %v2435_v47, 3.0  ;;  %v2504_v12 = vadd.f32 %v3545_v46, %v3541_v44  ;;  %vm2514_vm6 = vcmp.lt.f32.partialorder %v2512_v23, %v5309_v49 }
 0x4c0   :  { %v2532_v43 = vrot.slane %v5299_v38, %v4272_v3  ;;  %v3535_v40 = vsel %vm2422_vm11, 1.0, %v3779_v34  ;;  %v3537_v2 = vsel %vm2430_vm15, 1.0, %v3779_v34  ;;  %v3546_v20 = vsel %vm2513_vm3, 1.0, %v3779_v34  ;;  %vm2441_vm1 = vmand %vm2437_vm0, %vm2439_vm5 }
 0x4c1   :  { %vm2521_vm7 = vcmp.le.f32.partialorder %v2508_v32, %v5299_v38  ;;  %v3547_v24 = vsel %vm2514_vm6, 1.0, %v3779_v34  ;;  %v2519_v30 = vadd.f32 %v3546_v20, %v2495_v63  ;;  %vm2522_vm8 = vcmp.le.f32.partialorder %v2512_v23, %v5309_v49 }
 0x4c2   :  { %v3548_v47 = vsel %vm2521_vm7, 1.0, %v3779_v34  ;;  %v2520_v31 = vadd.f32 %v3547_v24, %v2496_v18  ;;  %v3549_v44 = vsel %vm2522_vm8, 1.0, %v3779_v34  ;;  %v2536_v36 = vrot.slane %v5309_v49, %v4272_v3 }
 0x4c3   :  { %v2527_v56 = vadd.f32 %v3548_v47, %v2503_v62  ;;  %v5420_v50 = vadd.f32 %v3535_v40, %v2404_v0  ;;  %v2528_v35 = vadd.f32 %v3549_v44, %v2504_v12  ;;  %vm2537_vm13 = vcmp.lt.f32.partialorder %v2532_v43, %v5299_v38 }
 0x4c4   :  { %vm2545_vm9 = vcmp.le.f32.partialorder %v2532_v43, %v5299_v38  ;;  %v5424_v32 = vadd.f32 %v3537_v2, %v2412_v45  ;;  %vm2538_vm11 = vcmp.lt.f32.partialorder %v2536_v36, %v5309_v49  ;;  %v3550_v54 = vsel %vm2537_vm13, 1.0, %v3779_v34 }
 0x4c5   :  { %vm2546_vm10 = vcmp.le.f32.partialorder %v2536_v36, %v5309_v49  ;;  %v5430_v23 = vsel %vm2441_vm1, %v5135_v29, -inf  ;;  %v3551_v63 = vsel %vm2538_vm11, 1.0, %v3779_v34  ;;  %v2543_v0 = vadd.f32 %v3550_v54, %v2519_v30 }
 0x4c6   :  { %v3552_v18 = vsel %vm2545_vm9, 1.0, %v3779_v34  ;;  %v2544_v46 = vadd.f32 %v3551_v63, %v2520_v31  ;;  %v3553_v62 = vsel %vm2546_vm10, 1.0, %v3779_v34  ;;  %v2556_v45 = vrot.slane %v5299_v38, %v4298_v39 }
 0x4c7   :  { %v2551_v12 = vadd.f32 %v3552_v18, %v2527_v56  ;;  %v2552_v43 = vadd.f32 %v3553_v62, %v2528_v35  ;;  %v2560_v40 = vrot.slane %v5309_v49, %v4298_v39  ;;  %v2580_v2 = vrot.slane %v5299_v38, %v4325_v53 }
 0x4c8   :  { %v2584_v20 = vrot.slane %v5309_v49, %v4325_v53  ;;  %vm2561_vm2 = vcmp.lt.f32.partialorder %v2556_v45, %v5299_v38  ;;  %vm2569_vm12 = vcmp.le.f32.partialorder %v2556_v45, %v5299_v38  ;;  %v2604_v24 = vrot.slane %v5299_v38, %v4344_v8 }
 0x4c9   :  { %v2608_v30 = vrot.slane %v5309_v49, %v4344_v8  ;;  %vm2562_vm4 = vcmp.lt.f32.partialorder %v2560_v40, %v5309_v49  ;;  %v3554_v47 = vsel %vm2561_vm2, 1.0, %v3779_v34  ;;  %vm2570_vm14 = vcmp.le.f32.partialorder %v2560_v40, %v5309_v49 }
 0x4ca   :  { %v3556_v31 = vsel %vm2569_vm12, 1.0, %v3779_v34  ;;  %vm2438_vm15 = vcmp.le.f32.partialorder %v5420_v50, 3.0  ;;  %vm2440_vm0 = vcmp.gt.f32.partialorder %v5424_v32, 3.0  ;;  %v3555_v44 = vsel %vm2562_vm4, 1.0, %v3779_v34 }
 0x4cb   :  { %v2567_v56 = vadd.f32 %v3554_v47, %v2543_v0  ;;  %v3557_v36 = vsel %vm2570_vm14, 1.0, %v3779_v34  ;;  %v2575_v35 = vadd.f32 %v3556_v31, %v2551_v12  ;;  %v2568_v54 = vadd.f32 %v3555_v44, %v2544_v46  ;;  %vm2442_vm4 = vmand %vm2438_vm15, %vm2440_vm0 }
 0x4cc   :  { %v2576_v63 = vadd.f32 %v3557_v36, %v2552_v43  ;;  %vm2585_vm3 = vcmp.lt.f32.partialorder %v2580_v2, %v5299_v38  ;;  %vm2586_vm5 = vcmp.lt.f32.partialorder %v2584_v20, %v5309_v49  ;;  %vm2593_vm6 = vcmp.le.f32.partialorder %v2580_v2, %v5299_v38 }
 0x4cd   :  { %v3558_v18 = vsel %vm2585_vm3, 1.0, %v3779_v34  ;;  %v3559_v62 = vsel %vm2586_vm5, 1.0, %v3779_v34  ;;  %vm2594_vm7 = vcmp.le.f32.partialorder %v2584_v20, %v5309_v49  ;;  %v3560_v0 = vsel %vm2593_vm6, 1.0, %v3779_v34 }
 0x4ce   :  { %v2591_v45 = vadd.f32 %v3558_v18, %v2567_v56  ;;  %v2592_v40 = vadd.f32 %v3559_v62, %v2568_v54  ;;  %v3561_v12 = vsel %vm2594_vm7, 1.0, %v3779_v34  ;;  %v2599_v46 = vadd.f32 %v3560_v0, %v2575_v35 }
 0x4cf   :  { %v2600_v43 = vadd.f32 %v3561_v12, %v2576_v63  ;;  %vm2609_vm8 = vcmp.lt.f32.partialorder %v2604_v24, %v5299_v38  ;;  %vm2610_vm1 = vcmp.lt.f32.partialorder %v2608_v30, %v5309_v49  ;;  %vm2617_vm13 = vcmp.le.f32.partialorder %v2604_v24, %v5299_v38 }
 0x4d0   :  { %v3562_v47 = vsel %vm2609_vm8, 1.0, %v3779_v34  ;;  %v3563_v31 = vsel %vm2610_vm1, 1.0, %v3779_v34  ;;  %vm2618_vm9 = vcmp.le.f32.partialorder %v2608_v30, %v5309_v49  ;;  %v3564_v44 = vsel %vm2617_vm13, 1.0, %v3779_v34 }
 0x4d1   :  { %v2615_v2 = vadd.f32 %v3562_v47, %v2591_v45  ;;  %v2616_v20 = vadd.f32 %v3563_v31, %v2592_v40  ;;  %v3565_v56 = vsel %vm2618_vm9, 1.0, %v3779_v34  ;;  %v2623_v36 = vadd.f32 %v3564_v44, %v2599_v46 }
 0x4d2   :  { %v2624_v35 = vadd.f32 %v3565_v56, %v2600_v43  ;;  %v2628_v54 = vrot.slane %v5299_v38, %v4372_v10  ;;  %v2632_v63 = vrot.slane %v5309_v49, %v4372_v10  ;;  %v2672_v18 = vrot.slane %v5315_v58, %v4154_v26 }
 0x4d3   :  { %v2676_v24 = vrot.slane %v5367_v57, %v4154_v26  ;;  %v2696_v30 = vrot.slane %v5315_v58, %v4151_v25  ;;  %v2700_v62 = vrot.slane %v5367_v57, %v4151_v25  ;;  %v2235_v47 = vrot.slane %v5371_v51, 2 }
 0x4d4   :  { %vm2633_vm11 = vcmp.lt.f32.partialorder %v2628_v54, %v5299_v38  ;;  %vm2634_vm10 = vcmp.lt.f32.partialorder %v2632_v63, %v5309_v49  ;;  %vm2641_vm2 = vcmp.le.f32.partialorder %v2628_v54, %v5299_v38  ;;  %vm2642_vm12 = vcmp.le.f32.partialorder %v2632_v63, %v5309_v49 }
 0x4d5   :  { %v3566_v45 = vsel %vm2633_vm11, 1.0, %v3779_v34  ;;  %v3567_v40 = vsel %vm2634_vm10, 1.0, %v3779_v34  ;;  %v3568_v26 = vsel %vm2641_vm2, 1.0, %v3779_v34  ;;  %v3569_v0 = vsel %vm2642_vm12, 1.0, %v3779_v34 }
 0x4d6   :  { %v2639_v25 = vadd.f32 %v3566_v45, %v2615_v2  ;;  %v2640_v12 = vadd.f32 %v3567_v40, %v2616_v20  ;;  %v2647_v46 = vadd.f32 %v3568_v26, %v2623_v36  ;;  %v2648_v43 = vadd.f32 %v3569_v0, %v2624_v35 }
 0x4d7   :  { %v5501_v31 = vmax.f32 %v5343_v41, %v2239_v33  ;;  %v2445_v44 = vrot.slane %v5430_v23, 4  ;;  %vm2677_vm14 = vcmp.lt.f32.partialorder %v2672_v18, %v5315_v58  ;;  %vm2678_vm6 = vcmp.lt.f32.partialorder %v2676_v24, %v5367_v57 }
 0x4d8   :  { %vm2649_vm3 = vcmp.le.f32.partialorder %v2639_v25, 3.0  ;;  %vm2651_vm5 = vcmp.gt.f32.partialorder %v2647_v46, 3.0  ;;  %vm2685_vm15 = vcmp.le.f32.partialorder %v2672_v18, %v5315_v58  ;;  %v2444_v50 = vsel %vm2442_vm4, %v5167_v48, -inf }
 0x4d9   :  { %vm2650_vm0 = vcmp.le.f32.partialorder %v2640_v12, 3.0  ;;  %vm2652_vm7 = vcmp.gt.f32.partialorder %v2648_v43, 3.0  ;;  %vm2686_vm8 = vcmp.le.f32.partialorder %v2676_v24, %v5367_v57  ;;  %vm2653_vm1 = vmand %vm2649_vm3, %vm2651_vm5  ;;  %v3570_v41 = vsel %vm2677_vm14, 1.0, %v3779_v34 }
 0x4da   :  { %vm2701_vm13 = vcmp.lt.f32.partialorder %v2696_v30, %v5315_v58  ;;  %vm2702_vm9 = vcmp.lt.f32.partialorder %v2700_v62, %v5367_v57  ;;  %vm2709_vm11 = vcmp.le.f32.partialorder %v2696_v30, %v5315_v58  ;;  %v3571_v33 = vsel %vm2678_vm6, 1.0, %v3779_v34  ;;  %vm2654_vm2 = vmand %vm2650_vm0, %vm2652_vm7 }
 0x4db   :  { %v3572_v32 = vsel %vm2685_vm15, 1.0, %v3779_v34  ;;  %v3574_v2 = vsel %vm2701_vm13, 1.0, %v3779_v34  ;;  %v3575_v20 = vsel %vm2702_vm9, 1.0, %v3779_v34  ;;  %v5518_v56 = vmax.f32 %v5430_v23, %v2445_v44 }
 0x4dc   :  { %v2451_v36 = vrot.slane %v2444_v50, 4  ;;  %v3573_v35 = vsel %vm2686_vm8, 1.0, %v3779_v34  ;;  %vm2710_vm10 = vcmp.le.f32.partialorder %v2700_v62, %v5367_v57  ;;  %v2655_v54 = vsel %vm2653_vm1, %v5299_v38, -inf }
 0x4dd   :  { %v3576_v63 = vsel %vm2709_vm11, 1.0, %v3779_v34  ;;  %v3577_v18 = vsel %vm2710_vm10, 1.0, %v3779_v34  ;;  %v2720_v24 = vrot.slane %v5315_v58, %v4265_v21  ;;  %v2707_v30 = vadd.f32 %v3574_v2, %v3570_v41 }
 0x4de   :  { %v2708_v23 = vadd.f32 %v3575_v20, %v3571_v33  ;;  %v2715_v45 = vadd.f32 %v3576_v63, %v3572_v32  ;;  %v2724_v40 = vrot.slane %v5367_v57, %v4265_v21  ;;  %v2716_v26 = vadd.f32 %v3577_v18, %v3573_v35 }
 0x4df   :  { %vm2725_vm12 = vcmp.lt.f32.partialorder %v2720_v24, %v5315_v58  ;;  %vm2733_vm4 = vcmp.le.f32.partialorder %v2720_v24, %v5315_v58  ;;  %v2744_v62 = vrot.slane %v5315_v58, %v4272_v3  ;;  %v2447_v0 = vrot.slane %v5518_v56, 2 }
 0x4e0   :  { %v5536_v25 = vmax.f32 %v2444_v50, %v2451_v36  ;;  %vm2726_vm14 = vcmp.lt.f32.partialorder %v2724_v40, %v5367_v57  ;;  %vm2734_vm3 = vcmp.le.f32.partialorder %v2724_v40, %v5367_v57  ;;  %v2656_v12 = vsel %vm2654_vm2, %v5309_v49, -inf }
 0x4e1   :  { %v2657_v46 = vrot.slane %v2655_v54, 4  ;;  %v3578_v21 = vsel %vm2725_vm12, 1.0, %v3779_v34  ;;  %v3579_v43 = vsel %vm2726_vm14, 1.0, %v3779_v34  ;;  %v3580_v33 = vsel %vm2733_vm4, 1.0, %v3779_v34 }
 0x4e2   :  { %v2731_v44 = vadd.f32 %v3578_v21, %v2707_v30  ;;  %v2732_v41 = vadd.f32 %v3579_v43, %v2708_v23  ;;  %v3581_v32 = vsel %vm2734_vm3, 1.0, %v3779_v34  ;;  %v2739_v2 = vadd.f32 %v3580_v33, %v2715_v45 }
 0x4e3   :  { %v2740_v50 = vadd.f32 %v3581_v32, %v2716_v26  ;;  %v2748_v20 = vrot.slane %v5367_v57, %v4272_v3  ;;  %vm2749_vm5 = vcmp.lt.f32.partialorder %v2744_v62, %v5315_v58  ;;  %v2453_v36 = vrot.slane %v5536_v25, 2 }
 0x4e4   :  { %v2663_v35 = vrot.slane %v2656_v12, 4  ;;  %vm2757_vm6 = vcmp.le.f32.partialorder %v2744_v62, %v5315_v58  ;;  %v2768_v63 = vrot.slane %v5315_v58, %v4298_v39  ;;  %v5552_v18 = vmax.f32 %v2655_v54, %v2657_v46 }
 0x4e5   :  { %vm2750_vm15 = vcmp.lt.f32.partialorder %v2748_v20, %v5367_v57  ;;  %v3582_v24 = vsel %vm2749_vm5, 1.0, %v3779_v34  ;;  %vm2758_vm0 = vcmp.le.f32.partialorder %v2748_v20, %v5367_v57  ;;  %v3584_v23 = vsel %vm2757_vm6, 1.0, %v3779_v34 }
 0x4e6   :  { %v3583_v3 = vsel %vm2750_vm15, 1.0, %v3779_v34  ;;  %v2755_v30 = vadd.f32 %v3582_v24, %v2731_v44  ;;  %v3585_v45 = vsel %vm2758_vm0, 1.0, %v3779_v34  ;;  %v2763_v26 = vadd.f32 %v3584_v23, %v2739_v2 }
 0x4e7   :  { %v2756_v40 = vadd.f32 %v3583_v3, %v2732_v41  ;;  %v2764_v62 = vadd.f32 %v3585_v45, %v2740_v50  ;;  %v2772_v54 = vrot.slane %v5367_v57, %v4298_v39  ;;  %vm2773_vm7 = vcmp.lt.f32.partialorder %v2768_v63, %v5315_v58 }
 0x4e8   :  { %vm2781_vm8 = vcmp.le.f32.partialorder %v2768_v63, %v5315_v58  ;;  %v2792_v46 = vrot.slane %v5315_v58, %v4325_v53  ;;  %v2796_v21 = vrot.slane %v5367_v57, %v4325_v53  ;;  %v3586_v43 = vsel %vm2773_vm7, 1.0, %v3779_v34 }
 0x4e9   :  { %vm2774_vm1 = vcmp.lt.f32.partialorder %v2772_v54, %v5367_v57  ;;  %vm2782_vm13 = vcmp.le.f32.partialorder %v2772_v54, %v5367_v57  ;;  %v3588_v44 = vsel %vm2781_vm8, 1.0, %v3779_v34  ;;  %v2779_v41 = vadd.f32 %v3586_v43, %v2755_v30 }
 0x4ea   :  { %v3587_v39 = vsel %vm2774_vm1, 1.0, %v3779_v34  ;;  %v3589_v33 = vsel %vm2782_vm13, 1.0, %v3779_v34  ;;  %v2787_v32 = vadd.f32 %v3588_v44, %v2763_v26  ;;  %vm2797_vm9 = vcmp.lt.f32.partialorder %v2792_v46, %v5315_v58 }
 0x4eb   :  { %v2780_v2 = vadd.f32 %v3587_v39, %v2756_v40  ;;  %v2788_v50 = vadd.f32 %v3589_v33, %v2764_v62  ;;  %vm2798_vm11 = vcmp.lt.f32.partialorder %v2796_v21, %v5367_v57  ;;  %v3590_v53 = vsel %vm2797_vm9, 1.0, %v3779_v34 }
 0x4ec   :  { %v3591_v20 = vsel %vm2798_vm11, 1.0, %v3779_v34  ;;  %vm2805_vm10 = vcmp.le.f32.partialorder %v2792_v46, %v5315_v58  ;;  %vm2806_vm2 = vcmp.le.f32.partialorder %v2796_v21, %v5367_v57  ;;  %v2803_v63 = vadd.f32 %v3590_v53, %v2779_v41 }
 0x4ed   :  { %v2804_v24 = vadd.f32 %v3591_v20, %v2780_v2  ;;  %v3592_v3 = vsel %vm2805_vm10, 1.0, %v3779_v34  ;;  %v3593_v30 = vsel %vm2806_vm2, 1.0, %v3779_v34  ;;  %v2816_v40 = vrot.slane %v5315_v58, %v4344_v8 }
 0x4ee   :  { %v2811_v23 = vadd.f32 %v3592_v3, %v2787_v32  ;;  %v2812_v45 = vadd.f32 %v3593_v30, %v2788_v50  ;;  %v2820_v26 = vrot.slane %v5367_v57, %v4344_v8  ;;  %v2659_v62 = vrot.slane %v5552_v18, 2 }
 0x4ef   :  { %v2664_v54 = vmax.f32 %v2656_v12, %v2663_v35  ;;  %v2840_v46 = vrot.slane %v5315_v58, %v4372_v10  ;;  %v2844_v21 = vrot.slane %v5367_v57, %v4372_v10  ;;  %vm2821_vm12 = vcmp.lt.f32.partialorder %v2816_v40, %v5315_v58 }
 0x4f0   :  { %vm2822_vm4 = vcmp.lt.f32.partialorder %v2820_v26, %v5367_v57  ;;  %vm2829_vm14 = vcmp.le.f32.partialorder %v2816_v40, %v5315_v58  ;;  %vm2830_vm3 = vcmp.le.f32.partialorder %v2820_v26, %v5367_v57  ;;  %v3594_v43 = vsel %vm2821_vm12, 1.0, %v3779_v34 }
 0x4f1   :  { %v3595_v8 = vsel %vm2822_vm4, 1.0, %v3779_v34  ;;  %v3596_v12 = vsel %vm2829_vm14, 1.0, %v3779_v34  ;;  %v3597_v35 = vsel %vm2830_vm3, 1.0, %v3779_v34  ;;  %v2827_v44 = vadd.f32 %v3594_v43, %v2803_v63 }
 0x4f2   :  { %v2828_v39 = vadd.f32 %v3595_v8, %v2804_v24  ;;  %v2835_v41 = vadd.f32 %v3596_v12, %v2811_v23  ;;  %v2836_v10 = vadd.f32 %v3597_v35, %v2812_v45  ;;  %vm2845_vm5 = vcmp.lt.f32.partialorder %v2840_v46, %v5315_v58 }
 0x4f3   :  { %vm2846_vm6 = vcmp.lt.f32.partialorder %v2844_v21, %v5367_v57  ;;  %vm2853_vm15 = vcmp.le.f32.partialorder %v2840_v46, %v5315_v58  ;;  %vm2854_vm0 = vcmp.le.f32.partialorder %v2844_v21, %v5367_v57  ;;  %v3598_v33 = vsel %vm2845_vm5, 1.0, %v3779_v34 }
 0x4f4   :  { %v3599_v32 = vsel %vm2846_vm6, 1.0, %v3779_v34  ;;  %v3600_v2 = vsel %vm2853_vm15, 1.0, %v3779_v34  ;;  %v3601_v50 = vsel %vm2854_vm0, 1.0, %v3779_v34  ;;  %v2851_v53 = vadd.f32 %v3598_v33, %v2827_v44 }
 0x4f5   :  { %v2852_v20 = vadd.f32 %v3599_v32, %v2828_v39  ;;  %v2859_v63 = vadd.f32 %v3600_v2, %v2835_v41  ;;  %v2860_v24 = vadd.f32 %v3601_v50, %v2836_v10  ;;  %v2020_v3 = vrot.slane %v5137_v22, 2 }
 0x4f6   :  { %v2241_v30 = vrot.slane %v5501_v31, 2  ;;  %v2448_v23 = vmax.f32 %v5518_v56, %v2447_v0  ;;  %v2665_v45 = vrot.slane %v2664_v54, 2  ;;  %vm2861_vm7 = vcmp.le.f32.partialorder %v2851_v53, 3.0 }
 0x4f7   :  { %vm2862_vm8 = vcmp.le.f32.partialorder %v2852_v20, 3.0  ;;  %vm2863_vm1 = vcmp.gt.f32.partialorder %v2859_v63, 3.0  ;;  %vm2864_vm13 = vcmp.gt.f32.partialorder %v2860_v24, 3.0  ;;  %v1598_v40 = vrot.slane %v5098_v55, 1 }
 0x4f8   :  { %v2015_v34 = vmax.f32 %v5122_v37, %v2014_v7  ;;  %v2236_v26 = vmax.f32 %v5371_v51, %v2235_v47  ;;  %v2454_v46 = vmax.f32 %v5536_v25, %v2453_v36  ;;  %vm2865_vm9 = vmand %vm2861_vm7, %vm2863_vm1  ;;  %v5625_v56 = vmax.f32 %v5082_v27, %v1592_v4 }
 0x4f9   :  { %v1804_v0 = vrot.slane %v5102_v5, 1  ;;  %v2660_v21 = vmax.f32 %v5552_v18, %v2659_v62  ;;  %vm2866_vm11 = vmand %vm2862_vm8, %vm2864_vm13  ;;  %v2867_v37 = vsel %vm2865_vm9, %v5315_v58, -inf  ;;  %v2242_v7 = vmax.f32 %v5501_v31, %v2241_v30 }
 0x4fa   :  { %v2666_v51 = vmax.f32 %v2664_v54, %v2665_v45  ;;  %v2868_v47 = vsel %vm2866_vm11, %v5367_v57, -inf  ;;  %v2869_v43 = vrot.slane %v2867_v37, 4  ;;  %v1810_v25 = vrot.slane %v5106_v6, 1 }
 0x4fb   :  { %v2021_v36 = vmax.f32 %v5137_v22, %v2020_v3  ;;  %vm2024_vm10 = vcmask 1040384   ;;  %v2449_v27 = vrot.slane %v2448_v23, 1  ;;  %v2875_v4 = vrot.slane %v2868_v47, 4 }
 0x4fc   :  { %v2016_v8 = vrot.slane %v2015_v34, 1  ;;  %vm2027_vm2 = vcmask 1041408   ;;  %v2237_v12 = vrot.slane %v2236_v26, 1  ;;  %v2455_v18 = vrot.slane %v2454_v46, 1 }
 0x4fd   :  { %v2870_v62 = vmax.f32 %v2867_v37, %v2869_v43  ;;  %v2661_v35 = vrot.slane %v2660_v21, 1  ;;  %v2876_v44 = vmax.f32 %v2868_v47, %v2875_v4  ;;  %v1160_v31 = vadd.f32 %v5077_v19, %v4251_v17 }
 0x4fe   :  { %v1161_v54 = vadd.f32 %v5080_v28, %v4246_v1  ;;  %v2243_v39 = vrot.slane %v2242_v7, 1  ;;  %v2667_v41 = vrot.slane %v2666_v51, 1  ;;  %v1162_v22 = vadd.f32 %v5135_v29, %v4242_v16 }
 0x4ff   :  { %v2871_v10 = vrot.slane %v2870_v62, 2  ;;  %v2450_v33 = vmax.f32 %v2448_v23, %v2449_v27  ;;  %v2877_v32 = vrot.slane %v2876_v44, 2  ;;  %v1163_v2 = vadd.f32 %v5167_v48, %v4236_v15  ;;  %1168 = vst [vmem:[#allocation5] sm:$0xff] %v1160_v31 }
 0x500   :  { %v1164_v50 = vadd.f32 %v5299_v38, %v4231_v14  ;;  %1169 = vst [vmem:[#allocation5 + $0x8] sm:$0xff] %v1161_v54  ;;  %v1165_v1 = vadd.f32 %v5309_v49, %v4223_v13  ;;  %v1166_v53 = vadd.f32 %v5315_v58, %v4216_v11  ;;  %v1167_v16 = vadd.f32 %v5367_v57, %v4209_v9 }
 0x501   :  { %v2872_v17 = vmax.f32 %v2870_v62, %v2871_v10  ;;  %1170 = vst [vmem:[#allocation5 + $0x10] sm:$0xff] %v1162_v22  ;;  %v2022_v20 = vrot.slane %v2021_v36, 1  ;;  %v2456_v63 = vmax.f32 %v2454_v46, %v2455_v18  ;;  %v2662_v24 = vmax.f32 %v2660_v21, %v2661_v35  ;;  %1171 = vst [vmem:[#allocation5 + $0x18] sm:$0xff] %v1163_v2 }
 0x502   :  { %v2878_v15 = vmax.f32 %v2876_v44, %v2877_v32  ;;  %1172 = vst [vmem:[#allocation5 + $0x20] sm:$0xff] %v1164_v50  ;;  %v1599_v14 = vmax.f32 %v5098_v55, %v1598_v40  ;;  %v2238_v3 = vmax.f32 %v2236_v26, %v2237_v12  ;;  %v2668_v30 = vmax.f32 %v2666_v51, %v2667_v41  ;;  %v1088_v41 = vpop.f32.mrf.mxu0 }
 0x503   :  { %v2873_v23 = vrot.slane %v2872_v17, 1  ;;  %1173 = vst [vmem:[#allocation5 + $0x28] sm:$0xff] %v1165_v1  ;;  %1174 = vst [vmem:[#allocation5 + $0x30] sm:$0xff] %v1166_v53  ;;  %v1805_v11 = vmax.f32 %v5102_v5, %v1804_v0  ;;  %vm2030_vm12 = vcmask 1042432   ;;  %v2244_v13 = vmax.f32 %v2242_v7, %v2243_v39 }
 0x504   :  { %1175 = vst [vmem:[#allocation5 + $0x38] sm:$0xff] %v1167_v16  ;;  %v2879_v9 = vrot.slane %v2878_v15, 1  ;;  %v1811_v45 = vmax.f32 %v5106_v6, %v1810_v25  ;;  %v2017_v46 = vmax.f32 %v2015_v34, %v2016_v8  ;;  %v2881_v37 = vsel %vm2024_vm10, %v2238_v3, %v2450_v33  ;;  %v1090_v10 = vpop.f32.mrf.mxu0 }
 0x505   :  { %v2874_v21 = vmax.f32 %v2872_v17, %v2873_v23  ;;  %v2023_v47 = vmax.f32 %v2021_v36, %v2022_v20  ;;  %v2882_v55 = vsel %vm2024_vm10, %v2244_v13, %v2456_v63  ;;  %v2883_v40 = vsel %vm2027_vm2, %v2881_v37, %v2662_v24 }
 0x506   :  { %v2880_v43 = vmax.f32 %v2878_v15, %v2879_v9  ;;  %v2025_v26 = vsel %vm2024_vm10, %v5094_v42, %v5625_v56  ;;  %v2884_v5 = vsel %vm2027_vm2, %v2882_v55, %v2668_v30  ;;  %vm2893_vm4 = vcmask 1043456   ;;  %v1094_v22 = vpop.f32.mrf.mxu0 }
 0x507   :  { %v2885_v0 = vsel %vm2030_vm12, %v2883_v40, %v2874_v21  ;;  %v2026_v6 = vsel %vm2024_vm10, %v5096_v60, %v1599_v14  ;;  %v2028_v34 = vsel %vm2027_vm2, %v2025_v26, %v1805_v11  ;;  %v1095_v11 = vadd.f32 %v1094_v22, %v4652_v59 }
 0x508   :  { %v2886_v7 = vsel %vm2030_vm12, %v2884_v5, %v2880_v43  ;;  %v2889_v51 = vrot.slane %v2885_v0, 4  ;;  %v2029_v25 = vsel %vm2027_vm2, %v2026_v6, %v1811_v45  ;;  %v2031_v36 = vsel %vm2030_vm12, %v2028_v34, %v2017_v46  ;;  %v1096_v33 = vpop.f32.mrf.mxu0 }
 0x509   :  { %v2890_v27 = vrot.slane %v2886_v7, 4  ;;  %v2032_v42 = vsel %vm2030_vm12, %v2029_v25, %v2023_v47  ;;  %v1097_v3 = vadd.f32 %v1096_v33, %v5064_v52  ;;  %v1091_v45 = vadd.f32 %v1090_v10, %v5064_v52 }
 0x50a   :  { %v2894_v56 = vsel %vm2893_vm4, %v2031_v36, %v2889_v51  ;;  %v1100_v32 = vpop.f32.mrf.mxu0  ;;  %v1089_v37 = vadd.f32 %v1088_v41, %v4652_v59  ;;  %v1138_v47 = vmul.f32 %v5070_v61, %v1095_v11  ;;  %vm1121_vm0 = vcmp.gt.f32.partialorder %v1095_v11, 0.0 }
 0x50b   :  { %v2895_v4 = vsel %vm2893_vm4, %v2032_v42, %v2890_v27  ;;  %v2896_v8 = vsub.f32 0.0, %v2894_v56  ;;  %v1101_v24 = vadd.f32 %v1100_v32, %v4652_v59  ;;  %v1139_v46 = vmul.f32 %v5070_v61, %v1097_v3 }
 0x50c   :  { %v2897_v12 = vsub.f32 0.0, %v2895_v4  ;;  %v1102_v2 = vpop.f32.mrf.mxu0  ;;  %vm1122_vm15 = vcmp.gt.f32.partialorder %v1097_v3, 0.0  ;;  %v1137_v55 = vmul.f32 %v5070_v61, %v1091_v45  ;;  %vm1120_vm7 = vcmp.gt.f32.partialorder %v1091_v45, 0.0 }
 0x50d   :  { %v2898_v18 = vmul.f32 1.442695, %v2896_v8  ;;  %v1103_v63 = vadd.f32 %v1102_v2, %v5064_v52  ;;  %v1140_v13 = vmul.f32 %v5070_v61, %v1101_v24  ;;  %vm1123_vm6 = vcmp.gt.f32.partialorder %v1101_v24, 0.0 }
 0x50e   :  { %v2900_v62 = vmul.f32 1.442695, %v2897_v12  ;;  %v1106_v50 = vpop.f32.mrf.mxu0  ;;  %v1155_v40 = vsel %vm1122_vm15, %v1097_v3, %v1139_v46  ;;  %v1154_v26 = vsel %vm1121_vm0, %v1095_v11, %v1138_v47  ;;  %vm1119_vm8 = vcmp.gt.f32.partialorder %v1089_v37, 0.0 }
 0x50f   :  { %3733 = vpow2.f32 %v2898_v18  ;;  %v1107_v20 = vadd.f32 %v1106_v50, %v4652_v59  ;;  %v1141_v30 = vmul.f32 %v5070_v61, %v1103_v63  ;;  %vm1124_vm5 = vcmp.gt.f32.partialorder %v1103_v63, 0.0 }
 0x510   :  { %3735 = vpow2.f32 %v2900_v62  ;;  %v1108_v17 = vpop.f32.mrf.mxu0  ;;  %v1156_v43 = vsel %vm1123_vm6, %v1101_v24, %v1140_v13  ;;  %v1153_v5 = vsel %vm1120_vm7, %v1091_v45, %v1137_v55  ;;  %v3183_v59 = vstv %s3287_s29 }
 0x511   :  { %v1109_v1 = vadd.f32 %v1108_v17, %v5064_v52  ;;  %v1142_v15 = vmul.f32 %v5070_v61, %v1107_v20  ;;  %vm1125_vm3 = vcmp.gt.f32.partialorder %v1107_v20, 0.0  ;;  %v1157_v21 = vsel %vm1124_vm5, %v1103_v63, %v1141_v30 }
 0x512   :  { %v1136_v52 = vmul.f32 %v5070_v61, %v1089_v37  ;;  %vm3185_vm1 = vcmask 57344  }
 0x513   :  { %v1143_v53 = vmul.f32 %v5070_v61, %v1109_v1  ;;  %vm1126_vm14 = vcmp.gt.f32.partialorder %v1109_v1, 0.0  ;;  %v1158_v9 = vsel %vm1125_vm3, %v1107_v20, %v1142_v15 }
 0x514   :  { %v1152_v0 = vsel %vm1119_vm8, %v1089_v37, %v1136_v52 }
 0x515   :  { %v1159_v16 = vsel %vm1126_vm14, %v1109_v1, %v1143_v53 }
 0x516   :  { %3129 = vmatprep.subr.mxu0 %v1159_v16 }
 0x51c   :  { %v3734_v60 = vpop.eup %3733 }
 0x51d   :  { %v3736_v35 = vpop.eup %3735  ;;  %v2902_v44 = vadd.f32 1.0, %v3734_v60 }
 0x51e   :  { %v2903_v31 = vadd.f32 1.0, %v3736_v35 }
 0x520   :  { %3737 = vrcp.f32 %v2903_v31 }
 0x521   :  { %3739 = vrcp.f32 %v2902_v44 }
 0x52d   :  { %v3738_v54 = vpop.eup %3737 }
 0x52e   :  { %v3740_v39 = vpop.eup %3739  ;;  %3036 = vmatprep.mubr.f32.mxu1 %v3738_v54 }
 0x52f   :  { %3037 = vmatmul.mubr.f32.vlgmr.msra.gmra.mxu1 %v3740_v39 }
 0x5ef   :  { %v3038_v14 = vpop.f32.mrf.mxu1 }
 0x5f1   :  { %v3040_v23 = vpop.f32.mrf.mxu1 }
 0x5f2   :  { %3107 = vmatprep.mubr.f32.mxu0 %v3040_v23 }
 0x5f3   :  { %3108 = vmatmul.mubr.f32.vlgmr.msra.gmra.mxu0 %v3038_v14 }
 0x5f4   :  { %3130 = vmatpush1.xpose.msra.mxu0 %v1158_v9  ;;  %3177 = vmatprep.mubr.f32.mxu0 %v3040_v23 }
 0x5f5   :  { %3131 = vmatprep.subr.mxu0 %v1157_v21 }
 0x5f8   :  { %3132 = vmatpush1.xpose.msra.mxu0 %v1156_v43 }
 0x5f9   :  { %3133 = vmatprep.subr.mxu0 %v1155_v40 }
 0x5fc   :  { %3134 = vmatpush1.xpose.msra.mxu0 %v1154_v26 }
 0x5fd   :  { %3135 = vmatprep.subr.mxu0 %v1153_v5 }
 0x600   :  { %3136 = vmatpush1.xpose.msra.mxu0 %v1152_v0 }
 0x601   :  { %3137 = vmatprep.subr.mxu0 %v5367_v57 }
 0x604   :  { %3138 = vmatpush1.xpose.msra.mxu0 %v5315_v58 }
 0x605   :  { %3139 = vmatprep.subr.mxu0 %v5309_v49 }
 0x608   :  { %3140 = vmatpush1.xpose.msra.mxu0 %v5299_v38 }
 0x609   :  { %3141 = vmatprep.subr.mxu0 %v5167_v48 }
 0x60c   :  { %3142 = vmatpush1.xpose.msra.mxu0 %v5135_v29 }
 0x60d   :  { %3143 = vmatprep.subr.mxu0 %v5080_v28 }
 0x610   :  { %3144 = vmatpush1.xpose.msra.mxu0 %v5077_v19 }
 0x613   :  { %3178 = vmatmul.mubr.f32.vlgmr.msra.gmra.mxu0 %v3038_v14 }
 0x6b3   :  { %v3109_v61 = vpop.f32.mrf.mxu0 }
 0x6b4   :  { %v3187_v6 = vadd.f32 %v3183_v59, %v3109_v61 }
 0x6b5   :  { %v3111_v57 = vpop.f32.mrf.mxu0 }
 0x6b6   :  { %3189 = vrot.lane.b32.xlu0 %v3187_v6, %s3780_s6 }
 0x6ba   :  { %3200 = vrot.lane.b32.xlu0 %v3187_v6, %s3781_s8 }
 0x6be   :  { %3210 = vrot.lane.b32.xlu0 %v3187_v6, %s3782_s30 }
 0x6c2   :  { %3220 = vrot.lane.b32.xlu0 %v3187_v6, %s3783_s5 }
 0x6c6   :  { %3230 = vrot.lane.b32.xlu0 %v3187_v6, %s3784_s14 }
 0x6ca   :  { %3240 = vrot.lane.b32.xlu0 %v3187_v6, %s3785_s15 }
 0x6ce   :  { %3250 = vrot.lane.b32.xlu0 %v3187_v6, %s3786_s7 }
 0x6d2   :  { %3260 = vrot.lane.b32.xlu0 %v3187_v6, %s3787_s16 }
 0x6d3   :  { %v3179_v19 = vpop.f32.mrf.mxu0 }
 0x6d4   :  { %v3184_v28 = vadd.f32 %v3183_v59, %v3179_v19 }
 0x6d5   :  { %v3181_v29 = vpop.f32.mrf.mxu0 }
 0x6d6   :  { %3195 = vrot.lane.b32.xlu1 %v3184_v28, %s3788_s11  ;;  %3186 = vst.msk [vmem:[%s5761_s12] sm:$0x1] %vm3185_vm1, %v3184_v28 }
 0x6da   :  { %3205 = vrot.lane.b32.xlu1 %v3184_v28, %s3789_s18 }
 0x6de   :  { %3215 = vrot.lane.b32.xlu1 %v3184_v28, %s3780_s6 }
 0x6e2   :  { %3225 = vrot.lane.b32.xlu1 %v3184_v28, %s3790_s0 }
 0x6e3   :  { %3764 = shalt.err (!%p3761_p9)
}
 0x6e4   :  { %s3792_s21 = smov 256   ;;  %s3793_s23 = smov 72   ;;  %vm3192_vm13 = vcmask 127044   ;;  %vm3198_vm9 = vcmask 188544   ;;  %vm3203_vm11 = vcmask 258244   ;;  %vm3208_vm10 = vcmask 320769  }
 0x6e5   :  { %3278 = dma.vmem_to_hbm [thread:$0]  %s3273_s19, 1024, %s5762_s13, [#allocation3], %s3792_s21, %s3792_s21, %s3783_s5   ;;  %vm3213_vm2 = vcmask 390469   ;;  %vm3218_vm12 = vcmask 451969   ;;  %vm3223_vm4 = vcmask 521669   ;;  %vm3228_vm14 = vcmask 584194  }
 0x6e6   :  { %3235 = vrot.lane.b32.xlu1 %v3184_v28, %s3782_s30  ;;  %vm3233_vm3 = vcmask 653894   ;;  %vm3238_vm5 = vcmask 715394   ;;  %vm3243_vm6 = vcmask 785094   ;;  %vm3248_vm15 = vcmask 847619  }
 0x6e7   :  { %vm3253_vm0 = vcmask 917319   ;;  %vm3258_vm7 = vcmask 978819   ;;  %vm3263_vm8 = vcmask 1048519  }
 0x6ea   :  { %3245 = vrot.lane.b32.xlu1 %v3184_v28, %s3793_s23 }
 0x6ee   :  { %3255 = vrot.lane.b32.xlu1 %v3184_v28, %s3784_s14 }
 0x728   :  { %v3190_v48 = vpop.permute.xlu0 %3189 }
 0x729   :  { %3193 = vst.msk [vmem:[%s5761_s12 - $0x4] sm:$0x10] %vm3192_vm13, %v3190_v48 }
 0x72c   :  { %v3201_v38 = vpop.permute.xlu0 %3200 }
 0x730   :  { %v3211_v49 = vpop.permute.xlu0 %3210 }
 0x734   :  { %v3221_v34 = vpop.permute.xlu0 %3220 }
 0x738   :  { %v3231_v51 = vpop.permute.xlu0 %3230 }
 0x73c   :  { %v3241_v27 = vpop.permute.xlu0 %3240 }
 0x740   :  { %v3251_v56 = vpop.permute.xlu0 %3250 }
 0x744   :  { %v3261_v12 = vpop.permute.xlu0 %3260 }
 0x748   :  { %v3196_v58 = vpop.permute.xlu1 %3195 }
 0x749   :  { %3199 = vst.msk [vmem:[%s5761_s12] sm:$0x1] %vm3198_vm9, %v3196_v58 }
 0x74a   :  { %3204 = vst.msk [vmem:[%s5761_s12 - $0x4] sm:$0x10] %vm3203_vm11, %v3201_v38 }
 0x74c   :  { %v3206_v7 = vpop.permute.xlu1 %3205 }
 0x74d   :  { %3209 = vst.msk [vmem:[%s5761_s12 - $0x1] sm:$0x2] %vm3208_vm10, %v3206_v7 }
 0x74e   :  { %3214 = vst.msk [vmem:[%s5761_s12 - $0x5] sm:$0x20] %vm3213_vm2, %v3211_v49 }
 0x750   :  { %v3216_v25 = vpop.permute.xlu1 %3215 }
 0x751   :  { %3219 = vst.msk [vmem:[%s5761_s12 - $0x1] sm:$0x2] %vm3218_vm12, %v3216_v25 }
 0x752   :  { %3224 = vst.msk [vmem:[%s5761_s12 - $0x5] sm:$0x20] %vm3223_vm4, %v3221_v34 }
 0x754   :  { %v3226_v36 = vpop.permute.xlu1 %3225 }
 0x755   :  { %3229 = vst.msk [vmem:[%s5761_s12 - $0x2] sm:$0x4] %vm3228_vm14, %v3226_v36 }
 0x756   :  { %3234 = vst.msk [vmem:[%s5761_s12 - $0x6] sm:$0x40] %vm3233_vm3, %v3231_v51 }
 0x758   :  { %v3236_v42 = vpop.permute.xlu1 %3235 }
 0x759   :  { %3239 = vst.msk [vmem:[%s5761_s12 - $0x2] sm:$0x4] %vm3238_vm5, %v3236_v42 }
 0x75a   :  { %3244 = vst.msk [vmem:[%s5761_s12 - $0x6] sm:$0x40] %vm3243_vm6, %v3241_v27 }
 0x75c   :  { %v3246_v4 = vpop.permute.xlu1 %3245 }
 0x75d   :  { %3249 = vst.msk [vmem:[%s5761_s12 - $0x3] sm:$0x8] %vm3248_vm15, %v3246_v4 }
 0x75e   :  { %3254 = vst.msk [vmem:[%s5761_s12 - $0x7] sm:$0x80] %vm3253_vm0, %v3251_v56 }
 0x760   :  { %v3256_v8 = vpop.permute.xlu1 %3255 }
 0x761   :  { %3259 = vst.msk [vmem:[%s5761_s12 - $0x3] sm:$0x8] %vm3258_vm7, %v3256_v8 }
 0x762   :  { %3264 = vst.msk [vmem:[%s5761_s12 - $0x7] sm:$0x80] %vm3263_vm8, %v3261_v12 }
 0x763   :  { %3775 = dma.done.wait [#allocation3], 1024  }
 0x764   :  { %3776 = vsyncadd [#allocation3], 4294966272 }
 0x765   :  { %3284 = vsyncpa [#allocation3], 1 }
 0x766   :  { %3285 = vsyncpa [#allocation4], 1 }

</bundles_post_ra>
